<compile_context>
chip_gen: v6e
topology: v6e:2x2x1
jax: 0.10.0
libtpu: 0.0.40
codegen_flags: <defaults>
</compile_context>

<pallas_src>
import functools

import jax
import jax.numpy as jnp
from jax import lax
from jax.experimental import pallas as pl
from jax.experimental.pallas import tpu as pltpu


def _round_up(x, m):
    return ((x + m - 1) // m) * m


def _sigmoid(x):
    # sigmoid(x) == 0.5 * tanh(0.5 * x) + 0.5  -> one EUP op per gate.
    return 0.5 * jnp.tanh(0.5 * x) + 0.5


# ----------------------------------------------------------------------------
# Fused multi-layer LSTM kernel: single pallas_call; layer loop and time loop
# both live inside the kernel, (h, c) state kept in VMEM scratch, intermediate
# layer activations kept in the output VMEM block (never round-trip to HBM).
# ----------------------------------------------------------------------------
def _lstm_stack_kernel(x_ref, h0_ref, c0_ref, w_ref, b_ref,
                       y_ref, hT_ref, cT_ref,
                       h_sc, c_sc, xh_sc, w_sc, b_sc):
    seq = y_ref.shape[0]
    num_layer = h0_ref.shape[0]
    hid = h0_ref.shape[-1]            # padded hidden (multiple of 128)

    # Working buffer for the layer stack is the output block itself (VMEM):
    # layer l reads timestep activations from y_ref and overwrites them.
    y_ref[...] = x_ref[...]

    def layer_body(l, carry):
        # Load this layer's fused weight / bias once (loop-invariant for time).
        w_sc[...] = w_ref[l]          # (2*hid, 4*hid) = [W_ih^T ; W_hh^T]
        b_sc[...] = b_ref[l]          # (1, 4*hid)     = b_ih + b_hh
        h_sc[...] = h0_ref[l]
        c_sc[...] = c0_ref[l]

        def step(t, carry2):
            # Fused gate matmul: [x_t, h] @ W  (single MXU push per step).
            xh_sc[:, :hid] = y_ref[t]
            xh_sc[:, hid:] = h_sc[...]
            gates = jnp.dot(xh_sc[...], w_sc[...],
                            preferred_element_type=jnp.float32) + b_sc[...]
            # Gate slices are 128-lane aligned (hid is a multiple of 128).
            i_g = _sigmoid(gates[:, 0 * hid:1 * hid])
            f_g = _sigmoid(gates[:, 1 * hid:2 * hid])
            g_g = jnp.tanh(gates[:, 2 * hid:3 * hid])
            o_g = _sigmoid(gates[:, 3 * hid:4 * hid])
            c_new = f_g * c_sc[...] + i_g * g_g
            h_new = o_g * jnp.tanh(c_new)
            h_sc[...] = h_new
            c_sc[...] = c_new
            y_ref[t] = h_new
            return carry2

        lax.fori_loop(0, seq, step, 0, unroll=(seq <= 16))

        # Final state written exactly once per layer.
        hT_ref[l] = h_sc[...]
        cT_ref[l] = c_sc[...]
        return carry

    lax.fori_loop(0, num_layer, layer_body, 0)


def lstm_stack(x, h0, c0, w_stack, b_stack, *, block_b):
    """x: (seq, b_pad, hid_pad); h0/c0: (L, b_pad, hid_pad);
    w_stack: (L, 2*hid_pad, 4*hid_pad); b_stack: (L, 1, 4*hid_pad)."""
    seq, b_pad, hid = x.shape
    num_layer = h0.shape[0]
    nb = b_pad // block_b

    grid_spec = pltpu.PrefetchScalarGridSpec(
        num_scalar_prefetch=0,
        grid=(nb,),                                   # independent batch blocks
        in_specs=[
            pl.BlockSpec((seq, block_b, hid), lambda i: (0, i, 0)),        # x
            pl.BlockSpec((num_layer, block_b, hid), lambda i: (0, i, 0)),  # h0
            pl.BlockSpec((num_layer, block_b, hid), lambda i: (0, i, 0)),  # c0
            pl.BlockSpec((num_layer, 2 * hid, 4 * hid), lambda i: (0, 0, 0)),  # W
            pl.BlockSpec((num_layer, 1, 4 * hid), lambda i: (0, 0, 0)),        # b
        ],
        out_specs=[
            pl.BlockSpec((seq, block_b, hid), lambda i: (0, i, 0)),        # y
            pl.BlockSpec((num_layer, block_b, hid), lambda i: (0, i, 0)),  # hT
            pl.BlockSpec((num_layer, block_b, hid), lambda i: (0, i, 0)),  # cT
        ],
        scratch_shapes=[
            pltpu.VMEM((block_b, hid), jnp.float32),       # h
            pltpu.VMEM((block_b, hid), jnp.float32),       # c
            pltpu.VMEM((block_b, 2 * hid), jnp.float32),   # [x_t, h]
            pltpu.VMEM((2 * hid, 4 * hid), jnp.float32),   # current layer W
            pltpu.VMEM((1, 4 * hid), jnp.float32),         # current layer b
        ],
    )

    y, hT, cT = pl.pallas_call(
        _lstm_stack_kernel,
        out_shape=(
            jax.ShapeDtypeStruct((seq, b_pad, hid), jnp.float32),
            jax.ShapeDtypeStruct((num_layer, b_pad, hid), jnp.float32),
            jax.ShapeDtypeStruct((num_layer, b_pad, hid), jnp.float32),
        ),
        grid_spec=grid_spec,
        compiler_params=pltpu.CompilerParams(
            dimension_semantics=("parallel",),          # batch blocks independent
            vmem_limit_bytes=32 * 1024 * 1024,
        ),
    )(x, h0, c0, w_stack, b_stack)
    return y, hT, cT


# ----------------------------------------------------------------------------
# Tied Linear decoder: tiled (N, H) @ (H, V) + bias, weight pre-transposed.
# ----------------------------------------------------------------------------
def _decoder_kernel(x_ref, w_ref, b_ref, o_ref):
    o_ref[...] = (jnp.dot(x_ref[...], w_ref[...],
                          preferred_element_type=jnp.float32)
                  + b_ref[...]).astype(o_ref.dtype)


def decoder(x_flat, w_t, b_row, *, block_n, block_v):
    """x_flat: (n_pad, hid_pad); w_t: (hid_pad, v_pad); b_row: (1, v_pad)."""
    n_pad, hid = x_flat.shape
    v_pad = w_t.shape[1]
    grid = (n_pad // block_n, v_pad // block_v)
    return pl.pallas_call(
        _decoder_kernel,
        out_shape=jax.ShapeDtypeStruct((n_pad, v_pad), jnp.float32),
        grid_spec=pltpu.PrefetchScalarGridSpec(
            num_scalar_prefetch=0,
            grid=grid,
            in_specs=[
                pl.BlockSpec((block_n, hid), lambda i, j: (i, 0)),
                pl.BlockSpec((hid, block_v), lambda i, j: (0, j)),
                pl.BlockSpec((1, block_v), lambda i, j: (0, j)),
            ],
            out_specs=pl.BlockSpec((block_n, block_v), lambda i, j: (i, j)),
        ),
        compiler_params=pltpu.CompilerParams(
            dimension_semantics=("parallel", "parallel"),
            vmem_limit_bytes=32 * 1024 * 1024,
        ),
    )(x_flat, w_t, b_row)


# ----------------------------------------------------------------------------
# Parameters: PyTorch-layout init + one-time packing (transpose/fuse/pad).
# ----------------------------------------------------------------------------
def init_params(key, num_token, num_input, num_hidden, num_layer):
    assert num_hidden == num_input
    keys = jax.random.split(key, 1 + 4 * num_layer)
    weight_range = 0.1
    emb = jax.random.uniform(keys[0], (num_token, num_input),
                             minval=-weight_range, maxval=weight_range,
                             dtype=jnp.float32)
    dec_b = jnp.zeros((num_token,), jnp.float32)

    stdv = 1.0 / float(num_hidden) ** 0.5      # PyTorch nn.LSTM default init
    layers = []
    for l in range(num_layer):
        kin = num_input if l == 0 else num_hidden
        k0, k1, k2, k3 = keys[1 + 4 * l:1 + 4 * (l + 1)]
        w_ih = jax.random.uniform(k0, (4 * num_hidden, kin),
                                  minval=-stdv, maxval=stdv, dtype=jnp.float32)
        w_hh = jax.random.uniform(k1, (4 * num_hidden, num_hidden),
                                  minval=-stdv, maxval=stdv, dtype=jnp.float32)
        b_ih = jax.random.uniform(k2, (4 * num_hidden,),
                                  minval=-stdv, maxval=stdv, dtype=jnp.float32)
        b_hh = jax.random.uniform(k3, (4 * num_hidden,),
                                  minval=-stdv, maxval=stdv, dtype=jnp.float32)
        layers.append((w_ih, w_hh, b_ih, b_hh))
    return {"embedding": emb, "layers": layers, "dec_bias": dec_b}


def _pack_gate_weight(w, hid, hid_pad):
    # w: (4*hid, k) PyTorch layout, gates [i, f, g, o] stacked along dim 0.
    # Returns (hid_pad, 4*hid_pad): transposed, each gate block zero-padded to
    # hid_pad lanes so in-kernel gate slices land on 128-lane boundaries.
    k = w.shape[1]
    wt = jnp.transpose(w).reshape(k, 4, hid)
    wt = jnp.pad(wt, ((0, hid_pad - k), (0, 0), (0, hid_pad - hid)))
    return wt.reshape(hid_pad, 4 * hid_pad)


def _pack_gate_bias(b, hid, hid_pad):
    return jnp.pad(b.reshape(4, hid),
                   ((0, 0), (0, hid_pad - hid))).reshape(1, 4 * hid_pad)


def pack_params(params, num_hidden):
    hid_pad = _round_up(num_hidden, 128)
    num_token = params["embedding"].shape[0]
    tok_pad = _round_up(num_token, 128)

    w_stack, b_stack = [], []
    for (w_ih, w_hh, b_ih, b_hh) in params["layers"]:
        wx = _pack_gate_weight(w_ih, num_hidden, hid_pad)   # (hid_pad, 4*hid_pad)
        wh = _pack_gate_weight(w_hh, num_hidden, hid_pad)
        w_stack.append(jnp.concatenate([wx, wh], axis=0))   # (2*hid_pad, 4*hid_pad)
        b_stack.append(_pack_gate_bias(b_ih + b_hh, num_hidden, hid_pad))
    w_stack = jnp.stack(w_stack)                            # (L, 2*hid_pad, 4*hid_pad)
    b_stack = jnp.stack(b_stack)                            # (L, 1, 4*hid_pad)

    emb = params["embedding"]                               # (V, H) tied weight
    emb_pad = jnp.pad(emb, ((0, 0), (0, hid_pad - num_hidden)))
    dec_w = jnp.pad(jnp.transpose(emb),                     # (H, V) -> (hid_pad, tok_pad)
                    ((0, hid_pad - num_hidden), (0, tok_pad - num_token)))
    dec_b = jnp.pad(params["dec_bias"], (0, tok_pad - num_token)).reshape(1, tok_pad)
    return {"emb_pad": emb_pad, "w_stack": w_stack, "b_stack": b_stack,
            "dec_w": dec_w, "dec_b": dec_b}


# ----------------------------------------------------------------------------
# Forward pass (matches LSTMModel.forward, eval-mode dropout = identity)
# ----------------------------------------------------------------------------
@functools.partial(jax.jit, static_argnames=("num_token",))
def lstm_model_forward(tokens, h0, c0, packed, *, num_token):
    """tokens: (seq, batch) int32; h0/c0: (num_layers, batch, num_hidden)."""
    seq, batch = tokens.shape
    num_layer, _, num_hidden = h0.shape
    hid_pad = packed["emb_pad"].shape[1]
    tok_pad = packed["dec_w"].shape[1]

    # Batch padding / parallel block choice (sublane-dense; blocks usable by
    # v7x's second TensorCore at larger batch sizes).
    b_pad = _round_up(batch, 8)
    if b_pad > 64:
        block_b = 64
        b_pad = _round_up(batch, 64)
    else:
        block_b = b_pad

    # Encoder (embedding gather, plain-JAX glue) + eval-mode dropout (identity).
    x = jnp.take(packed["emb_pad"], tokens, axis=0)          # (seq, batch, hid_pad)
    x = jnp.pad(x, ((0, 0), (0, b_pad - batch), (0, 0)))
    h0p = jnp.pad(h0, ((0, 0), (0, b_pad - batch), (0, hid_pad - num_hidden)))
    c0p = jnp.pad(c0, ((0, 0), (0, b_pad - batch), (0, hid_pad - num_hidden)))

    y, hT, cT = lstm_stack(x, h0p, c0p, packed["w_stack"], packed["b_stack"],
                           block_b=block_b)

    hN = hT[:, :batch, :num_hidden]
    cN = cT[:, :batch, :num_hidden]

    # Tied decoder (dropout before it is identity in eval mode).
    y_real = y[:, :batch, :]                                 # (seq, batch, hid_pad)
    n = seq * batch
    block_n = 128 if n >= 128 else _round_up(n, 8)
    n_pad = _round_up(n, block_n)
    x_flat = jnp.pad(y_real.reshape(n, hid_pad), ((0, n_pad - n), (0, 0)))

    if tok_pad % 512 == 0:
        block_v = 512
    elif tok_pad % 256 == 0:
        block_v = 256
    else:
        block_v = 128

    decoded_pad = decoder(x_flat, packed["dec_w"], packed["dec_b"],
                          block_n=block_n, block_v=block_v)
    decoded = decoded_pad[:n, :num_token].reshape(seq, batch, num_token)
    return decoded, (hN, cN)


if __name__ == "__main__":
    num_token = 16
    num_input = num_hidden = 32
    num_layer = 2
    seq_len = 8
    batch = 4

    key = jax.random.PRNGKey(0)
    k_param, k_tok = jax.random.split(key)
    params = init_params(k_param, num_token, num_input, num_hidden, num_layer)
    packed = pack_params(params, num_hidden)

    tokens = jax.random.randint(k_tok, (seq_len, batch), 0, num_token, dtype=jnp.int32)
    h0 = jnp.zeros((num_layer, batch, num_hidden), jnp.float32)
    c0 = jnp.zeros((num_layer, batch, num_hidden), jnp.float32)

    decoded, (hN, cN) = lstm_model_forward(tokens, h0, c0, packed,
                                           num_token=num_token)
    jax.block_until_ready((decoded, hN, cN))

    assert decoded.shape == (seq_len, batch, num_token)
    assert hN.shape == (num_layer, batch, num_hidden)
    assert cN.shape == (num_layer, batch, num_hidden)
    assert bool(jnp.all(jnp.isfinite(decoded)))
    print("KERNEL_OK")
</pallas_src>

<mosaic_0001>
module attributes {stable_mosaic.version = 11 : i64} {
  func.func @_decoder_kernel(%arg0: i32, %arg1: i32, %arg2: memref<32x128xf32, #tpu.memory_space<vmem>>, %arg3: memref<128x128xf32, #tpu.memory_space<vmem>>, %arg4: memref<1x128xf32, #tpu.memory_space<vmem>>, %arg5: memref<32x128xf32, #tpu.memory_space<vmem>>) attributes {dimension_semantics = [#tpu.dimension_semantics<parallel>, #tpu.dimension_semantics<parallel>], iteration_bounds = array<i64: 1, 1>, scalar_prefetch = 0 : i64, scratch_operands = 0 : i64, tpu.core_type = #tpu.core_type<tc>, window_params = [{transform_indices = @transform_0, window_bounds = array<i64: 32, 128>}, {transform_indices = @transform_1, window_bounds = array<i64: 128, 128>}, {transform_indices = @transform_2, window_bounds = array<i64: 1, 128>}, {transform_indices = @transform_3, window_bounds = array<i64: 32, 128>}]} {
    %c0 = arith.constant 0 : index
    %c0_0 = arith.constant 0 : index
    %0 = vector.load %arg2[%c0, %c0_0] : memref<32x128xf32, #tpu.memory_space<vmem>>, vector<32x128xf32>
    %c0_1 = arith.constant 0 : index
    %c0_2 = arith.constant 0 : index
    %1 = vector.load %arg3[%c0_1, %c0_2] : memref<128x128xf32, #tpu.memory_space<vmem>>, vector<128x128xf32>
    %cst = arith.constant dense<0.000000e+00> : vector<32x128xf32>
    %2 = tpu.matmul %0, %1, %cst {dimension_numbers = #tpu.dot_dimension_numbers<[1], [0], [0], [1], [0, 0, 1, 1], [], []>} : vector<32x128xf32>, vector<128x128xf32>, vector<32x128xf32> -> vector<32x128xf32>
    %c0_3 = arith.constant 0 : index
    %c0_4 = arith.constant 0 : index
    %3 = vector.load %arg4[%c0_3, %c0_4] : memref<1x128xf32, #tpu.memory_space<vmem>>, vector<1x128xf32>
    %4 = vector.broadcast %3 : vector<1x128xf32> to vector<32x128xf32>
    %5 = arith.addf %2, %4 : vector<32x128xf32>
    %c0_5 = arith.constant 0 : index
    %c0_6 = arith.constant 0 : index
    %6 = vector.load %arg5[%c0_5, %c0_6] : memref<32x128xf32, #tpu.memory_space<vmem>>, vector<32x128xf32>
    tpu.vector_store %arg5[%c0_5, %c0_6], %5 {strides = array<i32>} : memref<32x128xf32, #tpu.memory_space<vmem>>, vector<32x128xf32>,
    return
  }
  func.func @transform_0(%arg0: i32, %arg1: i32) -> (i32, i32) {
    %c0_i32 = arith.constant 0 : i32
    %c0_i32_0 = arith.constant 0 : i32
    return %arg0, %c0_i32 : i32, i32
  }
  func.func @transform_1(%arg0: i32, %arg1: i32) -> (i32, i32) {
    %c0_i32 = arith.constant 0 : i32
    %c0_i32_0 = arith.constant 0 : i32
    return %c0_i32, %arg1 : i32, i32
  }
  func.func @transform_2(%arg0: i32, %arg1: i32) -> (i32, i32) {
    %c0_i32 = arith.constant 0 : i32
    %c0_i32_0 = arith.constant 0 : i32
    return %c0_i32, %arg1 : i32, i32
  }
  func.func @transform_3(%arg0: i32, %arg1: i32) -> (i32, i32) {
    %c0_i32 = arith.constant 0 : i32
    return %arg0, %arg1 : i32, i32
  }
}

module attributes {stable_mosaic.version = 11 : i64} {
  func.func @_lstm_stack_kernel(%arg0: i32, %arg1: memref<8x8x128xf32, #tpu.memory_space<vmem>>, %arg2: memref<2x8x128xf32, #tpu.memory_space<vmem>>, %arg3: memref<2x8x128xf32, #tpu.memory_space<vmem>>, %arg4: memref<2x256x512xf32, #tpu.memory_space<vmem>>, %arg5: memref<2x1x512xf32, #tpu.memory_space<vmem>>, %arg6: memref<8x8x128xf32, #tpu.memory_space<vmem>>, %arg7: memref<2x8x128xf32, #tpu.memory_space<vmem>>, %arg8: memref<2x8x128xf32, #tpu.memory_space<vmem>>, %arg9: memref<8x128xf32, #tpu.memory_space<vmem>>, %arg10: memref<8x128xf32, #tpu.memory_space<vmem>>, %arg11: memref<8x256xf32, #tpu.memory_space<vmem>>, %arg12: memref<256x512xf32, #tpu.memory_space<vmem>>, %arg13: memref<1x512xf32, #tpu.memory_space<vmem>>) attributes {dimension_semantics = [#tpu.dimension_semantics<parallel>], iteration_bounds = array<i64: 1>, scalar_prefetch = 0 : i64, scratch_operands = 5 : i64, tpu.core_type = #tpu.core_type<tc>, window_params = [{transform_indices = @transform_0, window_bounds = array<i64: 8, 8, 128>}, {transform_indices = @transform_1, window_bounds = array<i64: 2, 8, 128>}, {transform_indices = @transform_2, window_bounds = array<i64: 2, 8, 128>}, {pipeline_mode = #tpu.pipeline_mode<synchronous>, transform_indices = @transform_3, window_bounds = array<i64: 2, 256, 512>}, {pipeline_mode = #tpu.pipeline_mode<synchronous>, transform_indices = @transform_4, window_bounds = array<i64: 2, 1, 512>}, {transform_indices = @transform_5, window_bounds = array<i64: 8, 8, 128>}, {transform_indices = @transform_6, window_bounds = array<i64: 2, 8, 128>}, {transform_indices = @transform_7, window_bounds = array<i64: 2, 8, 128>}]} {
    %c0 = arith.constant 0 : index
    %c0_0 = arith.constant 0 : index
    %c0_1 = arith.constant 0 : index
    %0 = vector.load %arg1[%c0, %c0_0, %c0_1] : memref<8x8x128xf32, #tpu.memory_space<vmem>>, vector<8x8x128xf32>
    %c0_2 = arith.constant 0 : index
    %c0_3 = arith.constant 0 : index
    %c0_4 = arith.constant 0 : index
    %1 = vector.load %arg6[%c0_2, %c0_3, %c0_4] : memref<8x8x128xf32, #tpu.memory_space<vmem>>, vector<8x8x128xf32>
    tpu.vector_store %arg6[%c0_2, %c0_3, %c0_4], %0 {strides = array<i32>} : memref<8x8x128xf32, #tpu.memory_space<vmem>>, vector<8x8x128xf32>,
    %c0_i32 = arith.constant 0 : i32
    %c2_i32 = arith.constant 2 : i32
    %2 = arith.addi %c0_i32, %c2_i32 : i32
    %c1_i32 = arith.constant 1 : i32
    scf.for %arg14 = %c0_i32 to %2 step %c1_i32  : i32 {
      %3 = arith.index_cast %arg14 : i32 to index
      %c0_6 = arith.constant 0 : index
      %c0_7 = arith.constant 0 : index
      %4 = vector.load %arg4[%3, %c0_6, %c0_7] : memref<2x256x512xf32, #tpu.memory_space<vmem>>, vector<1x256x512xf32>
      %5 = vector.shape_cast %4 : vector<1x256x512xf32> to vector<256x512xf32>
      %c0_8 = arith.constant 0 : index
      %c0_9 = arith.constant 0 : index
      %6 = vector.load %arg12[%c0_8, %c0_9] : memref<256x512xf32, #tpu.memory_space<vmem>>, vector<256x512xf32>
      tpu.vector_store %arg12[%c0_8, %c0_9], %5 {strides = array<i32>} : memref<256x512xf32, #tpu.memory_space<vmem>>, vector<256x512xf32>,
      %7 = arith.index_cast %arg14 : i32 to index
      %c0_10 = arith.constant 0 : index
      %c0_11 = arith.constant 0 : index
      %8 = vector.load %arg5[%7, %c0_10, %c0_11] : memref<2x1x512xf32, #tpu.memory_space<vmem>>, vector<1x1x512xf32>
      %9 = vector.shape_cast %8 : vector<1x1x512xf32> to vector<1x512xf32>
      %c0_12 = arith.constant 0 : index
      %c0_13 = arith.constant 0 : index
      %10 = vector.load %arg13[%c0_12, %c0_13] : memref<1x512xf32, #tpu.memory_space<vmem>>, vector<1x512xf32>
      tpu.vector_store %arg13[%c0_12, %c0_13], %9 {strides = array<i32>} : memref<1x512xf32, #tpu.memory_space<vmem>>, vector<1x512xf32>,
      %11 = arith.index_cast %arg14 : i32 to index
      %c0_14 = arith.constant 0 : index
      %c0_15 = arith.constant 0 : index
      %12 = vector.load %arg2[%11, %c0_14, %c0_15] : memref<2x8x128xf32, #tpu.memory_space<vmem>>, vector<1x8x128xf32>
      %13 = vector.shape_cast %12 : vector<1x8x128xf32> to vector<8x128xf32>
      %c0_16 = arith.constant 0 : index
      %c0_17 = arith.constant 0 : index
      %14 = vector.load %arg9[%c0_16, %c0_17] : memref<8x128xf32, #tpu.memory_space<vmem>>, vector<8x128xf32>
      tpu.vector_store %arg9[%c0_16, %c0_17], %13 {strides = array<i32>} : memref<8x128xf32, #tpu.memory_space<vmem>>, vector<8x128xf32>,
      %15 = arith.index_cast %arg14 : i32 to index
      %c0_18 = arith.constant 0 : index
      %c0_19 = arith.constant 0 : index
      %16 = vector.load %arg3[%15, %c0_18, %c0_19] : memref<2x8x128xf32, #tpu.memory_space<vmem>>, vector<1x8x128xf32>
      %17 = vector.shape_cast %16 : vector<1x8x128xf32> to vector<8x128xf32>
      %c0_20 = arith.constant 0 : index
      %c0_21 = arith.constant 0 : index
      %18 = vector.load %arg10[%c0_20, %c0_21] : memref<8x128xf32, #tpu.memory_space<vmem>>, vector<8x128xf32>
      tpu.vector_store %arg10[%c0_20, %c0_21], %17 {strides = array<i32>} : memref<8x128xf32, #tpu.memory_space<vmem>>, vector<8x128xf32>,
      %c0_i32_22 = arith.constant 0 : i32
      %19 = arith.index_cast %c0_i32_22 : i32 to index
      %c0_23 = arith.constant 0 : index
      %c0_24 = arith.constant 0 : index
      %20 = vector.load %arg6[%19, %c0_23, %c0_24] : memref<8x8x128xf32, #tpu.memory_space<vmem>>, vector<1x8x128xf32>
      %21 = vector.shape_cast %20 : vector<1x8x128xf32> to vector<8x128xf32>
      %c0_25 = arith.constant 0 : index
      %c0_26 = arith.constant 0 : index
      %22 = vector.load %arg11[%c0_25, %c0_26] : memref<8x256xf32, #tpu.memory_space<vmem>>, vector<8x128xf32>
      tpu.vector_store %arg11[%c0_25, %c0_26], %21 {strides = array<i32>} : memref<8x256xf32, #tpu.memory_space<vmem>>, vector<8x128xf32>,
      %c0_27 = arith.constant 0 : index
      %c0_28 = arith.constant 0 : index
      %23 = vector.load %arg9[%c0_27, %c0_28] : memref<8x128xf32, #tpu.memory_space<vmem>>, vector<8x128xf32>
      %c0_29 = arith.constant 0 : index
      %c128 = arith.constant 128 : index
      %24 = vector.load %arg11[%c0_29, %c128] : memref<8x256xf32, #tpu.memory_space<vmem>>, vector<8x128xf32>
      tpu.vector_store %arg11[%c0_29, %c128], %23 {strides = array<i32>} : memref<8x256xf32, #tpu.memory_space<vmem>>, vector<8x128xf32>,
      %c0_30 = arith.constant 0 : index
      %c0_31 = arith.constant 0 : index
      %25 = vector.load %arg11[%c0_30, %c0_31] : memref<8x256xf32, #tpu.memory_space<vmem>>, vector<8x256xf32>
      %c0_32 = arith.constant 0 : index
      %c0_33 = arith.constant 0 : index
      %26 = vector.load %arg12[%c0_32, %c0_33] : memref<256x512xf32, #tpu.memory_space<vmem>>, vector<256x512xf32>
      %cst = arith.constant dense<0.000000e+00> : vector<8x512xf32>
      %27 = tpu.matmul %25, %26, %cst {dimension_numbers = #tpu.dot_dimension_numbers<[1], [0], [0], [1], [0, 0, 1, 1], [], []>} : vector<8x256xf32>, vector<256x512xf32>, vector<8x512xf32> -> vector<8x512xf32>
      %c0_34 = arith.constant 0 : index
      %c0_35 = arith.constant 0 : index
      %28 = vector.load %arg13[%c0_34, %c0_35] : memref<1x512xf32, #tpu.memory_space<vmem>>, vector<1x512xf32>
      %29 = vector.broadcast %28 : vector<1x512xf32> to vector<8x512xf32>
      %30 = arith.addf %27, %29 : vector<8x512xf32>
      %31 = vector.extract_strided_slice %30 {offsets = [0, 0], sizes = [8, 128], strides = [1, 1]} : vector<8x512xf32> to vector<8x128xf32>
      %cst_36 = arith.constant 5.000000e-01 : f32
      %32 = vector.broadcast %cst_36 : f32 to vector<8x128xf32>
      %33 = arith.mulf %32, %31 : vector<8x128xf32>
      %34 = math.tanh %33 : vector<8x128xf32>
      %cst_37 = arith.constant 5.000000e-01 : f32
      %35 = vector.broadcast %cst_37 : f32 to vector<8x128xf32>
      %36 = arith.mulf %35, %34 : vector<8x128xf32>
      %cst_38 = arith.constant 5.000000e-01 : f32
      %37 = vector.broadcast %cst_38 : f32 to vector<8x128xf32>
      %38 = arith.addf %36, %37 : vector<8x128xf32>
      %39 = vector.extract_strided_slice %30 {offsets = [0, 128], sizes = [8, 128], strides = [1, 1]} : vector<8x512xf32> to vector<8x128xf32>
      %cst_39 = arith.constant 5.000000e-01 : f32
      %40 = vector.broadcast %cst_39 : f32 to vector<8x128xf32>
      %41 = arith.mulf %40, %39 : vector<8x128xf32>
      %42 = math.tanh %41 : vector<8x128xf32>
      %cst_40 = arith.constant 5.000000e-01 : f32
      %43 = vector.broadcast %cst_40 : f32 to vector<8x128xf32>
      %44 = arith.mulf %43, %42 : vector<8x128xf32>
      %cst_41 = arith.constant 5.000000e-01 : f32
      %45 = vector.broadcast %cst_41 : f32 to vector<8x128xf32>
      %46 = arith.addf %44, %45 : vector<8x128xf32>
      %47 = vector.extract_strided_slice %30 {offsets = [0, 256], sizes = [8, 128], strides = [1, 1]} : vector<8x512xf32> to vector<8x128xf32>
      %48 = math.tanh %47 : vector<8x128xf32>
      %49 = vector.extract_strided_slice %30 {offsets = [0, 384], sizes = [8, 128], strides = [1, 1]} : vector<8x512xf32> to vector<8x128xf32>
      %cst_42 = arith.constant 5.000000e-01 : f32
      %50 = vector.broadcast %cst_42 : f32 to vector<8x128xf32>
      %51 = arith.mulf %50, %49 : vector<8x128xf32>
      %52 = math.tanh %51 : vector<8x128xf32>
      %cst_43 = arith.constant 5.000000e-01 : f32
      %53 = vector.broadcast %cst_43 : f32 to vector<8x128xf32>
      %54 = arith.mulf %53, %52 : vector<8x128xf32>
      %cst_44 = arith.constant 5.000000e-01 : f32
      %55 = vector.broadcast %cst_44 : f32 to vector<8x128xf32>
      %56 = arith.addf %54, %55 : vector<8x128xf32>
      %c0_45 = arith.constant 0 : index
      %c0_46 = arith.constant 0 : index
      %57 = vector.load %arg10[%c0_45, %c0_46] : memref<8x128xf32, #tpu.memory_space<vmem>>, vector<8x128xf32>
      %58 = arith.mulf %46, %57 : vector<8x128xf32>
      %59 = arith.mulf %38, %48 : vector<8x128xf32>
      %60 = arith.addf %58, %59 : vector<8x128xf32>
      %61 = math.tanh %60 : vector<8x128xf32>
      %62 = arith.mulf %56, %61 : vector<8x128xf32>
      %c0_47 = arith.constant 0 : index
      %c0_48 = arith.constant 0 : index
      %63 = vector.load %arg9[%c0_47, %c0_48] : memref<8x128xf32, #tpu.memory_space<vmem>>, vector<8x128xf32>
      tpu.vector_store %arg9[%c0_47, %c0_48], %62 {strides = array<i32>} : memref<8x128xf32, #tpu.memory_space<vmem>>, vector<8x128xf32>,
      %c0_49 = arith.constant 0 : index
      %c0_50 = arith.constant 0 : index
      %64 = vector.load %arg10[%c0_49, %c0_50] : memref<8x128xf32, #tpu.memory_space<vmem>>, vector<8x128xf32>
      tpu.vector_store %arg10[%c0_49, %c0_50], %60 {strides = array<i32>} : memref<8x128xf32, #tpu.memory_space<vmem>>, vector<8x128xf32>,
      %65 = arith.index_cast %c0_i32_22 : i32 to index
      %c0_51 = arith.constant 0 : index
      %c0_52 = arith.constant 0 : index
      %66 = vector.load %arg6[%65, %c0_51, %c0_52] : memref<8x8x128xf32, #tpu.memory_space<vmem>>, vector<1x8x128xf32>
      %67 = vector.shape_cast %66 : vector<1x8x128xf32> to vector<8x128xf32>
      %68 = vector.shape_cast %62 : vector<8x128xf32> to vector<1x8x128xf32>
      tpu.vector_store %arg6[%65, %c0_51, %c0_52], %68 {strides = array<i32>} : memref<8x8x128xf32, #tpu.memory_space<vmem>>, vector<1x8x128xf32>,
      %c1_i32_53 = arith.constant 1 : i32
      %69 = arith.index_cast %c1_i32_53 : i32 to index
      %c0_54 = arith.constant 0 : index
      %c0_55 = arith.constant 0 : index
      %70 = vector.load %arg6[%69, %c0_54, %c0_55] : memref<8x8x128xf32, #tpu.memory_space<vmem>>, vector<1x8x128xf32>
      %71 = vector.shape_cast %70 : vector<1x8x128xf32> to vector<8x128xf32>
      %c0_56 = arith.constant 0 : index
      %c0_57 = arith.constant 0 : index
      %72 = vector.load %arg11[%c0_56, %c0_57] : memref<8x256xf32, #tpu.memory_space<vmem>>, vector<8x128xf32>
      tpu.vector_store %arg11[%c0_56, %c0_57], %71 {strides = array<i32>} : memref<8x256xf32, #tpu.memory_space<vmem>>, vector<8x128xf32>,
      %c0_58 = arith.constant 0 : index
      %c0_59 = arith.constant 0 : index
      %73 = vector.load %arg9[%c0_58, %c0_59] : memref<8x128xf32, #tpu.memory_space<vmem>>, vector<8x128xf32>
      %c0_60 = arith.constant 0 : index
      %c128_61 = arith.constant 128 : index
      %74 = vector.load %arg11[%c0_60, %c128_61] : memref<8x256xf32, #tpu.memory_space<vmem>>, vector<8x128xf32>
      tpu.vector_store %arg11[%c0_60, %c128_61], %73 {strides = array<i32>} : memref<8x256xf32, #tpu.memory_space<vmem>>, vector<8x128xf32>,
      %c0_62 = arith.constant 0 : index
      %c0_63 = arith.constant 0 : index
      %75 = vector.load %arg11[%c0_62, %c0_63] : memref<8x256xf32, #tpu.memory_space<vmem>>, vector<8x256xf32>
      %c0_64 = arith.constant 0 : index
      %c0_65 = arith.constant 0 : index
      %76 = vector.load %arg12[%c0_64, %c0_65] : memref<256x512xf32, #tpu.memory_space<vmem>>, vector<256x512xf32>
      %cst_66 = arith.constant dense<0.000000e+00> : vector<8x512xf32>
      %77 = tpu.matmul %75, %76, %cst_66 {dimension_numbers = #tpu.dot_dimension_numbers<[1], [0], [0], [1], [0, 0, 1, 1], [], []>} : vector<8x256xf32>, vector<256x512xf32>, vector<8x512xf32> -> vector<8x512xf32>
      %c0_67 = arith.constant 0 : index
      %c0_68 = arith.constant 0 : index
      %78 = vector.load %arg13[%c0_67, %c0_68] : memref<1x512xf32, #tpu.memory_space<vmem>>, vector<1x512xf32>
      %79 = vector.broadcast %78 : vector<1x512xf32> to vector<8x512xf32>
      %80 = arith.addf %77, %79 : vector<8x512xf32>
      %81 = vector.extract_strided_slice %80 {offsets = [0, 0], sizes = [8, 128], strides = [1, 1]} : vector<8x512xf32> to vector<8x128xf32>
      %cst_69 = arith.constant 5.000000e-01 : f32
      %82 = vector.broadcast %cst_69 : f32 to vector<8x128xf32>
      %83 = arith.mulf %82, %81 : vector<8x128xf32>
      %84 = math.tanh %83 : vector<8x128xf32>
      %cst_70 = arith.constant 5.000000e-01 : f32
      %85 = vector.broadcast %cst_70 : f32 to vector<8x128xf32>
      %86 = arith.mulf %85, %84 : vector<8x128xf32>
      %cst_71 = arith.constant 5.000000e-01 : f32
      %87 = vector.broadcast %cst_71 : f32 to vector<8x128xf32>
      %88 = arith.addf %86, %87 : vector<8x128xf32>
      %89 = vector.extract_strided_slice %80 {offsets = [0, 128], sizes = [8, 128], strides = [1, 1]} : vector<8x512xf32> to vector<8x128xf32>
      %cst_72 = arith.constant 5.000000e-01 : f32
      %90 = vector.broadcast %cst_72 : f32 to vector<8x128xf32>
      %91 = arith.mulf %90, %89 : vector<8x128xf32>
      %92 = math.tanh %91 : vector<8x128xf32>
      %cst_73 = arith.constant 5.000000e-01 : f32
      %93 = vector.broadcast %cst_73 : f32 to vector<8x128xf32>
      %94 = arith.mulf %93, %92 : vector<8x128xf32>
      %cst_74 = arith.constant 5.000000e-01 : f32
      %95 = vector.broadcast %cst_74 : f32 to vector<8x128xf32>
      %96 = arith.addf %94, %95 : vector<8x128xf32>
      %97 = vector.extract_strided_slice %80 {offsets = [0, 256], sizes = [8, 128], strides = [1, 1]} : vector<8x512xf32> to vector<8x128xf32>
      %98 = math.tanh %97 : vector<8x128xf32>
      %99 = vector.extract_strided_slice %80 {offsets = [0, 384], sizes = [8, 128], strides = [1, 1]} : vector<8x512xf32> to vector<8x128xf32>
      %cst_75 = arith.constant 5.000000e-01 : f32
      %100 = vector.broadcast %cst_75 : f32 to vector<8x128xf32>
      %101 = arith.mulf %100, %99 : vector<8x128xf32>
      %102 = math.tanh %101 : vector<8x128xf32>
      %cst_76 = arith.constant 5.000000e-01 : f32
      %103 = vector.broadcast %cst_76 : f32 to vector<8x128xf32>
      %104 = arith.mulf %103, %102 : vector<8x128xf32>
      %cst_77 = arith.constant 5.000000e-01 : f32
      %105 = vector.broadcast %cst_77 : f32 to vector<8x128xf32>
      %106 = arith.addf %104, %105 : vector<8x128xf32>
      %c0_78 = arith.constant 0 : index
      %c0_79 = arith.constant 0 : index
      %107 = vector.load %arg10[%c0_78, %c0_79] : memref<8x128xf32, #tpu.memory_space<vmem>>, vector<8x128xf32>
      %108 = arith.mulf %96, %107 : vector<8x128xf32>
      %109 = arith.mulf %88, %98 : vector<8x128xf32>
      %110 = arith.addf %108, %109 : vector<8x128xf32>
      %111 = math.tanh %110 : vector<8x128xf32>
      %112 = arith.mulf %106, %111 : vector<8x128xf32>
      %c0_80 = arith.constant 0 : index
      %c0_81 = arith.constant 0 : index
      %113 = vector.load %arg9[%c0_80, %c0_81] : memref<8x128xf32, #tpu.memory_space<vmem>>, vector<8x128xf32>
      tpu.vector_store %arg9[%c0_80, %c0_81], %112 {strides = array<i32>} : memref<8x128xf32, #tpu.memory_space<vmem>>, vector<8x128xf32>,
      %c0_82 = arith.constant 0 : index
      %c0_83 = arith.constant 0 : index
      %114 = vector.load %arg10[%c0_82, %c0_83] : memref<8x128xf32, #tpu.memory_space<vmem>>, vector<8x128xf32>
      tpu.vector_store %arg10[%c0_82, %c0_83], %110 {strides = array<i32>} : memref<8x128xf32, #tpu.memory_space<vmem>>, vector<8x128xf32>,
      %115 = arith.index_cast %c1_i32_53 : i32 to index
      %c0_84 = arith.constant 0 : index
      %c0_85 = arith.constant 0 : index
      %116 = vector.load %arg6[%115, %c0_84, %c0_85] : memref<8x8x128xf32, #tpu.memory_space<vmem>>, vector<1x8x128xf32>
      %117 = vector.shape_cast %116 : vector<1x8x128xf32> to vector<8x128xf32>
      %118 = vector.shape_cast %112 : vector<8x128xf32> to vector<1x8x128xf32>
      tpu.vector_store %arg6[%115, %c0_84, %c0_85], %118 {strides = array<i32>} : memref<8x8x128xf32, #tpu.memory_space<vmem>>, vector<1x8x128xf32>,
      %c2_i32_86 = arith.constant 2 : i32
      %119 = arith.index_cast %c2_i32_86 : i32 to index
      %c0_87 = arith.constant 0 : index
      %c0_88 = arith.constant 0 : index
      %120 = vector.load %arg6[%119, %c0_87, %c0_88] : memref<8x8x128xf32, #tpu.memory_space<vmem>>, vector<1x8x128xf32>
      %121 = vector.shape_cast %120 : vector<1x8x128xf32> to vector<8x128xf32>
      %c0_89 = arith.constant 0 : index
      %c0_90 = arith.constant 0 : index
      %122 = vector.load %arg11[%c0_89, %c0_90] : memref<8x256xf32, #tpu.memory_space<vmem>>, vector<8x128xf32>
      tpu.vector_store %arg11[%c0_89, %c0_90], %121 {strides = array<i32>} : memref<8x256xf32, #tpu.memory_space<vmem>>, vector<8x128xf32>,
      %c0_91 = arith.constant 0 : index
      %c0_92 = arith.constant 0 : index
      %123 = vector.load %arg9[%c0_91, %c0_92] : memref<8x128xf32, #tpu.memory_space<vmem>>, vector<8x128xf32>
      %c0_93 = arith.constant 0 : index
      %c128_94 = arith.constant 128 : index
      %124 = vector.load %arg11[%c0_93, %c128_94] : memref<8x256xf32, #tpu.memory_space<vmem>>, vector<8x128xf32>
      tpu.vector_store %arg11[%c0_93, %c128_94], %123 {strides = array<i32>} : memref<8x256xf32, #tpu.memory_space<vmem>>, vector<8x128xf32>,
      %c0_95 = arith.constant 0 : index
      %c0_96 = arith.constant 0 : index
      %125 = vector.load %arg11[%c0_95, %c0_96] : memref<8x256xf32, #tpu.memory_space<vmem>>, vector<8x256xf32>
      %c0_97 = arith.constant 0 : index
      %c0_98 = arith.constant 0 : index
      %126 = vector.load %arg12[%c0_97, %c0_98] : memref<256x512xf32, #tpu.memory_space<vmem>>, vector<256x512xf32>
      %cst_99 = arith.constant dense<0.000000e+00> : vector<8x512xf32>
      %127 = tpu.matmul %125, %126, %cst_99 {dimension_numbers = #tpu.dot_dimension_numbers<[1], [0], [0], [1], [0, 0, 1, 1], [], []>} : vector<8x256xf32>, vector<256x512xf32>, vector<8x512xf32> -> vector<8x512xf32>
      %c0_100 = arith.constant 0 : index
      %c0_101 = arith.constant 0 : index
      %128 = vector.load %arg13[%c0_100, %c0_101] : memref<1x512xf32, #tpu.memory_space<vmem>>, vector<1x512xf32>
      %129 = vector.broadcast %128 : vector<1x512xf32> to vector<8x512xf32>
      %130 = arith.addf %127, %129 : vector<8x512xf32>
      %131 = vector.extract_strided_slice %130 {offsets = [0, 0], sizes = [8, 128], strides = [1, 1]} : vector<8x512xf32> to vector<8x128xf32>
      %cst_102 = arith.constant 5.000000e-01 : f32
      %132 = vector.broadcast %cst_102 : f32 to vector<8x128xf32>
      %133 = arith.mulf %132, %131 : vector<8x128xf32>
      %134 = math.tanh %133 : vector<8x128xf32>
      %cst_103 = arith.constant 5.000000e-01 : f32
      %135 = vector.broadcast %cst_103 : f32 to vector<8x128xf32>
      %136 = arith.mulf %135, %134 : vector<8x128xf32>
      %cst_104 = arith.constant 5.000000e-01 : f32
      %137 = vector.broadcast %cst_104 : f32 to vector<8x128xf32>
      %138 = arith.addf %136, %137 : vector<8x128xf32>
      %139 = vector.extract_strided_slice %130 {offsets = [0, 128], sizes = [8, 128], strides = [1, 1]} : vector<8x512xf32> to vector<8x128xf32>
      %cst_105 = arith.constant 5.000000e-01 : f32
      %140 = vector.broadcast %cst_105 : f32 to vector<8x128xf32>
      %141 = arith.mulf %140, %139 : vector<8x128xf32>
      %142 = math.tanh %141 : vector<8x128xf32>
      %cst_106 = arith.constant 5.000000e-01 : f32
      %143 = vector.broadcast %cst_106 : f32 to vector<8x128xf32>
      %144 = arith.mulf %143, %142 : vector<8x128xf32>
      %cst_107 = arith.constant 5.000000e-01 : f32
      %145 = vector.broadcast %cst_107 : f32 to vector<8x128xf32>
      %146 = arith.addf %144, %145 : vector<8x128xf32>
      %147 = vector.extract_strided_slice %130 {offsets = [0, 256], sizes = [8, 128], strides = [1, 1]} : vector<8x512xf32> to vector<8x128xf32>
      %148 = math.tanh %147 : vector<8x128xf32>
      %149 = vector.extract_strided_slice %130 {offsets = [0, 384], sizes = [8, 128], strides = [1, 1]} : vector<8x512xf32> to vector<8x128xf32>
      %cst_108 = arith.constant 5.000000e-01 : f32
      %150 = vector.broadcast %cst_108 : f32 to vector<8x128xf32>
      %151 = arith.mulf %150, %149 : vector<8x128xf32>
      %152 = math.tanh %151 : vector<8x128xf32>
      %cst_109 = arith.constant 5.000000e-01 : f32
      %153 = vector.broadcast %cst_109 : f32 to vector<8x128xf32>
      %154 = arith.mulf %153, %152 : vector<8x128xf32>
      %cst_110 = arith.constant 5.000000e-01 : f32
      %155 = vector.broadcast %cst_110 : f32 to vector<8x128xf32>
      %156 = arith.addf %154, %155 : vector<8x128xf32>
      %c0_111 = arith.constant 0 : index
      %c0_112 = arith.constant 0 : index
      %157 = vector.load %arg10[%c0_111, %c0_112] : memref<8x128xf32, #tpu.memory_space<vmem>>, vector<8x128xf32>
      %158 = arith.mulf %146, %157 : vector<8x128xf32>
      %159 = arith.mulf %138, %148 : vector<8x128xf32>
      %160 = arith.addf %158, %159 : vector<8x128xf32>
      %161 = math.tanh %160 : vector<8x128xf32>
      %162 = arith.mulf %156, %161 : vector<8x128xf32>
      %c0_113 = arith.constant 0 : index
      %c0_114 = arith.constant 0 : index
      %163 = vector.load %arg9[%c0_113, %c0_114] : memref<8x128xf32, #tpu.memory_space<vmem>>, vector<8x128xf32>
      tpu.vector_store %arg9[%c0_113, %c0_114], %162 {strides = array<i32>} : memref<8x128xf32, #tpu.memory_space<vmem>>, vector<8x128xf32>,
      %c0_115 = arith.constant 0 : index
      %c0_116 = arith.constant 0 : index
      %164 = vector.load %arg10[%c0_115, %c0_116] : memref<8x128xf32, #tpu.memory_space<vmem>>, vector<8x128xf32>
      tpu.vector_store %arg10[%c0_115, %c0_116], %160 {strides = array<i32>} : memref<8x128xf32, #tpu.memory_space<vmem>>, vector<8x128xf32>,
      %165 = arith.index_cast %c2_i32_86 : i32 to index
      %c0_117 = arith.constant 0 : index
      %c0_118 = arith.constant 0 : index
      %166 = vector.load %arg6[%165, %c0_117, %c0_118] : memref<8x8x128xf32, #tpu.memory_space<vmem>>, vector<1x8x128xf32>
      %167 = vector.shape_cast %166 : vector<1x8x128xf32> to vector<8x128xf32>
      %168 = vector.shape_cast %162 : vector<8x128xf32> to vector<1x8x128xf32>
      tpu.vector_store %arg6[%165, %c0_117, %c0_118], %168 {strides = array<i32>} : memref<8x8x128xf32, #tpu.memory_space<vmem>>, vector<1x8x128xf32>,
      %c3_i32 = arith.constant 3 : i32
      %169 = arith.index_cast %c3_i32 : i32 to index
      %c0_119 = arith.constant 0 : index
      %c0_120 = arith.constant 0 : index
      %170 = vector.load %arg6[%169, %c0_119, %c0_120] : memref<8x8x128xf32, #tpu.memory_space<vmem>>, vector<1x8x128xf32>
      %171 = vector.shape_cast %170 : vector<1x8x128xf32> to vector<8x128xf32>
      %c0_121 = arith.constant 0 : index
      %c0_122 = arith.constant 0 : index
      %172 = vector.load %arg11[%c0_121, %c0_122] : memref<8x256xf32, #tpu.memory_space<vmem>>, vector<8x128xf32>
      tpu.vector_store %arg11[%c0_121, %c0_122], %171 {strides = array<i32>} : memref<8x256xf32, #tpu.memory_space<vmem>>, vector<8x128xf32>,
      %c0_123 = arith.constant 0 : index
      %c0_124 = arith.constant 0 : index
      %173 = vector.load %arg9[%c0_123, %c0_124] : memref<8x128xf32, #tpu.memory_space<vmem>>, vector<8x128xf32>
      %c0_125 = arith.constant 0 : index
      %c128_126 = arith.constant 128 : index
      %174 = vector.load %arg11[%c0_125, %c128_126] : memref<8x256xf32, #tpu.memory_space<vmem>>, vector<8x128xf32>
      tpu.vector_store %arg11[%c0_125, %c128_126], %173 {strides = array<i32>} : memref<8x256xf32, #tpu.memory_space<vmem>>, vector<8x128xf32>,
      %c0_127 = arith.constant 0 : index
      %c0_128 = arith.constant 0 : index
      %175 = vector.load %arg11[%c0_127, %c0_128] : memref<8x256xf32, #tpu.memory_space<vmem>>, vector<8x256xf32>
      %c0_129 = arith.constant 0 : index
      %c0_130 = arith.constant 0 : index
      %176 = vector.load %arg12[%c0_129, %c0_130] : memref<256x512xf32, #tpu.memory_space<vmem>>, vector<256x512xf32>
      %cst_131 = arith.constant dense<0.000000e+00> : vector<8x512xf32>
      %177 = tpu.matmul %175, %176, %cst_131 {dimension_numbers = #tpu.dot_dimension_numbers<[1], [0], [0], [1], [0, 0, 1, 1], [], []>} : vector<8x256xf32>, vector<256x512xf32>, vector<8x512xf32> -> vector<8x512xf32>
      %c0_132 = arith.constant 0 : index
      %c0_133 = arith.constant 0 : index
      %178 = vector.load %arg13[%c0_132, %c0_133] : memref<1x512xf32, #tpu.memory_space<vmem>>, vector<1x512xf32>
      %179 = vector.broadcast %178 : vector<1x512xf32> to vector<8x512xf32>
      %180 = arith.addf %177, %179 : vector<8x512xf32>
      %181 = vector.extract_strided_slice %180 {offsets = [0, 0], sizes = [8, 128], strides = [1, 1]} : vector<8x512xf32> to vector<8x128xf32>
      %cst_134 = arith.constant 5.000000e-01 : f32
      %182 = vector.broadcast %cst_134 : f32 to vector<8x128xf32>
      %183 = arith.mulf %182, %181 : vector<8x128xf32>
      %184 = math.tanh %183 : vector<8x128xf32>
      %cst_135 = arith.constant 5.000000e-01 : f32
      %185 = vector.broadcast %cst_135 : f32 to vector<8x128xf32>
      %186 = arith.mulf %185, %184 : vector<8x128xf32>
      %cst_136 = arith.constant 5.000000e-01 : f32
      %187 = vector.broadcast %cst_136 : f32 to vector<8x128xf32>
      %188 = arith.addf %186, %187 : vector<8x128xf32>
      %189 = vector.extract_strided_slice %180 {offsets = [0, 128], sizes = [8, 128], strides = [1, 1]} : vector<8x512xf32> to vector<8x128xf32>
      %cst_137 = arith.constant 5.000000e-01 : f32
      %190 = vector.broadcast %cst_137 : f32 to vector<8x128xf32>
      %191 = arith.mulf %190, %189 : vector<8x128xf32>
      %192 = math.tanh %191 : vector<8x128xf32>
      %cst_138 = arith.constant 5.000000e-01 : f32
      %193 = vector.broadcast %cst_138 : f32 to vector<8x128xf32>
      %194 = arith.mulf %193, %192 : vector<8x128xf32>
      %cst_139 = arith.constant 5.000000e-01 : f32
      %195 = vector.broadcast %cst_139 : f32 to vector<8x128xf32>
      %196 = arith.addf %194, %195 : vector<8x128xf32>
      %197 = vector.extract_strided_slice %180 {offsets = [0, 256], sizes = [8, 128], strides = [1, 1]} : vector<8x512xf32> to vector<8x128xf32>
      %198 = math.tanh %197 : vector<8x128xf32>
      %199 = vector.extract_strided_slice %180 {offsets = [0, 384], sizes = [8, 128], strides = [1, 1]} : vector<8x512xf32> to vector<8x128xf32>
      %cst_140 = arith.constant 5.000000e-01 : f32
      %200 = vector.broadcast %cst_140 : f32 to vector<8x128xf32>
      %201 = arith.mulf %200, %199 : vector<8x128xf32>
      %202 = math.tanh %201 : vector<8x128xf32>
      %cst_141 = arith.constant 5.000000e-01 : f32
      %203 = vector.broadcast %cst_141 : f32 to vector<8x128xf32>
      %204 = arith.mulf %203, %202 : vector<8x128xf32>
      %cst_142 = arith.constant 5.000000e-01 : f32
      %205 = vector.broadcast %cst_142 : f32 to vector<8x128xf32>
      %206 = arith.addf %204, %205 : vector<8x128xf32>
      %c0_143 = arith.constant 0 : index
      %c0_144 = arith.constant 0 : index
      %207 = vector.load %arg10[%c0_143, %c0_144] : memref<8x128xf32, #tpu.memory_space<vmem>>, vector<8x128xf32>
      %208 = arith.mulf %196, %207 : vector<8x128xf32>
      %209 = arith.mulf %188, %198 : vector<8x128xf32>
      %210 = arith.addf %208, %209 : vector<8x128xf32>
      %211 = math.tanh %210 : vector<8x128xf32>
      %212 = arith.mulf %206, %211 : vector<8x128xf32>
      %c0_145 = arith.constant 0 : index
      %c0_146 = arith.constant 0 : index
      %213 = vector.load %arg9[%c0_145, %c0_146] : memref<8x128xf32, #tpu.memory_space<vmem>>, vector<8x128xf32>
      tpu.vector_store %arg9[%c0_145, %c0_146], %212 {strides = array<i32>} : memref<8x128xf32, #tpu.memory_space<vmem>>, vector<8x128xf32>,
      %c0_147 = arith.constant 0 : index
      %c0_148 = arith.constant 0 : index
      %214 = vector.load %arg10[%c0_147, %c0_148] : memref<8x128xf32, #tpu.memory_space<vmem>>, vector<8x128xf32>
      tpu.vector_store %arg10[%c0_147, %c0_148], %210 {strides = array<i32>} : memref<8x128xf32, #tpu.memory_space<vmem>>, vector<8x128xf32>,
      %215 = arith.index_cast %c3_i32 : i32 to index
      %c0_149 = arith.constant 0 : index
      %c0_150 = arith.constant 0 : index
      %216 = vector.load %arg6[%215, %c0_149, %c0_150] : memref<8x8x128xf32, #tpu.memory_space<vmem>>, vector<1x8x128xf32>
      %217 = vector.shape_cast %216 : vector<1x8x128xf32> to vector<8x128xf32>
      %218 = vector.shape_cast %212 : vector<8x128xf32> to vector<1x8x128xf32>
      tpu.vector_store %arg6[%215, %c0_149, %c0_150], %218 {strides = array<i32>} : memref<8x8x128xf32, #tpu.memory_space<vmem>>, vector<1x8x128xf32>,
      %c4_i32 = arith.constant 4 : i32
      %219 = arith.index_cast %c4_i32 : i32 to index
      %c0_151 = arith.constant 0 : index
      %c0_152 = arith.constant 0 : index
      %220 = vector.load %arg6[%219, %c0_151, %c0_152] : memref<8x8x128xf32, #tpu.memory_space<vmem>>, vector<1x8x128xf32>
      %221 = vector.shape_cast %220 : vector<1x8x128xf32> to vector<8x128xf32>
      %c0_153 = arith.constant 0 : index
      %c0_154 = arith.constant 0 : index
      %222 = vector.load %arg11[%c0_153, %c0_154] : memref<8x256xf32, #tpu.memory_space<vmem>>, vector<8x128xf32>
      tpu.vector_store %arg11[%c0_153, %c0_154], %221 {strides = array<i32>} : memref<8x256xf32, #tpu.memory_space<vmem>>, vector<8x128xf32>,
      %c0_155 = arith.constant 0 : index
      %c0_156 = arith.constant 0 : index
      %223 = vector.load %arg9[%c0_155, %c0_156] : memref<8x128xf32, #tpu.memory_space<vmem>>, vector<8x128xf32>
      %c0_157 = arith.constant 0 : index
      %c128_158 = arith.constant 128 : index
      %224 = vector.load %arg11[%c0_157, %c128_158] : memref<8x256xf32, #tpu.memory_space<vmem>>, vector<8x128xf32>
      tpu.vector_store %arg11[%c0_157, %c128_158], %223 {strides = array<i32>} : memref<8x256xf32, #tpu.memory_space<vmem>>, vector<8x128xf32>,
      %c0_159 = arith.constant 0 : index
      %c0_160 = arith.constant 0 : index
      %225 = vector.load %arg11[%c0_159, %c0_160] : memref<8x256xf32, #tpu.memory_space<vmem>>, vector<8x256xf32>
      %c0_161 = arith.constant 0 : index
      %c0_162 = arith.constant 0 : index
      %226 = vector.load %arg12[%c0_161, %c0_162] : memref<256x512xf32, #tpu.memory_space<vmem>>, vector<256x512xf32>
      %cst_163 = arith.constant dense<0.000000e+00> : vector<8x512xf32>
      %227 = tpu.matmul %225, %226, %cst_163 {dimension_numbers = #tpu.dot_dimension_numbers<[1], [0], [0], [1], [0, 0, 1, 1], [], []>} : vector<8x256xf32>, vector<256x512xf32>, vector<8x512xf32> -> vector<8x512xf32>
      %c0_164 = arith.constant 0 : index
      %c0_165 = arith.constant 0 : index
      %228 = vector.load %arg13[%c0_164, %c0_165] : memref<1x512xf32, #tpu.memory_space<vmem>>, vector<1x512xf32>
      %229 = vector.broadcast %228 : vector<1x512xf32> to vector<8x512xf32>
      %230 = arith.addf %227, %229 : vector<8x512xf32>
      %231 = vector.extract_strided_slice %230 {offsets = [0, 0], sizes = [8, 128], strides = [1, 1]} : vector<8x512xf32> to vector<8x128xf32>
      %cst_166 = arith.constant 5.000000e-01 : f32
      %232 = vector.broadcast %cst_166 : f32 to vector<8x128xf32>
      %233 = arith.mulf %232, %231 : vector<8x128xf32>
      %234 = math.tanh %233 : vector<8x128xf32>
      %cst_167 = arith.constant 5.000000e-01 : f32
      %235 = vector.broadcast %cst_167 : f32 to vector<8x128xf32>
      %236 = arith.mulf %235, %234 : vector<8x128xf32>
      %cst_168 = arith.constant 5.000000e-01 : f32
      %237 = vector.broadcast %cst_168 : f32 to vector<8x128xf32>
      %238 = arith.addf %236, %237 : vector<8x128xf32>
      %239 = vector.extract_strided_slice %230 {offsets = [0, 128], sizes = [8, 128], strides = [1, 1]} : vector<8x512xf32> to vector<8x128xf32>
      %cst_169 = arith.constant 5.000000e-01 : f32
      %240 = vector.broadcast %cst_169 : f32 to vector<8x128xf32>
      %241 = arith.mulf %240, %239 : vector<8x128xf32>
      %242 = math.tanh %241 : vector<8x128xf32>
      %cst_170 = arith.constant 5.000000e-01 : f32
      %243 = vector.broadcast %cst_170 : f32 to vector<8x128xf32>
      %244 = arith.mulf %243, %242 : vector<8x128xf32>
      %cst_171 = arith.constant 5.000000e-01 : f32
      %245 = vector.broadcast %cst_171 : f32 to vector<8x128xf32>
      %246 = arith.addf %244, %245 : vector<8x128xf32>
      %247 = vector.extract_strided_slice %230 {offsets = [0, 256], sizes = [8, 128], strides = [1, 1]} : vector<8x512xf32> to vector<8x128xf32>
      %248 = math.tanh %247 : vector<8x128xf32>
      %249 = vector.extract_strided_slice %230 {offsets = [0, 384], sizes = [8, 128], strides = [1, 1]} : vector<8x512xf32> to vector<8x128xf32>
      %cst_172 = arith.constant 5.000000e-01 : f32
      %250 = vector.broadcast %cst_172 : f32 to vector<8x128xf32>
      %251 = arith.mulf %250, %249 : vector<8x128xf32>
      %252 = math.tanh %251 : vector<8x128xf32>
      %cst_173 = arith.constant 5.000000e-01 : f32
      %253 = vector.broadcast %cst_173 : f32 to vector<8x128xf32>
      %254 = arith.mulf %253, %252 : vector<8x128xf32>
      %cst_174 = arith.constant 5.000000e-01 : f32
      %255 = vector.broadcast %cst_174 : f32 to vector<8x128xf32>
      %256 = arith.addf %254, %255 : vector<8x128xf32>
      %c0_175 = arith.constant 0 : index
      %c0_176 = arith.constant 0 : index
      %257 = vector.load %arg10[%c0_175, %c0_176] : memref<8x128xf32, #tpu.memory_space<vmem>>, vector<8x128xf32>
      %258 = arith.mulf %246, %257 : vector<8x128xf32>
      %259 = arith.mulf %238, %248 : vector<8x128xf32>
      %260 = arith.addf %258, %259 : vector<8x128xf32>
      %261 = math.tanh %260 : vector<8x128xf32>
      %262 = arith.mulf %256, %261 : vector<8x128xf32>
      %c0_177 = arith.constant 0 : index
      %c0_178 = arith.constant 0 : index
      %263 = vector.load %arg9[%c0_177, %c0_178] : memref<8x128xf32, #tpu.memory_space<vmem>>, vector<8x128xf32>
      tpu.vector_store %arg9[%c0_177, %c0_178], %262 {strides = array<i32>} : memref<8x128xf32, #tpu.memory_space<vmem>>, vector<8x128xf32>,
      %c0_179 = arith.constant 0 : index
      %c0_180 = arith.constant 0 : index
      %264 = vector.load %arg10[%c0_179, %c0_180] : memref<8x128xf32, #tpu.memory_space<vmem>>, vector<8x128xf32>
      tpu.vector_store %arg10[%c0_179, %c0_180], %260 {strides = array<i32>} : memref<8x128xf32, #tpu.memory_space<vmem>>, vector<8x128xf32>,
      %265 = arith.index_cast %c4_i32 : i32 to index
      %c0_181 = arith.constant 0 : index
      %c0_182 = arith.constant 0 : index
      %266 = vector.load %arg6[%265, %c0_181, %c0_182] : memref<8x8x128xf32, #tpu.memory_space<vmem>>, vector<1x8x128xf32>
      %267 = vector.shape_cast %266 : vector<1x8x128xf32> to vector<8x128xf32>
      %268 = vector.shape_cast %262 : vector<8x128xf32> to vector<1x8x128xf32>
      tpu.vector_store %arg6[%265, %c0_181, %c0_182], %268 {strides = array<i32>} : memref<8x8x128xf32, #tpu.memory_space<vmem>>, vector<1x8x128xf32>,
      %c5_i32 = arith.constant 5 : i32
      %269 = arith.index_cast %c5_i32 : i32 to index
      %c0_183 = arith.constant 0 : index
      %c0_184 = arith.constant 0 : index
      %270 = vector.load %arg6[%269, %c0_183, %c0_184] : memref<8x8x128xf32, #tpu.memory_space<vmem>>, vector<1x8x128xf32>
      %271 = vector.shape_cast %270 : vector<1x8x128xf32> to vector<8x128xf32>
      %c0_185 = arith.constant 0 : index
      %c0_186 = arith.constant 0 : index
      %272 = vector.load %arg11[%c0_185, %c0_186] : memref<8x256xf32, #tpu.memory_space<vmem>>, vector<8x128xf32>
      tpu.vector_store %arg11[%c0_185, %c0_186], %271 {strides = array<i32>} : memref<8x256xf32, #tpu.memory_space<vmem>>, vector<8x128xf32>,
      %c0_187 = arith.constant 0 : index
      %c0_188 = arith.constant 0 : index
      %273 = vector.load %arg9[%c0_187, %c0_188] : memref<8x128xf32, #tpu.memory_space<vmem>>, vector<8x128xf32>
      %c0_189 = arith.constant 0 : index
      %c128_190 = arith.constant 128 : index
      %274 = vector.load %arg11[%c0_189, %c128_190] : memref<8x256xf32, #tpu.memory_space<vmem>>, vector<8x128xf32>
      tpu.vector_store %arg11[%c0_189, %c128_190], %273 {strides = array<i32>} : memref<8x256xf32, #tpu.memory_space<vmem>>, vector<8x128xf32>,
      %c0_191 = arith.constant 0 : index
      %c0_192 = arith.constant 0 : index
      %275 = vector.load %arg11[%c0_191, %c0_192] : memref<8x256xf32, #tpu.memory_space<vmem>>, vector<8x256xf32>
      %c0_193 = arith.constant 0 : index
      %c0_194 = arith.constant 0 : index
      %276 = vector.load %arg12[%c0_193, %c0_194] : memref<256x512xf32, #tpu.memory_space<vmem>>, vector<256x512xf32>
      %cst_195 = arith.constant dense<0.000000e+00> : vector<8x512xf32>
      %277 = tpu.matmul %275, %276, %cst_195 {dimension_numbers = #tpu.dot_dimension_numbers<[1], [0], [0], [1], [0, 0, 1, 1], [], []>} : vector<8x256xf32>, vector<256x512xf32>, vector<8x512xf32> -> vector<8x512xf32>
      %c0_196 = arith.constant 0 : index
      %c0_197 = arith.constant 0 : index
      %278 = vector.load %arg13[%c0_196, %c0_197] : memref<1x512xf32, #tpu.memory_space<vmem>>, vector<1x512xf32>
      %279 = vector.broadcast %278 : vector<1x512xf32> to vector<8x512xf32>
      %280 = arith.addf %277, %279 : vector<8x512xf32>
      %281 = vector.extract_strided_slice %280 {offsets = [0, 0], sizes = [8, 128], strides = [1, 1]} : vector<8x512xf32> to vector<8x128xf32>
      %cst_198 = arith.constant 5.000000e-01 : f32
      %282 = vector.broadcast %cst_198 : f32 to vector<8x128xf32>
      %283 = arith.mulf %282, %281 : vector<8x128xf32>
      %284 = math.tanh %283 : vector<8x128xf32>
      %cst_199 = arith.constant 5.000000e-01 : f32
      %285 = vector.broadcast %cst_199 : f32 to vector<8x128xf32>
      %286 = arith.mulf %285, %284 : vector<8x128xf32>
      %cst_200 = arith.constant 5.000000e-01 : f32
      %287 = vector.broadcast %cst_200 : f32 to vector<8x128xf32>
      %288 = arith.addf %286, %287 : vector<8x128xf32>
      %289 = vector.extract_strided_slice %280 {offsets = [0, 128], sizes = [8, 128], strides = [1, 1]} : vector<8x512xf32> to vector<8x128xf32>
      %cst_201 = arith.constant 5.000000e-01 : f32
      %290 = vector.broadcast %cst_201 : f32 to vector<8x128xf32>
      %291 = arith.mulf %290, %289 : vector<8x128xf32>
      %292 = math.tanh %291 : vector<8x128xf32>
      %cst_202 = arith.constant 5.000000e-01 : f32
      %293 = vector.broadcast %cst_202 : f32 to vector<8x128xf32>
      %294 = arith.mulf %293, %292 : vector<8x128xf32>
      %cst_203 = arith.constant 5.000000e-01 : f32
      %295 = vector.broadcast %cst_203 : f32 to vector<8x128xf32>
      %296 = arith.addf %294, %295 : vector<8x128xf32>
      %297 = vector.extract_strided_slice %280 {offsets = [0, 256], sizes = [8, 128], strides = [1, 1]} : vector<8x512xf32> to vector<8x128xf32>
      %298 = math.tanh %297 : vector<8x128xf32>
      %299 = vector.extract_strided_slice %280 {offsets = [0, 384], sizes = [8, 128], strides = [1, 1]} : vector<8x512xf32> to vector<8x128xf32>
      %cst_204 = arith.constant 5.000000e-01 : f32
      %300 = vector.broadcast %cst_204 : f32 to vector<8x128xf32>
      %301 = arith.mulf %300, %299 : vector<8x128xf32>
      %302 = math.tanh %301 : vector<8x128xf32>
      %cst_205 = arith.constant 5.000000e-01 : f32
      %303 = vector.broadcast %cst_205 : f32 to vector<8x128xf32>
      %304 = arith.mulf %303, %302 : vector<8x128xf32>
      %cst_206 = arith.constant 5.000000e-01 : f32
      %305 = vector.broadcast %cst_206 : f32 to vector<8x128xf32>
      %306 = arith.addf %304, %305 : vector<8x128xf32>
      %c0_207 = arith.constant 0 : index
      %c0_208 = arith.constant 0 : index
      %307 = vector.load %arg10[%c0_207, %c0_208] : memref<8x128xf32, #tpu.memory_space<vmem>>, vector<8x128xf32>
      %308 = arith.mulf %296, %307 : vector<8x128xf32>
      %309 = arith.mulf %288, %298 : vector<8x128xf32>
      %310 = arith.addf %308, %309 : vector<8x128xf32>
      %311 = math.tanh %310 : vector<8x128xf32>
      %312 = arith.mulf %306, %311 : vector<8x128xf32>
      %c0_209 = arith.constant 0 : index
      %c0_210 = arith.constant 0 : index
      %313 = vector.load %arg9[%c0_209, %c0_210] : memref<8x128xf32, #tpu.memory_space<vmem>>, vector<8x128xf32>
      tpu.vector_store %arg9[%c0_209, %c0_210], %312 {strides = array<i32>} : memref<8x128xf32, #tpu.memory_space<vmem>>, vector<8x128xf32>,
      %c0_211 = arith.constant 0 : index
      %c0_212 = arith.constant 0 : index
      %314 = vector.load %arg10[%c0_211, %c0_212] : memref<8x128xf32, #tpu.memory_space<vmem>>, vector<8x128xf32>
      tpu.vector_store %arg10[%c0_211, %c0_212], %310 {strides = array<i32>} : memref<8x128xf32, #tpu.memory_space<vmem>>, vector<8x128xf32>,
      %315 = arith.index_cast %c5_i32 : i32 to index
      %c0_213 = arith.constant 0 : index
      %c0_214 = arith.constant 0 : index
      %316 = vector.load %arg6[%315, %c0_213, %c0_214] : memref<8x8x128xf32, #tpu.memory_space<vmem>>, vector<1x8x128xf32>
      %317 = vector.shape_cast %316 : vector<1x8x128xf32> to vector<8x128xf32>
      %318 = vector.shape_cast %312 : vector<8x128xf32> to vector<1x8x128xf32>
      tpu.vector_store %arg6[%315, %c0_213, %c0_214], %318 {strides = array<i32>} : memref<8x8x128xf32, #tpu.memory_space<vmem>>, vector<1x8x128xf32>,
      %c6_i32 = arith.constant 6 : i32
      %319 = arith.index_cast %c6_i32 : i32 to index
      %c0_215 = arith.constant 0 : index
      %c0_216 = arith.constant 0 : index
      %320 = vector.load %arg6[%319, %c0_215, %c0_216] : memref<8x8x128xf32, #tpu.memory_space<vmem>>, vector<1x8x128xf32>
      %321 = vector.shape_cast %320 : vector<1x8x128xf32> to vector<8x128xf32>
      %c0_217 = arith.constant 0 : index
      %c0_218 = arith.constant 0 : index
      %322 = vector.load %arg11[%c0_217, %c0_218] : memref<8x256xf32, #tpu.memory_space<vmem>>, vector<8x128xf32>
      tpu.vector_store %arg11[%c0_217, %c0_218], %321 {strides = array<i32>} : memref<8x256xf32, #tpu.memory_space<vmem>>, vector<8x128xf32>,
      %c0_219 = arith.constant 0 : index
      %c0_220 = arith.constant 0 : index
      %323 = vector.load %arg9[%c0_219, %c0_220] : memref<8x128xf32, #tpu.memory_space<vmem>>, vector<8x128xf32>
      %c0_221 = arith.constant 0 : index
      %c128_222 = arith.constant 128 : index
      %324 = vector.load %arg11[%c0_221, %c128_222] : memref<8x256xf32, #tpu.memory_space<vmem>>, vector<8x128xf32>
      tpu.vector_store %arg11[%c0_221, %c128_222], %323 {strides = array<i32>} : memref<8x256xf32, #tpu.memory_space<vmem>>, vector<8x128xf32>,
      %c0_223 = arith.constant 0 : index
      %c0_224 = arith.constant 0 : index
      %325 = vector.load %arg11[%c0_223, %c0_224] : memref<8x256xf32, #tpu.memory_space<vmem>>, vector<8x256xf32>
      %c0_225 = arith.constant 0 : index
      %c0_226 = arith.constant 0 : index
      %326 = vector.load %arg12[%c0_225, %c0_226] : memref<256x512xf32, #tpu.memory_space<vmem>>, vector<256x512xf32>
      %cst_227 = arith.constant dense<0.000000e+00> : vector<8x512xf32>
      %327 = tpu.matmul %325, %326, %cst_227 {dimension_numbers = #tpu.dot_dimension_numbers<[1], [0], [0], [1], [0, 0, 1, 1], [], []>} : vector<8x256xf32>, vector<256x512xf32>, vector<8x512xf32> -> vector<8x512xf32>
      %c0_228 = arith.constant 0 : index
      %c0_229 = arith.constant 0 : index
      %328 = vector.load %arg13[%c0_228, %c0_229] : memref<1x512xf32, #tpu.memory_space<vmem>>, vector<1x512xf32>
      %329 = vector.broadcast %328 : vector<1x512xf32> to vector<8x512xf32>
      %330 = arith.addf %327, %329 : vector<8x512xf32>
      %331 = vector.extract_strided_slice %330 {offsets = [0, 0], sizes = [8, 128], strides = [1, 1]} : vector<8x512xf32> to vector<8x128xf32>
      %cst_230 = arith.constant 5.000000e-01 : f32
      %332 = vector.broadcast %cst_230 : f32 to vector<8x128xf32>
      %333 = arith.mulf %332, %331 : vector<8x128xf32>
      %334 = math.tanh %333 : vector<8x128xf32>
      %cst_231 = arith.constant 5.000000e-01 : f32
      %335 = vector.broadcast %cst_231 : f32 to vector<8x128xf32>
      %336 = arith.mulf %335, %334 : vector<8x128xf32>
      %cst_232 = arith.constant 5.000000e-01 : f32
      %337 = vector.broadcast %cst_232 : f32 to vector<8x128xf32>
      %338 = arith.addf %336, %337 : vector<8x128xf32>
      %339 = vector.extract_strided_slice %330 {offsets = [0, 128], sizes = [8, 128], strides = [1, 1]} : vector<8x512xf32> to vector<8x128xf32>
      %cst_233 = arith.constant 5.000000e-01 : f32
      %340 = vector.broadcast %cst_233 : f32 to vector<8x128xf32>
      %341 = arith.mulf %340, %339 : vector<8x128xf32>
      %342 = math.tanh %341 : vector<8x128xf32>
      %cst_234 = arith.constant 5.000000e-01 : f32
      %343 = vector.broadcast %cst_234 : f32 to vector<8x128xf32>
      %344 = arith.mulf %343, %342 : vector<8x128xf32>
      %cst_235 = arith.constant 5.000000e-01 : f32
      %345 = vector.broadcast %cst_235 : f32 to vector<8x128xf32>
      %346 = arith.addf %344, %345 : vector<8x128xf32>
      %347 = vector.extract_strided_slice %330 {offsets = [0, 256], sizes = [8, 128], strides = [1, 1]} : vector<8x512xf32> to vector<8x128xf32>
      %348 = math.tanh %347 : vector<8x128xf32>
      %349 = vector.extract_strided_slice %330 {offsets = [0, 384], sizes = [8, 128], strides = [1, 1]} : vector<8x512xf32> to vector<8x128xf32>
      %cst_236 = arith.constant 5.000000e-01 : f32
      %350 = vector.broadcast %cst_236 : f32 to vector<8x128xf32>
      %351 = arith.mulf %350, %349 : vector<8x128xf32>
      %352 = math.tanh %351 : vector<8x128xf32>
      %cst_237 = arith.constant 5.000000e-01 : f32
      %353 = vector.broadcast %cst_237 : f32 to vector<8x128xf32>
      %354 = arith.mulf %353, %352 : vector<8x128xf32>
      %cst_238 = arith.constant 5.000000e-01 : f32
      %355 = vector.broadcast %cst_238 : f32 to vector<8x128xf32>
      %356 = arith.addf %354, %355 : vector<8x128xf32>
      %c0_239 = arith.constant 0 : index
      %c0_240 = arith.constant 0 : index
      %357 = vector.load %arg10[%c0_239, %c0_240] : memref<8x128xf32, #tpu.memory_space<vmem>>, vector<8x128xf32>
      %358 = arith.mulf %346, %357 : vector<8x128xf32>
      %359 = arith.mulf %338, %348 : vector<8x128xf32>
      %360 = arith.addf %358, %359 : vector<8x128xf32>
      %361 = math.tanh %360 : vector<8x128xf32>
      %362 = arith.mulf %356, %361 : vector<8x128xf32>
      %c0_241 = arith.constant 0 : index
      %c0_242 = arith.constant 0 : index
      %363 = vector.load %arg9[%c0_241, %c0_242] : memref<8x128xf32, #tpu.memory_space<vmem>>, vector<8x128xf32>
      tpu.vector_store %arg9[%c0_241, %c0_242], %362 {strides = array<i32>} : memref<8x128xf32, #tpu.memory_space<vmem>>, vector<8x128xf32>,
      %c0_243 = arith.constant 0 : index
      %c0_244 = arith.constant 0 : index
      %364 = vector.load %arg10[%c0_243, %c0_244] : memref<8x128xf32, #tpu.memory_space<vmem>>, vector<8x128xf32>
      tpu.vector_store %arg10[%c0_243, %c0_244], %360 {strides = array<i32>} : memref<8x128xf32, #tpu.memory_space<vmem>>, vector<8x128xf32>,
      %365 = arith.index_cast %c6_i32 : i32 to index
      %c0_245 = arith.constant 0 : index
      %c0_246 = arith.constant 0 : index
      %366 = vector.load %arg6[%365, %c0_245, %c0_246] : memref<8x8x128xf32, #tpu.memory_space<vmem>>, vector<1x8x128xf32>
      %367 = vector.shape_cast %366 : vector<1x8x128xf32> to vector<8x128xf32>
      %368 = vector.shape_cast %362 : vector<8x128xf32> to vector<1x8x128xf32>
      tpu.vector_store %arg6[%365, %c0_245, %c0_246], %368 {strides = array<i32>} : memref<8x8x128xf32, #tpu.memory_space<vmem>>, vector<1x8x128xf32>,
      %c7_i32 = arith.constant 7 : i32
      %369 = arith.index_cast %c7_i32 : i32 to index
      %c0_247 = arith.constant 0 : index
      %c0_248 = arith.constant 0 : index
      %370 = vector.load %arg6[%369, %c0_247, %c0_248] : memref<8x8x128xf32, #tpu.memory_space<vmem>>, vector<1x8x128xf32>
      %371 = vector.shape_cast %370 : vector<1x8x128xf32> to vector<8x128xf32>
      %c0_249 = arith.constant 0 : index
      %c0_250 = arith.constant 0 : index
      %372 = vector.load %arg11[%c0_249, %c0_250] : memref<8x256xf32, #tpu.memory_space<vmem>>, vector<8x128xf32>
      tpu.vector_store %arg11[%c0_249, %c0_250], %371 {strides = array<i32>} : memref<8x256xf32, #tpu.memory_space<vmem>>, vector<8x128xf32>,
      %c0_251 = arith.constant 0 : index
      %c0_252 = arith.constant 0 : index
      %373 = vector.load %arg9[%c0_251, %c0_252] : memref<8x128xf32, #tpu.memory_space<vmem>>, vector<8x128xf32>
      %c0_253 = arith.constant 0 : index
      %c128_254 = arith.constant 128 : index
      %374 = vector.load %arg11[%c0_253, %c128_254] : memref<8x256xf32, #tpu.memory_space<vmem>>, vector<8x128xf32>
      tpu.vector_store %arg11[%c0_253, %c128_254], %373 {strides = array<i32>} : memref<8x256xf32, #tpu.memory_space<vmem>>, vector<8x128xf32>,
      %c0_255 = arith.constant 0 : index
      %c0_256 = arith.constant 0 : index
      %375 = vector.load %arg11[%c0_255, %c0_256] : memref<8x256xf32, #tpu.memory_space<vmem>>, vector<8x256xf32>
      %c0_257 = arith.constant 0 : index
      %c0_258 = arith.constant 0 : index
      %376 = vector.load %arg12[%c0_257, %c0_258] : memref<256x512xf32, #tpu.memory_space<vmem>>, vector<256x512xf32>
      %cst_259 = arith.constant dense<0.000000e+00> : vector<8x512xf32>
      %377 = tpu.matmul %375, %376, %cst_259 {dimension_numbers = #tpu.dot_dimension_numbers<[1], [0], [0], [1], [0, 0, 1, 1], [], []>} : vector<8x256xf32>, vector<256x512xf32>, vector<8x512xf32> -> vector<8x512xf32>
      %c0_260 = arith.constant 0 : index
      %c0_261 = arith.constant 0 : index
      %378 = vector.load %arg13[%c0_260, %c0_261] : memref<1x512xf32, #tpu.memory_space<vmem>>, vector<1x512xf32>
      %379 = vector.broadcast %378 : vector<1x512xf32> to vector<8x512xf32>
      %380 = arith.addf %377, %379 : vector<8x512xf32>
      %381 = vector.extract_strided_slice %380 {offsets = [0, 0], sizes = [8, 128], strides = [1, 1]} : vector<8x512xf32> to vector<8x128xf32>
      %cst_262 = arith.constant 5.000000e-01 : f32
      %382 = vector.broadcast %cst_262 : f32 to vector<8x128xf32>
      %383 = arith.mulf %382, %381 : vector<8x128xf32>
      %384 = math.tanh %383 : vector<8x128xf32>
      %cst_263 = arith.constant 5.000000e-01 : f32
      %385 = vector.broadcast %cst_263 : f32 to vector<8x128xf32>
      %386 = arith.mulf %385, %384 : vector<8x128xf32>
      %cst_264 = arith.constant 5.000000e-01 : f32
      %387 = vector.broadcast %cst_264 : f32 to vector<8x128xf32>
      %388 = arith.addf %386, %387 : vector<8x128xf32>
      %389 = vector.extract_strided_slice %380 {offsets = [0, 128], sizes = [8, 128], strides = [1, 1]} : vector<8x512xf32> to vector<8x128xf32>
      %cst_265 = arith.constant 5.000000e-01 : f32
      %390 = vector.broadcast %cst_265 : f32 to vector<8x128xf32>
      %391 = arith.mulf %390, %389 : vector<8x128xf32>
      %392 = math.tanh %391 : vector<8x128xf32>
      %cst_266 = arith.constant 5.000000e-01 : f32
      %393 = vector.broadcast %cst_266 : f32 to vector<8x128xf32>
      %394 = arith.mulf %393, %392 : vector<8x128xf32>
      %cst_267 = arith.constant 5.000000e-01 : f32
      %395 = vector.broadcast %cst_267 : f32 to vector<8x128xf32>
      %396 = arith.addf %394, %395 : vector<8x128xf32>
      %397 = vector.extract_strided_slice %380 {offsets = [0, 256], sizes = [8, 128], strides = [1, 1]} : vector<8x512xf32> to vector<8x128xf32>
      %398 = math.tanh %397 : vector<8x128xf32>
      %399 = vector.extract_strided_slice %380 {offsets = [0, 384], sizes = [8, 128], strides = [1, 1]} : vector<8x512xf32> to vector<8x128xf32>
      %cst_268 = arith.constant 5.000000e-01 : f32
      %400 = vector.broadcast %cst_268 : f32 to vector<8x128xf32>
      %401 = arith.mulf %400, %399 : vector<8x128xf32>
      %402 = math.tanh %401 : vector<8x128xf32>
      %cst_269 = arith.constant 5.000000e-01 : f32
      %403 = vector.broadcast %cst_269 : f32 to vector<8x128xf32>
      %404 = arith.mulf %403, %402 : vector<8x128xf32>
      %cst_270 = arith.constant 5.000000e-01 : f32
      %405 = vector.broadcast %cst_270 : f32 to vector<8x128xf32>
      %406 = arith.addf %404, %405 : vector<8x128xf32>
      %c0_271 = arith.constant 0 : index
      %c0_272 = arith.constant 0 : index
      %407 = vector.load %arg10[%c0_271, %c0_272] : memref<8x128xf32, #tpu.memory_space<vmem>>, vector<8x128xf32>
      %408 = arith.mulf %396, %407 : vector<8x128xf32>
      %409 = arith.mulf %388, %398 : vector<8x128xf32>
      %410 = arith.addf %408, %409 : vector<8x128xf32>
      %411 = math.tanh %410 : vector<8x128xf32>
      %412 = arith.mulf %406, %411 : vector<8x128xf32>
      %c0_273 = arith.constant 0 : index
      %c0_274 = arith.constant 0 : index
      %413 = vector.load %arg9[%c0_273, %c0_274] : memref<8x128xf32, #tpu.memory_space<vmem>>, vector<8x128xf32>
      tpu.vector_store %arg9[%c0_273, %c0_274], %412 {strides = array<i32>} : memref<8x128xf32, #tpu.memory_space<vmem>>, vector<8x128xf32>,
      %c0_275 = arith.constant 0 : index
      %c0_276 = arith.constant 0 : index
      %414 = vector.load %arg10[%c0_275, %c0_276] : memref<8x128xf32, #tpu.memory_space<vmem>>, vector<8x128xf32>
      tpu.vector_store %arg10[%c0_275, %c0_276], %410 {strides = array<i32>} : memref<8x128xf32, #tpu.memory_space<vmem>>, vector<8x128xf32>,
      %415 = arith.index_cast %c7_i32 : i32 to index
      %c0_277 = arith.constant 0 : index
      %c0_278 = arith.constant 0 : index
      %416 = vector.load %arg6[%415, %c0_277, %c0_278] : memref<8x8x128xf32, #tpu.memory_space<vmem>>, vector<1x8x128xf32>
      %417 = vector.shape_cast %416 : vector<1x8x128xf32> to vector<8x128xf32>
      %418 = vector.shape_cast %412 : vector<8x128xf32> to vector<1x8x128xf32>
      tpu.vector_store %arg6[%415, %c0_277, %c0_278], %418 {strides = array<i32>} : memref<8x8x128xf32, #tpu.memory_space<vmem>>, vector<1x8x128xf32>,
      %c8_i32 = arith.constant 8 : i32
      %c0_279 = arith.constant 0 : index
      %c0_280 = arith.constant 0 : index
      %419 = vector.load %arg9[%c0_279, %c0_280] : memref<8x128xf32, #tpu.memory_space<vmem>>, vector<8x128xf32>
      %420 = arith.index_cast %arg14 : i32 to index
      %c0_281 = arith.constant 0 : index
      %c0_282 = arith.constant 0 : index
      %421 = vector.load %arg7[%420, %c0_281, %c0_282] : memref<2x8x128xf32, #tpu.memory_space<vmem>>, vector<1x8x128xf32>
      %422 = vector.shape_cast %421 : vector<1x8x128xf32> to vector<8x128xf32>
      %423 = vector.shape_cast %419 : vector<8x128xf32> to vector<1x8x128xf32>
      tpu.vector_store %arg7[%420, %c0_281, %c0_282], %423 {strides = array<i32>} : memref<2x8x128xf32, #tpu.memory_space<vmem>>, vector<1x8x128xf32>,
      %c0_283 = arith.constant 0 : index
      %c0_284 = arith.constant 0 : index
      %424 = vector.load %arg10[%c0_283, %c0_284] : memref<8x128xf32, #tpu.memory_space<vmem>>, vector<8x128xf32>
      %425 = arith.index_cast %arg14 : i32 to index
      %c0_285 = arith.constant 0 : index
      %c0_286 = arith.constant 0 : index
      %426 = vector.load %arg8[%425, %c0_285, %c0_286] : memref<2x8x128xf32, #tpu.memory_space<vmem>>, vector<1x8x128xf32>
      %427 = vector.shape_cast %426 : vector<1x8x128xf32> to vector<8x128xf32>
      %428 = vector.shape_cast %424 : vector<8x128xf32> to vector<1x8x128xf32>
      tpu.vector_store %arg8[%425, %c0_285, %c0_286], %428 {strides = array<i32>} : memref<2x8x128xf32, #tpu.memory_space<vmem>>, vector<1x8x128xf32>,
    }
    %c2_i32_5 = arith.constant 2 : i32
    return
  }
  func.func @transform_0(%arg0: i32) -> (i32, i32, i32) {
    %c0_i32 = arith.constant 0 : i32
    %c0_i32_0 = arith.constant 0 : i32
    %c0_i32_1 = arith.constant 0 : i32
    return %c0_i32, %arg0, %c0_i32_0 : i32, i32, i32
  }
  func.func @transform_1(%arg0: i32) -> (i32, i32, i32) {
    %c0_i32 = arith.constant 0 : i32
    %c0_i32_0 = arith.constant 0 : i32
    %c0_i32_1 = arith.constant 0 : i32
    return %c0_i32, %arg0, %c0_i32_0 : i32, i32, i32
  }
  func.func @transform_2(%arg0: i32) -> (i32, i32, i32) {
    %c0_i32 = arith.constant 0 : i32
    %c0_i32_0 = arith.constant 0 : i32
    %c0_i32_1 = arith.constant 0 : i32
    return %c0_i32, %arg0, %c0_i32_0 : i32, i32, i32
  }
  func.func @transform_3(%arg0: i32) -> (i32, i32, i32) {
    %c0_i32 = arith.constant 0 : i32
    %c0_i32_0 = arith.constant 0 : i32
    %c0_i32_1 = arith.constant 0 : i32
    %c0_i32_2 = arith.constant 0 : i32
    return %c0_i32, %c0_i32_0, %c0_i32_1 : i32, i32, i32
  }
  func.func @transform_4(%arg0: i32) -> (i32, i32, i32) {
    %c0_i32 = arith.constant 0 : i32
    %c0_i32_0 = arith.constant 0 : i32
    %c0_i32_1 = arith.constant 0 : i32
    %c0_i32_2 = arith.constant 0 : i32
    return %c0_i32, %c0_i32_0, %c0_i32_1 : i32, i32, i32
  }
  func.func @transform_5(%arg0: i32) -> (i32, i32, i32) {
    %c0_i32 = arith.constant 0 : i32
    %c0_i32_0 = arith.constant 0 : i32
    %c0_i32_1 = arith.constant 0 : i32
    return %c0_i32, %arg0, %c0_i32_0 : i32, i32, i32
  }
  func.func @transform_6(%arg0: i32) -> (i32, i32, i32) {
    %c0_i32 = arith.constant 0 : i32
    %c0_i32_0 = arith.constant 0 : i32
    %c0_i32_1 = arith.constant 0 : i32
    return %c0_i32, %arg0, %c0_i32_0 : i32, i32, i32
  }
  func.func @transform_7(%arg0: i32) -> (i32, i32, i32) {
    %c0_i32 = arith.constant 0 : i32
    %c0_i32_0 = arith.constant 0 : i32
    %c0_i32_1 = arith.constant 0 : i32
    return %c0_i32, %arg0, %c0_i32_0 : i32, i32, i32
  }
}

</mosaic_0001>

<bundles_post_ra>
// kernel: lstm_model_forward.3
= control target key start
LH: loop header
LB: loop body
LE: loop exit
PB: predicated region body
PF: predicated region fallthrough
CT: control target
= control target key end

     0   :  { %s352_s0 = inlined_call_operand.vmem [shape: f32[32,128], index: 0, kind: input, shape index: {}]   ;;  %s353_s1 = inlined_call_operand.vmem [shape: f32[128,128], index: 1, kind: input, shape index: {}]   ;;  %s354_s2 = inlined_call_operand.vmem [shape: f32[1,128], index: 2, kind: input, shape index: {}]   ;;  %s355_s3 = inlined_call_operand.hbm [shape: f32[32,128], index: 3, kind: output, shape index: {}]  }
   0x1   :  { %v34_v0 = vld [vmem:[%s353_s1 + $0x78] sm:$0xff]  ;;  %v33_v1 = vld [vmem:[%s353_s1 + $0x70] sm:$0xff]  ;;  %v32_v2 = vld [vmem:[%s353_s1 + $0x68] sm:$0xff] }
   0x2   :  { %168 = vmatprep.subr.mxu0 %v34_v0  ;;  %206 = vmatprep.subr.mxu1 %v34_v0  ;;  %v31_v3 = vld [vmem:[%s353_s1 + $0x60] sm:$0xff]  ;;  %v30_v4 = vld [vmem:[%s353_s1 + $0x58] sm:$0xff] }
   0x3   :  { %169 = vmatpush3.msra.mxu0 %v34_v0  ;;  %222 = vmatpush3.msra.mxu1 %v34_v0 }
   0x4   :  { %170 = vmatprep.subr.mxu0 %v33_v1  ;;  %207 = vmatprep.subr.mxu1 %v33_v1 }
   0x5   :  { %171 = vmatpush3.msra.mxu0 %v33_v1  ;;  %223 = vmatpush3.msra.mxu1 %v33_v1 }
   0x6   :  { %172 = vmatprep.subr.mxu0 %v32_v2  ;;  %208 = vmatprep.subr.mxu1 %v32_v2 }
   0x7   :  { %173 = vmatpush3.msra.mxu0 %v32_v2  ;;  %224 = vmatpush3.msra.mxu1 %v32_v2 }
   0x8   :  { %8 = vsyncpa [#allocation3], 0  ;;  %174 = vmatprep.subr.mxu0 %v31_v3  ;;  %209 = vmatprep.subr.mxu1 %v31_v3  ;;  %v29_v5 = vld [vmem:[%s353_s1 + $0x50] sm:$0xff]  ;;  %v28_v6 = vld [vmem:[%s353_s1 + $0x48] sm:$0xff]  ;;  %s263_s26 = smov [#allocation2]  }
   0x9   :  { %175 = vmatpush3.msra.mxu0 %v31_v3  ;;  %225 = vmatpush3.msra.mxu1 %v31_v3  ;;  %v27_v7 = vld [vmem:[%s353_s1 + $0x40] sm:$0xff]  ;;  %v26_v8 = vld [vmem:[%s353_s1 + $0x38] sm:$0xff]  ;;  %v25_v9 = vld [vmem:[%s353_s1 + $0x30] sm:$0xff]  ;;  %s136_s27 = sshll.u32 %s263_s26, 4  ;;  %s137_s27 = int_to_ptr.vmem [resolvable:$true] %s136_s27 }
   0xa   :  { %176 = vmatprep.subr.mxu0 %v30_v4  ;;  %210 = vmatprep.subr.mxu1 %v30_v4  ;;  %v24_v10 = vld [vmem:[%s353_s1 + $0x28] sm:$0xff]  ;;  %v23_v11 = vld [vmem:[%s353_s1 + $0x20] sm:$0xff]  ;;  %v22_v12 = vld [vmem:[%s353_s1 + $0x18] sm:$0xff]  ;;  %p246_p1 = scmp.lt.s32.totalorder %s137_s27, %s137_s27 }
   0xb   :  { %177 = vmatpush3.msra.mxu0 %v30_v4  ;;  %226 = vmatpush3.msra.mxu1 %v30_v4  ;;  %v21_v13 = vld [vmem:[%s353_s1 + $0x10] sm:$0xff]  ;;  %v20_v14 = vld [vmem:[%s353_s1 + $0x8] sm:$0xff]  ;;  %v19_v15 = vld [vmem:[%s353_s1] sm:$0xff] }
   0xc   :  { %178 = vmatprep.subr.mxu0 %v29_v5  ;;  %211 = vmatprep.subr.mxu1 %v29_v5  ;;  %v15_v16 = vld [vmem:[%s352_s0] sm:$0xff]  ;;  %v17_v17 = vld [vmem:[%s352_s0 + $0x10] sm:$0xff]  ;;  %v16_v18 = vld [vmem:[%s352_s0 + $0x8] sm:$0xff] }
   0xd   :  { %179 = vmatpush3.msra.mxu0 %v29_v5  ;;  %227 = vmatpush3.msra.mxu1 %v29_v5  ;;  %v18_v19 = vld [vmem:[%s352_s0 + $0x18] sm:$0xff]  ;;  %v147_v20 = vld [vmem:[%s354_s2] ss:$0 sm:$0xff]  ;;  %s241_s0 = scalar_lea.vmem %s137_s27, 512 }
   0xe   :  { %180 = vmatprep.subr.mxu0 %v28_v6  ;;  %212 = vmatprep.subr.mxu1 %v28_v6  ;;  %p242_p0 = scmp.ne.s32.totalorder %s137_s27, %s241_s0  ;;  %p247_p2 = scmp.lt.s32.totalorder %s241_s0, %s241_s0 }
   0xf   :  { %181 = vmatpush3.msra.mxu0 %v28_v6  ;;  %228 = vmatpush3.msra.mxu1 %v28_v6 }
  0x10   :  { %182 = vmatprep.subr.mxu0 %v27_v7  ;;  %213 = vmatprep.subr.mxu1 %v27_v7  ;;  %p248_p3 = por %p247_p2, %p246_p1 }
  0x11   :  { %183 = vmatpush3.msra.mxu0 %v27_v7  ;;  %229 = vmatpush3.msra.mxu1 %v27_v7 }
  0x12   :  { %184 = vmatprep.subr.mxu0 %v26_v8  ;;  %214 = vmatprep.subr.mxu1 %v26_v8  ;;  %p249_p4 = pnand %p248_p3, %p242_p0 }
  0x13   :  { %185 = vmatpush3.msra.mxu0 %v26_v8  ;;  %230 = vmatpush3.msra.mxu1 %v26_v8 }
  0x14   :  { %186 = vmatprep.subr.mxu0 %v25_v9  ;;  %215 = vmatprep.subr.mxu1 %v25_v9 }
  0x15   :  { %187 = vmatpush3.msra.mxu0 %v25_v9  ;;  %231 = vmatpush3.msra.mxu1 %v25_v9 }
  0x16   :  { %188 = vmatprep.subr.mxu0 %v24_v10  ;;  %216 = vmatprep.subr.mxu1 %v24_v10 }
  0x17   :  { %189 = vmatpush3.msra.mxu0 %v24_v10  ;;  %232 = vmatpush3.msra.mxu1 %v24_v10 }
  0x18   :  { %190 = vmatprep.subr.mxu0 %v23_v11  ;;  %217 = vmatprep.subr.mxu1 %v23_v11 }
  0x19   :  { %191 = vmatpush3.msra.mxu0 %v23_v11  ;;  %233 = vmatpush3.msra.mxu1 %v23_v11 }
  0x1a   :  { %192 = vmatprep.subr.mxu0 %v22_v12  ;;  %218 = vmatprep.subr.mxu1 %v22_v12 }
  0x1b   :  { %193 = vmatpush3.msra.mxu0 %v22_v12  ;;  %234 = vmatpush3.msra.mxu1 %v22_v12 }
  0x1c   :  { %194 = vmatprep.subr.mxu0 %v21_v13  ;;  %219 = vmatprep.subr.mxu1 %v21_v13 }
  0x1d   :  { %195 = vmatpush3.msra.mxu0 %v21_v13  ;;  %235 = vmatpush3.msra.mxu1 %v21_v13 }
  0x1e   :  { %196 = vmatprep.subr.mxu0 %v20_v14  ;;  %220 = vmatprep.subr.mxu1 %v20_v14 }
  0x1f   :  { %197 = vmatpush3.msra.mxu0 %v20_v14  ;;  %236 = vmatpush3.msra.mxu1 %v20_v14 }
  0x20   :  { %198 = vmatprep.subr.mxu0 %v19_v15  ;;  %221 = vmatprep.subr.mxu1 %v19_v15 }
  0x21   :  { %199 = vmatpush3.msra.mxu0 %v19_v15  ;;  %237 = vmatpush3.msra.mxu1 %v19_v15 }
  0x22   :  { %200 = vmatprep.mubr.f32.mxu0 %v15_v16  ;;  %203 = vmatprep.mubr.f32.mxu1 %v17_v17 }
  0x23   :  { %201 = vmatmul.mubr.f32.vlgmr.msra.gmra.mxu0 %v16_v18  ;;  %204 = vmatmul.mubr.f32.vlgmr.msra.gmra.mxu1 %v18_v19 }
  0xe3   :  { %v202_v21 = vpop.f32.mrf.mxu0  ;;  %v205_v22 = vpop.f32.mrf.mxu1 }
  0xe4   :  { %v114_v23 = vadd.f32 %v202_v21, %v147_v20  ;;  %v124_v24 = vadd.f32 %v205_v22, %v147_v20 }
  0xe5   :  { %v108_v25 = vpop.f32.mrf.mxu0  ;;  %v118_v26 = vpop.f32.mrf.mxu1 }
  0xe6   :  { %128 = vst [vmem:[#allocation2 + $0x8] sm:$0xff] %v114_v23  ;;  %130 = vst [vmem:[#allocation2 + $0x18] sm:$0xff] %v124_v24  ;;  %v109_v27 = vadd.f32 %v147_v20, %v108_v25  ;;  %v119_v28 = vadd.f32 %v147_v20, %v118_v26 }
  0xe8   :  { %127 = vst [vmem:[#allocation2] sm:$0xff] %v109_v27  ;;  %129 = vst [vmem:[#allocation2 + $0x10] sm:$0xff] %v119_v28 }
  0xe9   :  { %252 = shalt.err (!%p249_p4)
}
  0xea   :  { %s264_s2 = smov 128   ;;  %s265_s28 = smov 8  }
  0xeb   :  { %142 = dma.vmem_to_hbm [thread:$0]  %s137_s27, 512, %s355_s3, [#allocation3], %s264_s2, %s264_s2, %s265_s28  }
  0xec   :  { %261 = dma.done.wait [#allocation3], 512  }
  0xed   :  { %262 = vsyncadd [#allocation3], 4294966784 }
  0xee   :  { %146 = vsyncpa [#allocation3], 1 }

// kernel: lstm_model_forward.2
= control target key start
LH: loop header
LB: loop body
LE: loop exit
PB: predicated region body
PF: predicated region fallthrough
CT: control target
= control target key end

     0   :  { %13 = vsyncpa [#allocation8], 0  ;;  %s3308_s24 = smov [#allocation7]   ;;  %s5342_s0 = inlined_call_operand.vmem [shape: f32[8,8,128], index: 0, kind: input, shape index: {}]   ;;  %s5343_s1 = inlined_call_operand.vmem [shape: f32[2,8,128], index: 1, kind: input, shape index: {}]   ;;  %s5344_s2 = inlined_call_operand.vmem [shape: f32[2,8,128], index: 2, kind: input, shape index: {}]   ;;  %s5345_s3 = inlined_call_operand.hbm [shape: f32[2,256,512], index: 3, kind: input, shape index: {}]   ;;  %s5346_s4 = inlined_call_operand.vmem [shape: f32[2,1,512], index: 4, kind: input, shape index: {}]   ;;  %s5347_s5 = inlined_call_operand.vmem [shape: f32[8,8,128], index: 5, kind: output, shape index: {0}]   ;;  %s5348_s6 = inlined_call_operand.vmem [shape: f32[2,8,128], index: 6, kind: output, shape index: {1}]   ;;  %s5349_s7 = inlined_call_operand.vmem [shape: f32[2,8,128], index: 7, kind: output, shape index: {2}]  }
   0x1   :  { %s25_s25 = sshll.u32 %s3308_s24, 4  ;;  %s26_s25 = int_to_ptr.vmem [resolvable:$true] %s25_s25 }
   0x2   :  { %s3286_s26 = scalar_lea.vmem %s26_s25, 32768  ;;  %p3291_p1 = scmp.lt.s32.totalorder %s26_s25, %s26_s25 }
   0x3   :  { %p3287_p0 = scmp.ne.s32.totalorder %s26_s25, %s3286_s26  ;;  %p3292_p2 = scmp.lt.s32.totalorder %s3286_s26, %s3286_s26 }
   0x5   :  { %p3293_p3 = por %p3292_p2, %p3291_p1 }
   0x7   :  { %p3294_p4 = pnand %p3293_p3, %p3287_p0 }
   0x9   :  { %3297 = shalt.err (!%p3294_p4)
}
   0xa   :  { %s3309_s27 = smov 512   ;;  %s3310_s28 = smov 32  }
   0xb   :  { %31 = dma.hbm_to_vmem [thread:$0]  %s5345_s3, 32768, %s26_s25, [#allocation8], %s3309_s27, %s3309_s27, %s3310_s28  }
   0xc   :  { %3302 = dma.done.wait [#allocation8], 32768  }
   0xd   :  { %3303 = vsyncadd [#allocation8], 4294934528  ;;  %v37_v0 = vld [vmem:[%s5342_s0] sm:$0xff]  ;;  %v38_v1 = vld [vmem:[%s5342_s0 + $0x8] sm:$0xff]  ;;  %s3402_s16 = smov 0  }
   0xe   :  { %v39_v2 = vld [vmem:[%s5342_s0 + $0x10] sm:$0xff]  ;;  %45 = vst [vmem:[%s5347_s5] sm:$0xff] %v37_v0  ;;  %46 = vst [vmem:[%s5347_s5 + $0x8] sm:$0xff] %v38_v1  ;;  %v40_v3 = vld [vmem:[%s5342_s0 + $0x18] sm:$0xff] }
   0xf   :  { %47 = vst [vmem:[%s5347_s5 + $0x10] sm:$0xff] %v39_v2  ;;  %v41_v4 = vld [vmem:[%s5342_s0 + $0x20] sm:$0xff]  ;;  %v42_v5 = vld [vmem:[%s5342_s0 + $0x28] sm:$0xff]  ;;  %48 = vst [vmem:[%s5347_s5 + $0x18] sm:$0xff] %v40_v3 }
  0x10   :  { %49 = vst [vmem:[%s5347_s5 + $0x20] sm:$0xff] %v41_v4  ;;  %50 = vst [vmem:[%s5347_s5 + $0x28] sm:$0xff] %v42_v5  ;;  %v43_v6 = vld [vmem:[%s5342_s0 + $0x30] sm:$0xff]  ;;  %v44_v7 = vld [vmem:[%s5342_s0 + $0x38] sm:$0xff] }
  0x11   :  { %51 = vst [vmem:[%s5347_s5 + $0x30] sm:$0xff] %v43_v6  ;;  %52 = vst [vmem:[%s5347_s5 + $0x38] sm:$0xff] %v44_v7 }
  0x12 LB: > { %s2954_s3 = sshll.u32 %s3306_s16, 10  ;;  %s2938_s0 = sshll.u32 %s3306_s16, 2  ;;  %s3306_s16 = sphi %s3402_s16, %s58_s16  }
  0x13   : > { %s3408_s17 = scalar_lea.vmem [#allocation7], %s2954_s3  ;;  %s319_s20 = scalar_lea.vmem %s5346_s4, %s2938_s0 }
  0x14   : > { %v3411_v8 = vld [vmem:[%s3408_s17 + $0x1e8] sm:$0xff]  ;;  %v3414_v9 = vld [vmem:[%s3408_s17 + $0x1e0] sm:$0xff]  ;;  %v3428_v13 = vld [vmem:[%s3408_s17 + $0x1f8] sm:$0xff]  ;;  %s3834_s21 = sshll.u32 %s3306_s16, 3  ;;  %s58_s16 = sadd.s32 1, %s3306_s16  }
  0x15   : > { %v3417_v10 = vld [vmem:[%s3408_s17 + $0x1c8] sm:$0xff]  ;;  %489 = vmatprep.subr.mxu0 %v3411_v8  ;;  %v3421_v11 = vld [vmem:[%s3408_s17 + $0x1c0] sm:$0xff]  ;;  %560 = vmatprep.subr.mxu1 %v3428_v13  ;;  %v3436_v15 = vld [vmem:[%s3408_s17 + $0x1f0] sm:$0xff]  ;;  %s327_s24 = scalar_lea.vmem %s5343_s1, %s3834_s21  ;;  %s330_s29 = scalar_lea.vmem %s5344_s2, %s3834_s21 }
  0x16   : > { %490 = vmatpush1.msra.mxu0 %v3414_v9  ;;  %v3425_v12 = vld [vmem:[%s3408_s17 + $0x1a8] sm:$0xff]  ;;  %v3432_v14 = vld [vmem:[%s3408_s17 + $0x1a0] sm:$0xff]  ;;  %v3439_v16 = vld [vmem:[%s3408_s17 + $0x1d8] sm:$0xff]  ;;  %561 = vmatpush1.msra.mxu1 %v3436_v15  ;;  %s2904_s14 = scalar_lea.vmem %s5349_s7, %s3834_s21  ;;  %s2901_s0 = scalar_lea.vmem %s5348_s6, %s3834_s21 }
  0x17   : > { %491 = vmatprep.subr.mxu0 %v3417_v10  ;;  %v3443_v17 = vld [vmem:[%s3408_s17 + $0x188] sm:$0xff]  ;;  %v3447_v18 = vld [vmem:[%s3408_s17 + $0x1d0] sm:$0xff]  ;;  %v3451_v19 = vld [vmem:[%s3408_s17 + $0x180] sm:$0xff]  ;;  %562 = vmatprep.subr.mxu1 %v3439_v16  ;;  %p55_p5 = scmp.ge.s32.totalorder %s58_s16, 2  }
  0x18   : > { %492 = vmatpush1.msra.mxu0 %v3421_v11  ;;  %v3455_v20 = vld [vmem:[%s3408_s17 + $0x1b8] sm:$0xff]  ;;  %v3458_v21 = vld [vmem:[%s3408_s17 + $0x1b0] sm:$0xff]  ;;  %v3462_v22 = vld [vmem:[%s3408_s17 + $0x168] sm:$0xff]  ;;  %563 = vmatpush1.msra.mxu1 %v3447_v18 }
  0x19   : > { %493 = vmatprep.subr.mxu0 %v3425_v12  ;;  %v3466_v23 = vld [vmem:[%s3408_s17 + $0x198] sm:$0xff]  ;;  %v3470_v24 = vld [vmem:[%s3408_s17 + $0x160] sm:$0xff]  ;;  %564 = vmatprep.subr.mxu1 %v3455_v20  ;;  %v3474_v25 = vld [vmem:[%s3408_s17 + $0x190] sm:$0xff] }
  0x1a   : > { %494 = vmatpush1.msra.mxu0 %v3432_v14  ;;  %v3478_v26 = vld [vmem:[%s3408_s17 + $0x148] sm:$0xff]  ;;  %565 = vmatpush1.msra.mxu1 %v3458_v21  ;;  %v3482_v27 = vld [vmem:[%s3408_s17 + $0x178] sm:$0xff]  ;;  %v3486_v28 = vld [vmem:[%s3408_s17 + $0x140] sm:$0xff] }
  0x1b   : > { %495 = vmatprep.subr.mxu0 %v3443_v17  ;;  %566 = vmatprep.subr.mxu1 %v3466_v23  ;;  %v3490_v29 = vld [vmem:[%s3408_s17 + $0x170] sm:$0xff]  ;;  %v3494_v30 = vld [vmem:[%s3408_s17 + $0x128] sm:$0xff]  ;;  %v3498_v31 = vld [vmem:[%s3408_s17 + $0x158] sm:$0xff] }
  0x1c   : > { %496 = vmatpush1.msra.mxu0 %v3451_v19  ;;  %567 = vmatpush1.msra.mxu1 %v3474_v25  ;;  %v3502_v32 = vld [vmem:[%s3408_s17 + $0x120] sm:$0xff]  ;;  %v3506_v33 = vld [vmem:[%s3408_s17 + $0x150] sm:$0xff]  ;;  %v3510_v34 = vld [vmem:[%s3408_s17 + $0x108] sm:$0xff] }
  0x1d   : > { %497 = vmatprep.subr.mxu0 %v3462_v22  ;;  %568 = vmatprep.subr.mxu1 %v3482_v27  ;;  %v3514_v35 = vld [vmem:[%s3408_s17 + $0x138] sm:$0xff]  ;;  %v3518_v36 = vld [vmem:[%s3408_s17 + $0x100] sm:$0xff]  ;;  %v3522_v37 = vld [vmem:[%s3408_s17 + $0x130] sm:$0xff] }
  0x1e   : > { %498 = vmatpush1.msra.mxu0 %v3470_v24  ;;  %569 = vmatpush1.msra.mxu1 %v3490_v29  ;;  %v3526_v38 = vld [vmem:[%s3408_s17 + $0xe8] sm:$0xff]  ;;  %v3530_v39 = vld [vmem:[%s3408_s17 + $0x118] sm:$0xff]  ;;  %v3534_v40 = vld [vmem:[%s3408_s17 + $0xe0] sm:$0xff] }
  0x1f   : > { %499 = vmatprep.subr.mxu0 %v3478_v26  ;;  %570 = vmatprep.subr.mxu1 %v3498_v31  ;;  %v3538_v41 = vld [vmem:[%s3408_s17 + $0x110] sm:$0xff]  ;;  %v3542_v42 = vld [vmem:[%s3408_s17 + $0xc8] sm:$0xff]  ;;  %v3546_v43 = vld [vmem:[%s3408_s17 + $0xf8] sm:$0xff] }
  0x20   : > { %500 = vmatpush1.msra.mxu0 %v3486_v28  ;;  %571 = vmatpush1.msra.mxu1 %v3506_v33  ;;  %v3550_v44 = vld [vmem:[%s3408_s17 + $0xc0] sm:$0xff]  ;;  %v3554_v45 = vld [vmem:[%s3408_s17 + $0xf0] sm:$0xff]  ;;  %v3558_v46 = vld [vmem:[%s3408_s17 + $0xa8] sm:$0xff] }
  0x21   : > { %501 = vmatprep.subr.mxu0 %v3494_v30  ;;  %572 = vmatprep.subr.mxu1 %v3514_v35  ;;  %v3562_v47 = vld [vmem:[%s3408_s17 + $0xd8] sm:$0xff]  ;;  %v3566_v48 = vld [vmem:[%s3408_s17 + $0xa0] sm:$0xff]  ;;  %v3570_v49 = vld [vmem:[%s3408_s17 + $0xd0] sm:$0xff] }
  0x22   : > { %502 = vmatpush1.msra.mxu0 %v3502_v32  ;;  %573 = vmatpush1.msra.mxu1 %v3522_v37  ;;  %v3574_v50 = vld [vmem:[%s3408_s17 + $0x88] sm:$0xff]  ;;  %v3578_v51 = vld [vmem:[%s3408_s17 + $0xb8] sm:$0xff]  ;;  %v3582_v52 = vld [vmem:[%s3408_s17 + $0x80] sm:$0xff] }
  0x23   : > { %503 = vmatprep.subr.mxu0 %v3510_v34  ;;  %574 = vmatprep.subr.mxu1 %v3530_v39  ;;  %5719 = vst [vmem:[#allocation10_spill] sm:$0xff] %v3574_v50  ;;  %5720 = vst [vmem:[#allocation11_spill] sm:$0xff] %v3582_v52  ;;  %v3586_v53 = vld [vmem:[%s3408_s17 + $0xb0] sm:$0xff]  ;;  %v3590_v54 = vld [vmem:[%s3408_s17 + $0x68] sm:$0xff] }
  0x24   : > { %504 = vmatpush1.msra.mxu0 %v3518_v36  ;;  %575 = vmatpush1.msra.mxu1 %v3538_v41  ;;  %5721 = vst [vmem:[#allocation12_spill] sm:$0xff] %v3590_v54  ;;  %v3594_v55 = vld [vmem:[%s3408_s17 + $0x98] sm:$0xff]  ;;  %v3598_v56 = vld [vmem:[%s3408_s17 + $0x60] sm:$0xff]  ;;  %v3602_v57 = vld [vmem:[%s3408_s17 + $0x90] sm:$0xff] }
  0x25   : > { %505 = vmatprep.subr.mxu0 %v3526_v38  ;;  %576 = vmatprep.subr.mxu1 %v3546_v43  ;;  %5722 = vst [vmem:[#allocation13_spill] sm:$0xff] %v3594_v55  ;;  %5723 = vst [vmem:[#allocation14_spill] sm:$0xff] %v3598_v56  ;;  %v3606_v58 = vld [vmem:[%s3408_s17 + $0x48] sm:$0xff]  ;;  %v3610_v59 = vld [vmem:[%s3408_s17 + $0x78] sm:$0xff] }
  0x26   : > { %506 = vmatpush1.msra.mxu0 %v3534_v40  ;;  %577 = vmatpush1.msra.mxu1 %v3554_v45  ;;  %5724 = vst [vmem:[#allocation15_spill] sm:$0xff] %v3602_v57  ;;  %5725 = vst [vmem:[#allocation16_spill] sm:$0xff] %v3606_v58  ;;  %v3614_v60 = vld [vmem:[%s3408_s17 + $0x40] sm:$0xff]  ;;  %v3618_v61 = vld [vmem:[%s3408_s17 + $0x70] sm:$0xff] }
  0x27   : > { %507 = vmatprep.subr.mxu0 %v3542_v42  ;;  %578 = vmatprep.subr.mxu1 %v3562_v47  ;;  %5726 = vst [vmem:[#allocation17_spill] sm:$0xff] %v3610_v59  ;;  %5727 = vst [vmem:[#allocation18_spill] sm:$0xff] %v3614_v60  ;;  %v3622_v62 = vld [vmem:[%s3408_s17 + $0x28] sm:$0xff]  ;;  %v3626_v63 = vld [vmem:[%s3408_s17 + $0x58] sm:$0xff] }
  0x28   : > { %508 = vmatpush1.msra.mxu0 %v3550_v44  ;;  %579 = vmatpush1.msra.mxu1 %v3570_v49  ;;  %5728 = vst [vmem:[#allocation19_spill] sm:$0xff] %v3618_v61  ;;  %5729 = vst [vmem:[#allocation20_spill] sm:$0xff] %v3622_v62  ;;  %v3630_v0 = vld [vmem:[%s3408_s17 + $0x20] sm:$0xff]  ;;  %v3634_v1 = vld [vmem:[%s3408_s17 + $0x50] sm:$0xff] }
  0x29   : > { %509 = vmatprep.subr.mxu0 %v3558_v46  ;;  %580 = vmatprep.subr.mxu1 %v3578_v51  ;;  %5730 = vst [vmem:[#allocation21_spill] sm:$0xff] %v3626_v63  ;;  %5731 = vst [vmem:[#allocation22_spill] sm:$0xff] %v3630_v0  ;;  %v3638_v2 = vld [vmem:[%s3408_s17 + $0x8] sm:$0xff]  ;;  %v3642_v3 = vld [vmem:[%s3408_s17 + $0x38] sm:$0xff] }
  0x2a   : > { %510 = vmatpush1.msra.mxu0 %v3566_v48  ;;  %581 = vmatpush1.msra.mxu1 %v3586_v53  ;;  %5732 = vst [vmem:[#allocation23_spill] sm:$0xff] %v3634_v1  ;;  %5733 = vst [vmem:[#allocation24_spill] sm:$0xff] %v3638_v2  ;;  %v3646_v4 = vld [vmem:[%s3408_s17] sm:$0xff]  ;;  %v3650_v5 = vld [vmem:[%s3408_s17 + $0x30] sm:$0xff] }
  0x2b   : > { %511 = vmatprep.subr.mxu0 %v3574_v50  ;;  %582 = vmatprep.subr.mxu1 %v3594_v55  ;;  %5734 = vst [vmem:[#allocation25_spill] sm:$0xff] %v3642_v3  ;;  %5735 = vst [vmem:[#allocation26_spill] sm:$0xff] %v3646_v4  ;;  %v3654_v6 = vld [vmem:[%s3408_s17 + $0x3e8] sm:$0xff]  ;;  %v3658_v7 = vld [vmem:[%s3408_s17 + $0x18] sm:$0xff] }
  0x2c   : > { %512 = vmatpush1.msra.mxu0 %v3582_v52  ;;  %583 = vmatpush1.msra.mxu1 %v3602_v57  ;;  %5736 = vst [vmem:[#allocation27_spill] sm:$0xff] %v3650_v5  ;;  %5737 = vst [vmem:[#allocation28_spill] sm:$0xff] %v3654_v6 }
  0x2d   : > { %513 = vmatprep.subr.mxu0 %v3590_v54  ;;  %584 = vmatprep.subr.mxu1 %v3610_v59  ;;  %5738 = vst [vmem:[#allocation29_spill] sm:$0xff] %v3658_v7 }
  0x2e   : > { %514 = vmatpush1.msra.mxu0 %v3598_v56  ;;  %585 = vmatpush1.msra.mxu1 %v3618_v61  ;;  %v3719_v61 = vld [vmem:[%s3408_s17 + $0x368] sm:$0xff] }
  0x2f   : > { %515 = vmatprep.subr.mxu0 %v3606_v58  ;;  %586 = vmatprep.subr.mxu1 %v3626_v63  ;;  %v3666_v63 = vld [vmem:[%s3408_s17 + $0x10] sm:$0xff]  ;;  %5753 = vst [vmem:[#allocation44_spill] sm:$0xff] %v3719_v61 }
  0x30   : > { %516 = vmatpush1.msra.mxu0 %v3614_v60  ;;  %587 = vmatpush1.msra.mxu1 %v3634_v1  ;;  %5740 = vst [vmem:[#allocation31_spill] sm:$0xff] %v3666_v63  ;;  %v3674_v1 = vld [vmem:[%s3408_s17 + $0x3f8] sm:$0xff] }
  0x31   : > { %517 = vmatprep.subr.mxu0 %v3622_v62  ;;  %v3662_v62 = vld [vmem:[%s3408_s17 + $0x3e0] sm:$0xff]  ;;  %588 = vmatprep.subr.mxu1 %v3642_v3  ;;  %5742 = vst [vmem:[#allocation33_spill] sm:$0xff] %v3674_v1  ;;  %v3682_v3 = vld [vmem:[%s3408_s17 + $0x3f0] sm:$0xff] }
  0x32   : > { %518 = vmatpush1.msra.mxu0 %v3630_v0  ;;  %5739 = vst [vmem:[#allocation30_spill] sm:$0xff] %v3662_v62  ;;  %v3670_v0 = vld [vmem:[%s3408_s17 + $0x3c8] sm:$0xff]  ;;  %589 = vmatpush1.msra.mxu1 %v3650_v5  ;;  %5744 = vst [vmem:[#allocation35_spill] sm:$0xff] %v3682_v3  ;;  %v3690_v5 = vld [vmem:[%s3408_s17 + $0x3d8] sm:$0xff] }
  0x33   : > { %519 = vmatprep.subr.mxu0 %v3638_v2  ;;  %5741 = vst [vmem:[#allocation32_spill] sm:$0xff] %v3670_v0  ;;  %v3678_v2 = vld [vmem:[%s3408_s17 + $0x3c0] sm:$0xff]  ;;  %590 = vmatprep.subr.mxu1 %v3658_v7  ;;  %5746 = vst [vmem:[#allocation37_spill] sm:$0xff] %v3690_v5  ;;  %v3698_v7 = vld [vmem:[%s3408_s17 + $0x3d0] sm:$0xff] }
  0x34   : > { %520 = vmatpush1.msra.mxu0 %v3646_v4  ;;  %5743 = vst [vmem:[#allocation34_spill] sm:$0xff] %v3678_v2  ;;  %v3686_v4 = vld [vmem:[%s3408_s17 + $0x3a8] sm:$0xff]  ;;  %591 = vmatpush1.msra.mxu1 %v3666_v63  ;;  %5748 = vst [vmem:[#allocation39_spill] sm:$0xff] %v3698_v7  ;;  %v3706_v63 = vld [vmem:[%s3408_s17 + $0x3b8] sm:$0xff] }
  0x35   : > { %521 = vmatprep.subr.mxu0 %v3654_v6  ;;  %5745 = vst [vmem:[#allocation36_spill] sm:$0xff] %v3686_v4  ;;  %v3694_v6 = vld [vmem:[%s3408_s17 + $0x3a0] sm:$0xff]  ;;  %592 = vmatprep.subr.mxu1 %v3674_v1  ;;  %5750 = vst [vmem:[#allocation41_spill] sm:$0xff] %v3706_v63  ;;  %v3714_v1 = vld [vmem:[%s3408_s17 + $0x3b0] sm:$0xff] }
  0x36   : > { %522 = vmatpush2.msra.mxu0 %v3662_v62  ;;  %5747 = vst [vmem:[#allocation38_spill] sm:$0xff] %v3694_v6  ;;  %v3702_v62 = vld [vmem:[%s3408_s17 + $0x388] sm:$0xff]  ;;  %593 = vmatpush2.msra.mxu1 %v3682_v3  ;;  %5752 = vst [vmem:[#allocation43_spill] sm:$0xff] %v3714_v1  ;;  %v3723_v3 = vld [vmem:[%s3408_s17 + $0x398] sm:$0xff] }
  0x37   : > { %523 = vmatprep.subr.mxu0 %v3670_v0  ;;  %5749 = vst [vmem:[#allocation40_spill] sm:$0xff] %v3702_v62  ;;  %v3710_v0 = vld [vmem:[%s3408_s17 + $0x380] sm:$0xff]  ;;  %594 = vmatprep.subr.mxu1 %v3690_v5  ;;  %5754 = vst [vmem:[#allocation45_spill] sm:$0xff] %v3723_v3  ;;  %v3731_v5 = vld [vmem:[%s3408_s17 + $0x390] sm:$0xff] }
  0x38   : > { %524 = vmatpush2.msra.mxu0 %v3678_v2  ;;  %5751 = vst [vmem:[#allocation42_spill] sm:$0xff] %v3710_v0  ;;  %595 = vmatpush2.msra.mxu1 %v3698_v7  ;;  %5756 = vst [vmem:[#allocation47_spill] sm:$0xff] %v3731_v5  ;;  %v3735_v2 = vld [vmem:[%s3408_s17 + $0x348] sm:$0xff]  ;;  %v3739_v7 = vld [vmem:[%s3408_s17 + $0x378] sm:$0xff] }
  0x39   : > { %525 = vmatprep.subr.mxu0 %v3686_v4  ;;  %v3727_v4 = vld [vmem:[%s3408_s17 + $0x360] sm:$0xff]  ;;  %596 = vmatprep.subr.mxu1 %v3706_v63  ;;  %5757 = vst [vmem:[#allocation48_spill] sm:$0xff] %v3735_v2  ;;  %5758 = vst [vmem:[#allocation49_spill] sm:$0xff] %v3739_v7 }
  0x3a   : > { %526 = vmatpush2.msra.mxu0 %v3694_v6  ;;  %5755 = vst [vmem:[#allocation46_spill] sm:$0xff] %v3727_v4  ;;  %597 = vmatpush2.msra.mxu1 %v3714_v1  ;;  %v3746_v63 = vld [vmem:[%s3408_s17 + $0x340] sm:$0xff]  ;;  %v3755_v1 = vld [vmem:[%s3408_s17 + $0x328] sm:$0xff]  ;;  %v3759_v6 = vld [vmem:[%s3408_s17 + $0x358] sm:$0xff] }
  0x3b   : > { %527 = vmatprep.subr.mxu0 %v3702_v62  ;;  %5759 = vst [vmem:[#allocation50_spill] sm:$0xff] %v3746_v63  ;;  %598 = vmatprep.subr.mxu1 %v3723_v3  ;;  %v5761_v62 = vlaneseq  ;;  %5762 = vst [vmem:[#allocation52_spill] sm:$0xff] %v3755_v1  ;;  %v3767_v3 = vld [vmem:[%s3408_s17 + $0x350] sm:$0xff] }
  0x3c   : > { %528 = vmatpush2.msra.mxu0 %v3710_v0  ;;  %v3750_v0 = vld [vmem:[%s3408_s17 + $0x370] sm:$0xff]  ;;  %599 = vmatpush2.msra.mxu1 %v3731_v5  ;;  %5763 = vst [vmem:[#allocation53_spill] sm:$0xff] %v3759_v6  ;;  %5765 = vst [vmem:[#allocation55_spill] sm:$0xff] %v3767_v3  ;;  %v3775_v5 = vld [vmem:[%s3408_s17 + $0x338] sm:$0xff] }
  0x3d   : > { %529 = vmatprep.subr.mxu0 %v3719_v61  ;;  %5760 = vst [vmem:[#allocation51_spill] sm:$0xff] %v3750_v0  ;;  %vm323_vm0 = vcmp.lt.s32.totalorder %v5761_v62, 512  ;;  %v3763_v61 = vld [vmem:[%s3408_s17 + $0x320] sm:$0xff]  ;;  %600 = vmatprep.subr.mxu1 %v3739_v7  ;;  %5767 = vst [vmem:[#allocation57_spill] sm:$0xff] %v3775_v5  ;;  %v3783_v7 = vld [vmem:[%s3408_s17 + $0x330] sm:$0xff] }
  0x3e   : > { %530 = vmatpush2.msra.mxu0 %v3727_v4  ;;  %5764 = vst [vmem:[#allocation54_spill] sm:$0xff] %v3763_v61  ;;  %v320_v62 = vld [vmem:[%s319_s20] sm:$0xf]  ;;  %v3771_v4 = vld [vmem:[%s3408_s17 + $0x308] sm:$0xff]  ;;  %601 = vmatpush2.msra.mxu1 %v3750_v0  ;;  %5769 = vst [vmem:[#allocation59_spill] sm:$0xff] %v3783_v7 }
  0x3f   : > { %531 = vmatprep.subr.mxu0 %v3735_v2  ;;  %5766 = vst [vmem:[#allocation56_spill] sm:$0xff] %v3771_v4  ;;  %325 = vst.msk [vmem:[#allocation6] sm:$0xf] %vm323_vm0, %v320_v62  ;;  %v3779_v2 = vld [vmem:[%s3408_s17 + $0x300] sm:$0xff]  ;;  %602 = vmatprep.subr.mxu1 %v3759_v6  ;;  %v3791_v0 = vld [vmem:[%s3408_s17 + $0x318] sm:$0xff] }
  0x40   : > { %532 = vmatpush2.msra.mxu0 %v3746_v63  ;;  %5768 = vst [vmem:[#allocation58_spill] sm:$0xff] %v3779_v2  ;;  %v3787_v63 = vld [vmem:[%s3408_s17 + $0x2e8] sm:$0xff]  ;;  %603 = vmatpush2.msra.mxu1 %v3767_v3  ;;  %5771 = vst [vmem:[#allocation61_spill] sm:$0xff] %v3791_v0  ;;  %v3795_v62 = vld [vmem:[%s3408_s17 + $0x2e0] sm:$0xff] }
  0x41   : > { %533 = vmatprep.subr.mxu0 %v3755_v1  ;;  %5770 = vst [vmem:[#allocation60_spill] sm:$0xff] %v3787_v63  ;;  %5772 = vst [vmem:[#allocation62_spill] sm:$0xff] %v3795_v62  ;;  %604 = vmatprep.subr.mxu1 %v3775_v5  ;;  %v3799_v6 = vld [vmem:[%s3408_s17 + $0x310] sm:$0xff]  ;;  %v3807_v3 = vld [vmem:[%s3408_s17 + $0x2f8] sm:$0xff] }
  0x42   : > { %534 = vmatpush2.msra.mxu0 %v3763_v61  ;;  %5773 = vst [vmem:[#allocation63_spill] sm:$0xff] %v3799_v6  ;;  %v3803_v61 = vld [vmem:[%s3408_s17 + $0x2c8] sm:$0xff]  ;;  %605 = vmatpush2.msra.mxu1 %v3783_v7  ;;  %5775 = vst [vmem:[#allocation65_spill] sm:$0xff] %v3807_v3  ;;  %v3815_v5 = vld [vmem:[%s3408_s17 + $0x2f0] sm:$0xff] }
  0x43   : > { %535 = vmatprep.subr.mxu0 %v3771_v4  ;;  %5774 = vst [vmem:[#allocation64_spill] sm:$0xff] %v3803_v61  ;;  %v3811_v4 = vld [vmem:[%s3408_s17 + $0x2c0] sm:$0xff]  ;;  %606 = vmatprep.subr.mxu1 %v3791_v0  ;;  %5777 = vst [vmem:[#allocation67_spill] sm:$0xff] %v3815_v5  ;;  %v3823_v7 = vld [vmem:[%s3408_s17 + $0x2d8] sm:$0xff] }
  0x44   : > { %536 = vmatpush2.msra.mxu0 %v3779_v2  ;;  %5776 = vst [vmem:[#allocation66_spill] sm:$0xff] %v3811_v4  ;;  %v3819_v2 = vld [vmem:[%s3408_s17 + $0x2a8] sm:$0xff]  ;;  %607 = vmatpush2.msra.mxu1 %v3799_v6  ;;  %5779 = vst [vmem:[#allocation69_spill] sm:$0xff] %v3823_v7  ;;  %v3831_v0 = vld [vmem:[%s3408_s17 + $0x2d0] sm:$0xff] }
  0x45   : > { %537 = vmatprep.subr.mxu0 %v3787_v63  ;;  %5778 = vst [vmem:[#allocation68_spill] sm:$0xff] %v3819_v2  ;;  %v3827_v63 = vld [vmem:[%s3408_s17 + $0x2a0] sm:$0xff]  ;;  %608 = vmatprep.subr.mxu1 %v3807_v3  ;;  %5781 = vst [vmem:[#allocation71_spill] sm:$0xff] %v3831_v0  ;;  %v3838_v6 = vld [vmem:[%s3408_s17 + $0x288] sm:$0xff] }
  0x46   : > { %538 = vmatpush2.msra.mxu0 %v3795_v62  ;;  %5780 = vst [vmem:[#allocation70_spill] sm:$0xff] %v3827_v63  ;;  %5782 = vst [vmem:[#allocation72_spill] sm:$0xff] %v3838_v6  ;;  %609 = vmatpush2.msra.mxu1 %v3815_v5  ;;  %v3846_v3 = vld [vmem:[%s3408_s17 + $0x280] sm:$0xff]  ;;  %v3850_v62 = vld [vmem:[%s3408_s17 + $0x2b0] sm:$0xff] }
  0x47   : > { %539 = vmatprep.subr.mxu0 %v3803_v61  ;;  %v3842_v61 = vld [vmem:[%s3408_s17 + $0x2b8] sm:$0xff]  ;;  %5784 = vst [vmem:[#allocation74_spill] sm:$0xff] %v3846_v3  ;;  %610 = vmatprep.subr.mxu1 %v3823_v7  ;;  %5785 = vst [vmem:[#allocation75_spill] sm:$0xff] %v3850_v62  ;;  %v3866_v7 = vld [vmem:[%s3408_s17 + $0x260] sm:$0xff] }
  0x48   : > { %540 = vmatpush2.msra.mxu0 %v3811_v4  ;;  %5783 = vst [vmem:[#allocation73_spill] sm:$0xff] %v3842_v61  ;;  %v3854_v4 = vld [vmem:[%s3408_s17 + $0x268] sm:$0xff]  ;;  %611 = vmatpush2.msra.mxu1 %v3831_v0  ;;  %v3858_v5 = vld [vmem:[%s3408_s17 + $0x298] sm:$0xff]  ;;  %5788 = vst [vmem:[#allocation78_spill] sm:$0xff] %v3866_v7 }
  0x49   : > { %541 = vmatprep.subr.mxu0 %v3819_v2  ;;  %5786 = vst [vmem:[#allocation76_spill] sm:$0xff] %v3854_v4  ;;  %5787 = vst [vmem:[#allocation77_spill] sm:$0xff] %v3858_v5  ;;  %612 = vmatprep.subr.mxu1 %v3842_v61  ;;  %v3874_v0 = vld [vmem:[%s3408_s17 + $0x248] sm:$0xff]  ;;  %v3878_v2 = vld [vmem:[%s3408_s17 + $0x278] sm:$0xff] }
  0x4a   : > { %542 = vmatpush2.msra.mxu0 %v3827_v63  ;;  %v3870_v63 = vld [vmem:[%s3408_s17 + $0x290] sm:$0xff]  ;;  %5790 = vst [vmem:[#allocation80_spill] sm:$0xff] %v3874_v0  ;;  %613 = vmatpush2.msra.mxu1 %v3850_v62  ;;  %5791 = vst [vmem:[#allocation81_spill] sm:$0xff] %v3878_v2  ;;  %v328_v61 = vld [vmem:[%s327_s24] sm:$0xff] }
  0x4b   : > { %543 = vmatprep.subr.mxu0 %v3838_v6  ;;  %5789 = vst [vmem:[#allocation79_spill] sm:$0xff] %v3870_v63  ;;  %v3882_v6 = vld [vmem:[%s3408_s17 + $0x240] sm:$0xff]  ;;  %614 = vmatprep.subr.mxu1 %v3858_v5  ;;  %v3891_v1 = vld [vmem:[%s3408_s17 + $0x270] sm:$0xff]  ;;  %v3903_v5 = vld [vmem:[%s3408_s17 + $0x208] sm:$0xff] }
  0x4c   : > { %544 = vmatpush2.msra.mxu0 %v3846_v3  ;;  %5792 = vst [vmem:[#allocation82_spill] sm:$0xff] %v3882_v6  ;;  %v3887_v3 = vld [vmem:[%s3408_s17 + $0x228] sm:$0xff]  ;;  %615 = vmatpush2.msra.mxu1 %v3870_v63  ;;  %5794 = vst [vmem:[#allocation84_spill] sm:$0xff] %v3891_v1  ;;  %v3895_v62 = vld [vmem:[%s3408_s17 + $0x220] sm:$0xff] }
  0x4d   : > { %545 = vmatprep.subr.mxu0 %v3854_v4  ;;  %5793 = vst [vmem:[#allocation83_spill] sm:$0xff] %v3887_v3  ;;  %5795 = vst [vmem:[#allocation85_spill] sm:$0xff] %v3895_v62  ;;  %616 = vmatprep.subr.mxu1 %v3878_v2  ;;  %v3899_v4 = vld [vmem:[%s3408_s17 + $0x258] sm:$0xff]  ;;  %v3910_v63 = vld [vmem:[%s3408_s17 + $0x200] sm:$0xff] }
  0x4e   : > { %546 = vmatpush2.msra.mxu0 %v3866_v7  ;;  %5796 = vst [vmem:[#allocation86_spill] sm:$0xff] %v3899_v4  ;;  %5797 = vst [vmem:[#allocation87_spill] sm:$0xff] %v3903_v5  ;;  %553 = vmatprep.mubr.f32.mxu0 %v328_v61  ;;  %v3906_v7 = vld [vmem:[%s3408_s17 + $0x250] sm:$0xff] }
  0x4f   : > { %547 = vmatprep.subr.mxu0 %v3874_v0  ;;  %5798 = vst [vmem:[#allocation88_spill] sm:$0xff] %v3906_v7  ;;  %5799 = vst [vmem:[#allocation89_spill] sm:$0xff] %v3910_v63  ;;  %617 = vmatpush2.msra.mxu1 %v3891_v1  ;;  %v3914_v0 = vld [vmem:[%s3408_s17 + $0x238] sm:$0xff]  ;;  %v3922_v2 = vld [vmem:[%s3408_s17 + $0x230] sm:$0xff] }
  0x50   : > { %548 = vmatpush2.msra.mxu0 %v3882_v6  ;;  %5800 = vst [vmem:[#allocation90_spill] sm:$0xff] %v3914_v0  ;;  %v333_v6 = vld [vmem:[%s5347_s5] sm:$0xff]  ;;  %618 = vmatprep.subr.mxu1 %v3899_v4  ;;  %5801 = vst [vmem:[#allocation91_spill] sm:$0xff] %v3922_v2  ;;  %v3932_v1 = vld [vmem:[%s3408_s17 + $0x210] sm:$0xff] }
  0x51   : > { %549 = vmatprep.subr.mxu0 %v3887_v3  ;;  %619 = vmatpush2.msra.mxu1 %v3906_v7  ;;  %v3927_v3 = vld [vmem:[%s3408_s17 + $0x218] sm:$0xff]  ;;  %5803 = vst [vmem:[#allocation93_spill] sm:$0xff] %v3932_v1 }
  0x52   : > { %550 = vmatpush2.msra.mxu0 %v3895_v62  ;;  %5802 = vst [vmem:[#allocation92_spill] sm:$0xff] %v3927_v3  ;;  %620 = vmatprep.subr.mxu1 %v3914_v0 }
  0x53   : > { %551 = vmatprep.subr.mxu0 %v3903_v5  ;;  %621 = vmatpush2.msra.mxu1 %v3922_v2 }
  0x54   : > { %552 = vmatpush2.msra.mxu0 %v3910_v63  ;;  %622 = vmatprep.subr.mxu1 %v3927_v3 }
  0x55   : > { %554 = vmatmul.mubr.f32.vlgmr.msra.gmra.mxu0 %v333_v6  ;;  %624 = vmatprep.mubr.f32.mxu1 %v328_v61  ;;  %v5804_v61 = vld [vmem:[#allocation19_spill] sm:$0xff] }
  0x56   : > { %623 = vmatpush2.msra.mxu1 %v3932_v1  ;;  %810 = vmatprep.subr.mxu0 %v3411_v8 }
  0x57   : > { %625 = vmatmul.mubr.f32.vlgmr.msra.gmra.mxu1 %v333_v6  ;;  %811 = vmatpush1.msra.mxu0 %v3414_v9  ;;  %v5805_v6 = vld [vmem:[#allocation20_spill] sm:$0xff] }
  0x58   : > { %812 = vmatprep.subr.mxu0 %v3417_v10  ;;  %881 = vmatprep.subr.mxu1 %v3428_v13 }
  0x59   : > { %813 = vmatpush1.msra.mxu0 %v3421_v11  ;;  %882 = vmatpush1.msra.mxu1 %v3436_v15 }
  0x5a   : > { %814 = vmatprep.subr.mxu0 %v3425_v12  ;;  %883 = vmatprep.subr.mxu1 %v3439_v16 }
  0x5b   : > { %815 = vmatpush1.msra.mxu0 %v3432_v14  ;;  %884 = vmatpush1.msra.mxu1 %v3447_v18 }
  0x5c   : > { %816 = vmatprep.subr.mxu0 %v3443_v17  ;;  %885 = vmatprep.subr.mxu1 %v3455_v20 }
  0x5d   : > { %817 = vmatpush1.msra.mxu0 %v3451_v19  ;;  %886 = vmatpush1.msra.mxu1 %v3458_v21 }
  0x5e   : > { %818 = vmatprep.subr.mxu0 %v3462_v22  ;;  %887 = vmatprep.subr.mxu1 %v3466_v23 }
  0x5f   : > { %819 = vmatpush1.msra.mxu0 %v3470_v24  ;;  %888 = vmatpush1.msra.mxu1 %v3474_v25 }
  0x60   : > { %820 = vmatprep.subr.mxu0 %v3478_v26  ;;  %889 = vmatprep.subr.mxu1 %v3482_v27 }
  0x61   : > { %821 = vmatpush1.msra.mxu0 %v3486_v28  ;;  %890 = vmatpush1.msra.mxu1 %v3490_v29 }
  0x62   : > { %822 = vmatprep.subr.mxu0 %v3494_v30  ;;  %891 = vmatprep.subr.mxu1 %v3498_v31 }
  0x63   : > { %823 = vmatpush1.msra.mxu0 %v3502_v32  ;;  %892 = vmatpush1.msra.mxu1 %v3506_v33 }
  0x64   : > { %824 = vmatprep.subr.mxu0 %v3510_v34  ;;  %893 = vmatprep.subr.mxu1 %v3514_v35 }
  0x65   : > { %825 = vmatpush1.msra.mxu0 %v3518_v36  ;;  %894 = vmatpush1.msra.mxu1 %v3522_v37 }
  0x66   : > { %826 = vmatprep.subr.mxu0 %v3526_v38  ;;  %895 = vmatprep.subr.mxu1 %v3530_v39 }
  0x67   : > { %827 = vmatpush1.msra.mxu0 %v3534_v40  ;;  %896 = vmatpush1.msra.mxu1 %v3538_v41 }
  0x68   : > { %828 = vmatprep.subr.mxu0 %v3542_v42  ;;  %897 = vmatprep.subr.mxu1 %v3546_v43 }
  0x69   : > { %829 = vmatpush1.msra.mxu0 %v3550_v44  ;;  %898 = vmatpush1.msra.mxu1 %v3554_v45 }
  0x6a   : > { %830 = vmatprep.subr.mxu0 %v3558_v46  ;;  %899 = vmatprep.subr.mxu1 %v3562_v47 }
  0x6b   : > { %831 = vmatpush1.msra.mxu0 %v3566_v48  ;;  %900 = vmatpush1.msra.mxu1 %v3570_v49 }
  0x6c   : > { %832 = vmatprep.subr.mxu0 %v3574_v50  ;;  %901 = vmatprep.subr.mxu1 %v3578_v51  ;;  %v5807_v50 = vld [vmem:[#allocation22_spill] sm:$0xff] }
  0x6d   : > { %833 = vmatpush1.msra.mxu0 %v3582_v52  ;;  %902 = vmatpush1.msra.mxu1 %v3586_v53  ;;  %v5806_v52 = vld [vmem:[#allocation21_spill] sm:$0xff] }
  0x6e   : > { %834 = vmatprep.subr.mxu0 %v3590_v54  ;;  %903 = vmatprep.subr.mxu1 %v3594_v55  ;;  %v5808_v54 = vld [vmem:[#allocation23_spill] sm:$0xff]  ;;  %v5809_v55 = vld [vmem:[#allocation24_spill] sm:$0xff] }
  0x6f   : > { %835 = vmatpush1.msra.mxu0 %v3598_v56  ;;  %904 = vmatpush1.msra.mxu1 %v3602_v57  ;;  %v5810_v56 = vld [vmem:[#allocation25_spill] sm:$0xff]  ;;  %v5811_v57 = vld [vmem:[#allocation26_spill] sm:$0xff] }
  0x70   : > { %836 = vmatprep.subr.mxu0 %v3606_v58  ;;  %905 = vmatprep.subr.mxu1 %v3610_v59  ;;  %v5812_v58 = vld [vmem:[#allocation27_spill] sm:$0xff]  ;;  %v5813_v59 = vld [vmem:[#allocation28_spill] sm:$0xff] }
  0x71   : > { %837 = vmatpush1.msra.mxu0 %v3614_v60  ;;  %906 = vmatpush1.msra.mxu1 %v5804_v61  ;;  %v5814_v60 = vld [vmem:[#allocation29_spill] sm:$0xff]  ;;  %v5815_v61 = vld [vmem:[#allocation30_spill] sm:$0xff] }
  0x72   : > { %838 = vmatprep.subr.mxu0 %v5805_v6  ;;  %907 = vmatprep.subr.mxu1 %v5806_v52  ;;  %v5816_v6 = vld [vmem:[#allocation31_spill] sm:$0xff]  ;;  %v5817_v52 = vld [vmem:[#allocation32_spill] sm:$0xff] }
  0x73   : > { %839 = vmatpush1.msra.mxu0 %v5807_v50  ;;  %908 = vmatpush1.msra.mxu1 %v5808_v54  ;;  %v5818_v50 = vld [vmem:[#allocation33_spill] sm:$0xff]  ;;  %v5819_v54 = vld [vmem:[#allocation34_spill] sm:$0xff] }
  0x74   : > { %840 = vmatprep.subr.mxu0 %v5809_v55  ;;  %909 = vmatprep.subr.mxu1 %v5810_v56  ;;  %v5820_v55 = vld [vmem:[#allocation35_spill] sm:$0xff]  ;;  %v5821_v56 = vld [vmem:[#allocation36_spill] sm:$0xff] }
  0x75   : > { %841 = vmatpush1.msra.mxu0 %v5811_v57  ;;  %910 = vmatpush1.msra.mxu1 %v5812_v58  ;;  %v5822_v57 = vld [vmem:[#allocation37_spill] sm:$0xff]  ;;  %v5823_v58 = vld [vmem:[#allocation38_spill] sm:$0xff] }
  0x76   : > { %842 = vmatprep.subr.mxu0 %v5813_v59  ;;  %911 = vmatprep.subr.mxu1 %v5814_v60  ;;  %v5824_v59 = vld [vmem:[#allocation39_spill] sm:$0xff]  ;;  %v5825_v60 = vld [vmem:[#allocation40_spill] sm:$0xff] }
  0x77   : > { %843 = vmatpush2.msra.mxu0 %v5815_v61  ;;  %912 = vmatpush1.msra.mxu1 %v5816_v6  ;;  %v5826_v61 = vld [vmem:[#allocation41_spill] sm:$0xff]  ;;  %v5827_v6 = vld [vmem:[#allocation42_spill] sm:$0xff] }
  0x78   : > { %844 = vmatprep.subr.mxu0 %v5817_v52  ;;  %913 = vmatprep.subr.mxu1 %v5818_v50  ;;  %v5828_v52 = vld [vmem:[#allocation43_spill] sm:$0xff]  ;;  %v5829_v50 = vld [vmem:[#allocation44_spill] sm:$0xff] }
  0x79   : > { %845 = vmatpush2.msra.mxu0 %v5819_v54  ;;  %914 = vmatpush2.msra.mxu1 %v5820_v55  ;;  %v5830_v54 = vld [vmem:[#allocation45_spill] sm:$0xff]  ;;  %v5831_v55 = vld [vmem:[#allocation46_spill] sm:$0xff] }
  0x7a   : > { %846 = vmatprep.subr.mxu0 %v5821_v56  ;;  %915 = vmatprep.subr.mxu1 %v5822_v57  ;;  %v5832_v56 = vld [vmem:[#allocation47_spill] sm:$0xff]  ;;  %v5833_v57 = vld [vmem:[#allocation48_spill] sm:$0xff] }
  0x7b   : > { %847 = vmatpush2.msra.mxu0 %v5823_v58  ;;  %916 = vmatpush2.msra.mxu1 %v5824_v59  ;;  %v5834_v58 = vld [vmem:[#allocation49_spill] sm:$0xff]  ;;  %v5835_v59 = vld [vmem:[#allocation50_spill] sm:$0xff] }
  0x7c   : > { %848 = vmatprep.subr.mxu0 %v5825_v60  ;;  %917 = vmatprep.subr.mxu1 %v5826_v61  ;;  %v5836_v60 = vld [vmem:[#allocation51_spill] sm:$0xff]  ;;  %v5837_v61 = vld [vmem:[#allocation52_spill] sm:$0xff] }
  0x7d   : > { %849 = vmatpush2.msra.mxu0 %v5827_v6  ;;  %918 = vmatpush2.msra.mxu1 %v5828_v52  ;;  %v5838_v6 = vld [vmem:[#allocation53_spill] sm:$0xff]  ;;  %v5839_v52 = vld [vmem:[#allocation54_spill] sm:$0xff] }
  0x7e   : > { %850 = vmatprep.subr.mxu0 %v5829_v50  ;;  %919 = vmatprep.subr.mxu1 %v5830_v54  ;;  %v5840_v50 = vld [vmem:[#allocation55_spill] sm:$0xff]  ;;  %v5841_v54 = vld [vmem:[#allocation56_spill] sm:$0xff] }
  0x7f   : > { %851 = vmatpush2.msra.mxu0 %v5831_v55  ;;  %920 = vmatpush2.msra.mxu1 %v5832_v56  ;;  %v5842_v55 = vld [vmem:[#allocation57_spill] sm:$0xff]  ;;  %v5843_v56 = vld [vmem:[#allocation58_spill] sm:$0xff] }
  0x80   : > { %852 = vmatprep.subr.mxu0 %v5833_v57  ;;  %921 = vmatprep.subr.mxu1 %v5834_v58  ;;  %v5844_v57 = vld [vmem:[#allocation59_spill] sm:$0xff]  ;;  %v5845_v58 = vld [vmem:[#allocation60_spill] sm:$0xff] }
  0x81   : > { %853 = vmatpush2.msra.mxu0 %v5835_v59  ;;  %922 = vmatpush2.msra.mxu1 %v5836_v60  ;;  %v5846_v59 = vld [vmem:[#allocation61_spill] sm:$0xff]  ;;  %v5847_v60 = vld [vmem:[#allocation62_spill] sm:$0xff] }
  0x82   : > { %854 = vmatprep.subr.mxu0 %v5837_v61  ;;  %923 = vmatprep.subr.mxu1 %v5838_v6  ;;  %v5848_v61 = vld [vmem:[#allocation63_spill] sm:$0xff]  ;;  %v5849_v6 = vld [vmem:[#allocation64_spill] sm:$0xff] }
  0x83   : > { %855 = vmatpush2.msra.mxu0 %v5839_v52  ;;  %924 = vmatpush2.msra.mxu1 %v5840_v50  ;;  %v5850_v52 = vld [vmem:[#allocation65_spill] sm:$0xff]  ;;  %v5851_v50 = vld [vmem:[#allocation66_spill] sm:$0xff] }
  0x84   : > { %856 = vmatprep.subr.mxu0 %v5841_v54  ;;  %925 = vmatprep.subr.mxu1 %v5842_v55  ;;  %v5852_v54 = vld [vmem:[#allocation67_spill] sm:$0xff]  ;;  %v5853_v55 = vld [vmem:[#allocation68_spill] sm:$0xff] }
  0x85   : > { %857 = vmatpush2.msra.mxu0 %v5843_v56  ;;  %926 = vmatpush2.msra.mxu1 %v5844_v57  ;;  %v5854_v56 = vld [vmem:[#allocation69_spill] sm:$0xff]  ;;  %v5855_v57 = vld [vmem:[#allocation70_spill] sm:$0xff] }
  0x86   : > { %858 = vmatprep.subr.mxu0 %v5845_v58  ;;  %927 = vmatprep.subr.mxu1 %v5846_v59  ;;  %v5856_v58 = vld [vmem:[#allocation71_spill] sm:$0xff]  ;;  %v5857_v59 = vld [vmem:[#allocation72_spill] sm:$0xff] }
  0x87   : > { %859 = vmatpush2.msra.mxu0 %v5847_v60  ;;  %928 = vmatpush2.msra.mxu1 %v5848_v61  ;;  %v5858_v60 = vld [vmem:[#allocation73_spill] sm:$0xff]  ;;  %v5859_v61 = vld [vmem:[#allocation74_spill] sm:$0xff] }
  0x88   : > { %860 = vmatprep.subr.mxu0 %v5849_v6  ;;  %929 = vmatprep.subr.mxu1 %v5850_v52  ;;  %v5860_v6 = vld [vmem:[#allocation75_spill] sm:$0xff]  ;;  %v5861_v52 = vld [vmem:[#allocation76_spill] sm:$0xff] }
  0x89   : > { %861 = vmatpush2.msra.mxu0 %v5851_v50  ;;  %930 = vmatpush2.msra.mxu1 %v5852_v54  ;;  %v5862_v50 = vld [vmem:[#allocation77_spill] sm:$0xff]  ;;  %v5863_v54 = vld [vmem:[#allocation78_spill] sm:$0xff] }
  0x8a   : > { %862 = vmatprep.subr.mxu0 %v5853_v55  ;;  %931 = vmatprep.subr.mxu1 %v5854_v56  ;;  %v5864_v55 = vld [vmem:[#allocation79_spill] sm:$0xff]  ;;  %v5865_v56 = vld [vmem:[#allocation80_spill] sm:$0xff] }
  0x8b   : > { %863 = vmatpush2.msra.mxu0 %v5855_v57  ;;  %932 = vmatpush2.msra.mxu1 %v5856_v58  ;;  %v5866_v57 = vld [vmem:[#allocation81_spill] sm:$0xff]  ;;  %v5867_v58 = vld [vmem:[#allocation82_spill] sm:$0xff] }
  0x8c   : > { %864 = vmatprep.subr.mxu0 %v5857_v59  ;;  %933 = vmatprep.subr.mxu1 %v5858_v60  ;;  %v5868_v59 = vld [vmem:[#allocation84_spill] sm:$0xff]  ;;  %v5869_v60 = vld [vmem:[#allocation83_spill] sm:$0xff] }
  0x8d   : > { %865 = vmatpush2.msra.mxu0 %v5859_v61  ;;  %934 = vmatpush2.msra.mxu1 %v5860_v6 }
  0x8e   : > { %866 = vmatprep.subr.mxu0 %v5861_v52  ;;  %935 = vmatprep.subr.mxu1 %v5862_v50 }
  0x8f   : > { %867 = vmatpush2.msra.mxu0 %v5863_v54  ;;  %936 = vmatpush2.msra.mxu1 %v5864_v55 }
  0x90   : > { %868 = vmatprep.subr.mxu0 %v5865_v56  ;;  %937 = vmatprep.subr.mxu1 %v5866_v57 }
  0x91   : > { %869 = vmatpush2.msra.mxu0 %v5867_v58  ;;  %938 = vmatpush2.msra.mxu1 %v5868_v59 }
  0x92   : > { %870 = vmatprep.subr.mxu0 %v5869_v60  ;;  %939 = vmatprep.subr.mxu1 %v3899_v4  ;;  %v5870_v60 = vlaneseq }
  0x93   : > { %871 = vmatpush2.msra.mxu0 %v3895_v62  ;;  %940 = vmatpush2.msra.mxu1 %v3906_v7  ;;  %v467_v7 = vld [vmem:[#allocation6] sm:$0xf] }
  0x94   : > { %872 = vmatprep.subr.mxu0 %v3903_v5  ;;  %941 = vmatprep.subr.mxu1 %v3914_v0  ;;  %v470_v62 = vshrl.u32 %v5870_v60, 7 }
  0x95   : > { %873 = vmatpush2.msra.mxu0 %v3910_v63  ;;  %942 = vmatpush2.msra.mxu1 %v3922_v2 }
  0x96   : > { %943 = vmatprep.subr.mxu1 %v3927_v3  ;;  %1131 = vmatprep.subr.mxu0 %v3411_v8  ;;  %v4068_v58 = vsub.s32 0, %v470_v62  ;;  %v4070_v5 = vsub.s32 1, %v470_v62  ;;  %v4073_v63 = vsub.s32 2, %v470_v62  ;;  %v4077_v57 = vsub.s32 3, %v470_v62  ;;  %v331_v62 = vld [vmem:[%s330_s29] sm:$0xff] }
  0x97   : > { %944 = vmatpush2.msra.mxu1 %v3932_v1 }
  0x98   : > { %1202 = vmatprep.subr.mxu1 %v3428_v13  ;;  %5871 = vst [vmem:[#allocation74_spill] sm:$0xff] %v4068_v58  ;;  %5872 = vst [vmem:[#allocation75_spill] sm:$0xff] %v4070_v5  ;;  %v472_v0 = vrot.slane %v467_v7, %v4068_v58  ;;  %v476_v2 = vrot.slane %v467_v7, %v4070_v5  ;;  %v480_v8 = vrot.slane %v467_v7, %v4073_v63 }
  0x99   : > { %5873 = vst [vmem:[#allocation77_spill] sm:$0xff] %v4073_v63  ;;  %v484_v58 = vrot.slane %v467_v7, %v4077_v57 }
 0x115   : > { %v555_v3 = vpop.f32.mrf.mxu0 }
 0x116   : > { %v556_v4 = vadd.f32 %v555_v3, %v472_v0 }
 0x117   : > { %v557_v1 = vpop.f32.mrf.mxu0  ;;  %v626_v60 = vpop.f32.mrf.mxu1 }
 0x118   : > { %v631_v13 = vmul.f32 0.5, %v556_v4  ;;  %v558_v56 = vadd.f32 %v557_v1, %v476_v2  ;;  %v627_v54 = vadd.f32 %v626_v60, %v480_v8 }
 0x119   : > { %v628_v52 = vpop.f32.mrf.mxu1 }
 0x11a   : > { %2966 = vtanh.f32 %v631_v13  ;;  %v635_v59 = vmul.f32 0.5, %v558_v56  ;;  %v629_v5 = vadd.f32 %v628_v52, %v484_v58 }
 0x11c   : > { %2968 = vtanh.f32 %v635_v59  ;;  %v640_v55 = vmul.f32 0.5, %v629_v5 }
 0x11d   : > { %2970 = vtanh.f32 %v627_v54 }
 0x11e   : > { %2972 = vtanh.f32 %v640_v55  ;;  %v5916_v55 = vld [vmem:[#allocation50_spill] sm:$0xff] }
 0x127   : > { %v2967_v0 = vpop.eup %2966 }
 0x128   : > { %v633_v3 = vmul.f32 0.5, %v2967_v0  ;;  %v2940_v0 = vld [vmem:[%s5347_s5 + $0x8] sm:$0xff] }
 0x129   : > { %v2969_v1 = vpop.eup %2968 }
 0x12a   : > { %v634_v2 = vadd.f32 0.5, %v633_v3  ;;  %v637_v4 = vmul.f32 0.5, %v2969_v1  ;;  %v2971_v56 = vpop.eup %2970  ;;  %v5917_v3 = vld [vmem:[#allocation55_spill] sm:$0xff]  ;;  %v5918_v1 = vld [vmem:[#allocation52_spill] sm:$0xff] }
 0x12b   : > { %v2973_v52 = vpop.eup %2972 }
 0x12c   : > { %v638_v8 = vadd.f32 0.5, %v637_v4  ;;  %v646_v54 = vmul.f32 %v2971_v56, %v634_v2  ;;  %v642_v58 = vmul.f32 0.5, %v2973_v52  ;;  %v5919_v2 = vld [vmem:[#allocation57_spill] sm:$0xff]  ;;  %v5920_v4 = vld [vmem:[#allocation54_spill] sm:$0xff]  ;;  %v5921_v56 = vld [vmem:[#allocation59_spill] sm:$0xff] }
 0x12d   : > { %v5926_v52 = vld [vmem:[#allocation60_spill] sm:$0xff] }
 0x12e   : > { %v645_v59 = vmul.f32 %v638_v8, %v331_v62  ;;  %v643_v5 = vadd.f32 0.5, %v642_v58  ;;  %v5922_v62 = vld [vmem:[#allocation56_spill] sm:$0xff]  ;;  %v5923_v8 = vld [vmem:[#allocation61_spill] sm:$0xff] }
 0x12f   : > { %v5927_v58 = vld [vmem:[#allocation65_spill] sm:$0xff] }
 0x130   : > { %v4084_v13 = vadd.f32 %v646_v54, %v645_v59  ;;  %v5924_v59 = vld [vmem:[#allocation58_spill] sm:$0xff]  ;;  %v5925_v54 = vld [vmem:[#allocation63_spill] sm:$0xff] }
 0x132   : > { %2974 = vtanh.f32 %v4084_v13 }
 0x13f   : > { %v2975_v7 = vpop.eup %2974 }
 0x140   : > { %v649_v60 = vmul.f32 %v2975_v7, %v643_v5  ;;  %v5928_v5 = vld [vmem:[#allocation62_spill] sm:$0xff]  ;;  %v5929_v7 = vld [vmem:[#allocation67_spill] sm:$0xff] }
 0x142   : > { %652 = vst [vmem:[%s5347_s5] sm:$0xff] %v649_v60  ;;  %874 = vmatprep.mubr.f32.mxu0 %v649_v60  ;;  %945 = vmatprep.mubr.f32.mxu1 %v649_v60  ;;  %v5930_v60 = vld [vmem:[#allocation64_spill] sm:$0xff] }
 0x143   : > { %875 = vmatmul.mubr.f32.vlgmr.msra.gmra.mxu0 %v2940_v0  ;;  %946 = vmatmul.mubr.f32.vlgmr.msra.gmra.mxu1 %v2940_v0  ;;  %v5931_v0 = vld [vmem:[#allocation69_spill] sm:$0xff] }
 0x144   : > { %1132 = vmatpush1.msra.mxu0 %v3414_v9  ;;  %1203 = vmatpush1.msra.mxu1 %v3436_v15  ;;  %v5874_v9 = vld [vmem:[#allocation10_spill] sm:$0xff]  ;;  %v5879_v15 = vld [vmem:[#allocation17_spill] sm:$0xff] }
 0x145   : > { %1133 = vmatprep.subr.mxu0 %v3417_v10  ;;  %1204 = vmatprep.subr.mxu1 %v3439_v16  ;;  %v5875_v10 = vld [vmem:[#allocation13_spill] sm:$0xff]  ;;  %v5880_v16 = vld [vmem:[#allocation14_spill] sm:$0xff] }
 0x146   : > { %1134 = vmatpush1.msra.mxu0 %v3421_v11  ;;  %1205 = vmatpush1.msra.mxu1 %v3447_v18  ;;  %v5876_v11 = vld [vmem:[#allocation11_spill] sm:$0xff]  ;;  %v5882_v18 = vld [vmem:[#allocation16_spill] sm:$0xff] }
 0x147   : > { %1135 = vmatprep.subr.mxu0 %v3425_v12  ;;  %1206 = vmatprep.subr.mxu1 %v3455_v20  ;;  %v5877_v12 = vld [vmem:[#allocation15_spill] sm:$0xff]  ;;  %v5884_v20 = vld [vmem:[#allocation18_spill] sm:$0xff] }
 0x148   : > { %1136 = vmatpush1.msra.mxu0 %v3432_v14  ;;  %1207 = vmatpush1.msra.mxu1 %v3458_v21  ;;  %v5878_v14 = vld [vmem:[#allocation12_spill] sm:$0xff]  ;;  %v5885_v21 = vld [vmem:[#allocation23_spill] sm:$0xff] }
 0x149   : > { %1137 = vmatprep.subr.mxu0 %v3443_v17  ;;  %1208 = vmatprep.subr.mxu1 %v3466_v23  ;;  %v5881_v17 = vld [vmem:[#allocation19_spill] sm:$0xff]  ;;  %v5887_v23 = vld [vmem:[#allocation25_spill] sm:$0xff] }
 0x14a   : > { %1138 = vmatpush1.msra.mxu0 %v3451_v19  ;;  %1209 = vmatpush1.msra.mxu1 %v3474_v25  ;;  %v5883_v19 = vld [vmem:[#allocation21_spill] sm:$0xff]  ;;  %v5889_v25 = vld [vmem:[#allocation27_spill] sm:$0xff] }
 0x14b   : > { %1139 = vmatprep.subr.mxu0 %v3462_v22  ;;  %1210 = vmatprep.subr.mxu1 %v3482_v27  ;;  %v5886_v22 = vld [vmem:[#allocation20_spill] sm:$0xff]  ;;  %v5891_v27 = vld [vmem:[#allocation29_spill] sm:$0xff] }
 0x14c   : > { %1140 = vmatpush1.msra.mxu0 %v3470_v24  ;;  %1211 = vmatpush1.msra.mxu1 %v3490_v29  ;;  %v5888_v24 = vld [vmem:[#allocation22_spill] sm:$0xff]  ;;  %v5893_v29 = vld [vmem:[#allocation31_spill] sm:$0xff] }
 0x14d   : > { %1141 = vmatprep.subr.mxu0 %v3478_v26  ;;  %1212 = vmatprep.subr.mxu1 %v3498_v31  ;;  %v5890_v26 = vld [vmem:[#allocation24_spill] sm:$0xff]  ;;  %v5895_v31 = vld [vmem:[#allocation33_spill] sm:$0xff] }
 0x14e   : > { %1142 = vmatpush1.msra.mxu0 %v3486_v28  ;;  %1213 = vmatpush1.msra.mxu1 %v3506_v33  ;;  %v5892_v28 = vld [vmem:[#allocation26_spill] sm:$0xff]  ;;  %v5897_v33 = vld [vmem:[#allocation35_spill] sm:$0xff] }
 0x14f   : > { %1143 = vmatprep.subr.mxu0 %v3494_v30  ;;  %1214 = vmatprep.subr.mxu1 %v3514_v35  ;;  %v5894_v30 = vld [vmem:[#allocation28_spill] sm:$0xff]  ;;  %v5899_v35 = vld [vmem:[#allocation37_spill] sm:$0xff] }
 0x150   : > { %1144 = vmatpush1.msra.mxu0 %v3502_v32  ;;  %1215 = vmatpush1.msra.mxu1 %v3522_v37  ;;  %v5896_v32 = vld [vmem:[#allocation30_spill] sm:$0xff]  ;;  %v5901_v37 = vld [vmem:[#allocation39_spill] sm:$0xff] }
 0x151   : > { %1145 = vmatprep.subr.mxu0 %v3510_v34  ;;  %1216 = vmatprep.subr.mxu1 %v3530_v39  ;;  %v5898_v34 = vld [vmem:[#allocation32_spill] sm:$0xff]  ;;  %v5903_v39 = vld [vmem:[#allocation41_spill] sm:$0xff] }
 0x152   : > { %1146 = vmatpush1.msra.mxu0 %v3518_v36  ;;  %1217 = vmatpush1.msra.mxu1 %v3538_v41  ;;  %v5900_v36 = vld [vmem:[#allocation34_spill] sm:$0xff]  ;;  %v5905_v41 = vld [vmem:[#allocation43_spill] sm:$0xff] }
 0x153   : > { %1147 = vmatprep.subr.mxu0 %v3526_v38  ;;  %1218 = vmatprep.subr.mxu1 %v3546_v43  ;;  %v5902_v38 = vld [vmem:[#allocation36_spill] sm:$0xff]  ;;  %v5907_v43 = vld [vmem:[#allocation45_spill] sm:$0xff] }
 0x154   : > { %1148 = vmatpush1.msra.mxu0 %v3534_v40  ;;  %1219 = vmatpush1.msra.mxu1 %v3554_v45  ;;  %v5904_v40 = vld [vmem:[#allocation38_spill] sm:$0xff]  ;;  %v5909_v45 = vld [vmem:[#allocation47_spill] sm:$0xff] }
 0x155   : > { %1149 = vmatprep.subr.mxu0 %v3542_v42  ;;  %1220 = vmatprep.subr.mxu1 %v3562_v47  ;;  %v5906_v42 = vld [vmem:[#allocation40_spill] sm:$0xff]  ;;  %v5911_v47 = vld [vmem:[#allocation49_spill] sm:$0xff] }
 0x156   : > { %1150 = vmatpush1.msra.mxu0 %v3550_v44  ;;  %1221 = vmatpush1.msra.mxu1 %v3570_v49  ;;  %v5908_v44 = vld [vmem:[#allocation42_spill] sm:$0xff]  ;;  %v5913_v49 = vld [vmem:[#allocation51_spill] sm:$0xff] }
 0x157   : > { %1151 = vmatprep.subr.mxu0 %v3558_v46  ;;  %1222 = vmatprep.subr.mxu1 %v3578_v51  ;;  %v5910_v46 = vld [vmem:[#allocation44_spill] sm:$0xff] }
 0x158   : > { %1152 = vmatpush1.msra.mxu0 %v3566_v48  ;;  %1223 = vmatpush1.msra.mxu1 %v3586_v53  ;;  %v5912_v48 = vld [vmem:[#allocation46_spill] sm:$0xff]  ;;  %v5914_v51 = vld [vmem:[#allocation48_spill] sm:$0xff]  ;;  %v5915_v53 = vld [vmem:[#allocation53_spill] sm:$0xff] }
 0x159   : > { %1153 = vmatprep.subr.mxu0 %v5874_v9  ;;  %1224 = vmatprep.subr.mxu1 %v5875_v10  ;;  %v5932_v9 = vld [vmem:[#allocation66_spill] sm:$0xff]  ;;  %v5933_v10 = vld [vmem:[#allocation71_spill] sm:$0xff] }
 0x15a   : > { %1154 = vmatpush1.msra.mxu0 %v5876_v11  ;;  %1225 = vmatpush1.msra.mxu1 %v5877_v12  ;;  %v5934_v11 = vld [vmem:[#allocation68_spill] sm:$0xff]  ;;  %v5935_v12 = vld [vmem:[#allocation73_spill] sm:$0xff] }
 0x15b   : > { %1155 = vmatprep.subr.mxu0 %v5878_v14  ;;  %1226 = vmatprep.subr.mxu1 %v5879_v15  ;;  %v5936_v14 = vld [vmem:[#allocation70_spill] sm:$0xff]  ;;  %v5937_v15 = vld [vmem:[#allocation72_spill] sm:$0xff] }
 0x15c   : > { %1156 = vmatpush1.msra.mxu0 %v5880_v16  ;;  %1227 = vmatpush1.msra.mxu1 %v5881_v17  ;;  %v5938_v16 = vld [vmem:[#allocation79_spill] sm:$0xff]  ;;  %v5939_v17 = vld [vmem:[#allocation76_spill] sm:$0xff] }
 0x15d   : > { %1157 = vmatprep.subr.mxu0 %v5882_v18  ;;  %1228 = vmatprep.subr.mxu1 %v5883_v19  ;;  %v5940_v18 = vld [vmem:[#allocation81_spill] sm:$0xff]  ;;  %v5941_v19 = vld [vmem:[#allocation78_spill] sm:$0xff] }
 0x15e   : > { %1158 = vmatpush1.msra.mxu0 %v5884_v20  ;;  %1229 = vmatpush1.msra.mxu1 %v5885_v21  ;;  %v5942_v20 = vld [vmem:[#allocation84_spill] sm:$0xff] }
 0x15f   : > { %1159 = vmatprep.subr.mxu0 %v5886_v22  ;;  %1230 = vmatprep.subr.mxu1 %v5887_v23  ;;  %v5943_v21 = vld [vmem:[#allocation80_spill] sm:$0xff]  ;;  %v5944_v22 = vld [vmem:[#allocation86_spill] sm:$0xff] }
 0x160   : > { %1160 = vmatpush1.msra.mxu0 %v5888_v24  ;;  %1231 = vmatpush1.msra.mxu1 %v5889_v25  ;;  %v5945_v23 = vld [vmem:[#allocation82_spill] sm:$0xff]  ;;  %v5946_v24 = vld [vmem:[#allocation88_spill] sm:$0xff]  ;;  %v5947_v25 = vld [vmem:[#allocation83_spill] sm:$0xff] }
 0x161   : > { %1161 = vmatprep.subr.mxu0 %v5890_v26  ;;  %1232 = vmatprep.subr.mxu1 %v5891_v27  ;;  %v5948_v26 = vld [vmem:[#allocation90_spill] sm:$0xff]  ;;  %v5949_v27 = vld [vmem:[#allocation85_spill] sm:$0xff] }
 0x162   : > { %1162 = vmatpush1.msra.mxu0 %v5892_v28  ;;  %1233 = vmatpush1.msra.mxu1 %v5893_v29  ;;  %v5950_v28 = vld [vmem:[#allocation91_spill] sm:$0xff] }
 0x163   : > { %1163 = vmatprep.subr.mxu0 %v5894_v30  ;;  %1234 = vmatprep.subr.mxu1 %v5895_v31  ;;  %v5951_v29 = vld [vmem:[#allocation87_spill] sm:$0xff]  ;;  %v5952_v30 = vld [vmem:[#allocation92_spill] sm:$0xff]  ;;  %v5953_v31 = vld [vmem:[#allocation89_spill] sm:$0xff] }
 0x164   : > { %1164 = vmatpush2.msra.mxu0 %v5896_v32  ;;  %1235 = vmatpush2.msra.mxu1 %v5897_v33  ;;  %v5954_v32 = vld [vmem:[#allocation93_spill] sm:$0xff]  ;;  %v4220_v33 = vld [vmem:[%s3408_s17 + $0x1e8] sm:$0xff] }
 0x165   : > { %1165 = vmatprep.subr.mxu0 %v5898_v34  ;;  %1236 = vmatprep.subr.mxu1 %v5899_v35  ;;  %5955 = vst [vmem:[#allocation10_spill] sm:$0xff] %v4220_v33  ;;  %v4224_v34 = vld [vmem:[%s3408_s17 + $0x1f8] sm:$0xff]  ;;  %v788_v35 = vld [vmem:[#allocation6] sm:$0xf] }
 0x166   : > { %1166 = vmatpush2.msra.mxu0 %v5900_v36  ;;  %1237 = vmatpush2.msra.mxu1 %v5901_v37  ;;  %5956 = vst [vmem:[#allocation13_spill] sm:$0xff] %v4224_v34  ;;  %v5957_v36 = vld [vmem:[#allocation74_spill] sm:$0xff] }
 0x167   : > { %1167 = vmatprep.subr.mxu0 %v5902_v38  ;;  %1238 = vmatprep.subr.mxu1 %v5903_v39  ;;  %v793_v37 = vrot.slane %v788_v35, %v5957_v36  ;;  %v5958_v38 = vld [vmem:[#allocation75_spill] sm:$0xff] }
 0x168   : > { %1168 = vmatpush2.msra.mxu0 %v5904_v40  ;;  %1239 = vmatpush2.msra.mxu1 %v5905_v41  ;;  %v797_v39 = vrot.slane %v788_v35, %v5958_v38 }
 0x169   : > { %1169 = vmatprep.subr.mxu0 %v5906_v42  ;;  %1240 = vmatprep.subr.mxu1 %v5907_v43  ;;  %v801_v42 = vrot.slane %v788_v35, %v4073_v63 }
 0x16a   : > { %1170 = vmatpush2.msra.mxu0 %v5908_v44  ;;  %1241 = vmatpush2.msra.mxu1 %v5909_v45 }
 0x16b   : > { %1171 = vmatprep.subr.mxu0 %v5910_v46  ;;  %1242 = vmatprep.subr.mxu1 %v5911_v47 }
 0x16c   : > { %1172 = vmatpush2.msra.mxu0 %v5912_v48  ;;  %1243 = vmatpush2.msra.mxu1 %v5913_v49  ;;  %v805_v49 = vrot.slane %v788_v35, %v4077_v57  ;;  %v4250_v35 = vld [vmem:[%s3408_s17 + $0x1c8] sm:$0xff] }
 0x16d   : > { %1173 = vmatprep.subr.mxu0 %v5914_v51  ;;  %1244 = vmatprep.subr.mxu1 %v5915_v53 }
 0x16e   : > { %1174 = vmatpush2.msra.mxu0 %v5916_v55  ;;  %1245 = vmatpush2.msra.mxu1 %v5917_v3 }
 0x16f   : > { %1175 = vmatprep.subr.mxu0 %v5918_v1  ;;  %1246 = vmatprep.subr.mxu1 %v5919_v2 }
 0x170   : > { %1176 = vmatpush2.msra.mxu0 %v5920_v4  ;;  %1247 = vmatpush2.msra.mxu1 %v5921_v56 }
 0x171   : > { %1177 = vmatprep.subr.mxu0 %v5922_v62  ;;  %1248 = vmatprep.subr.mxu1 %v5923_v8 }
 0x172   : > { %1178 = vmatpush2.msra.mxu0 %v5924_v59  ;;  %1249 = vmatpush2.msra.mxu1 %v5925_v54 }
 0x173   : > { %1179 = vmatprep.subr.mxu0 %v5926_v52  ;;  %1250 = vmatprep.subr.mxu1 %v5927_v58 }
 0x174   : > { %1180 = vmatpush2.msra.mxu0 %v5928_v5  ;;  %1251 = vmatpush2.msra.mxu1 %v5929_v7 }
 0x175   : > { %1181 = vmatprep.subr.mxu0 %v5930_v60  ;;  %1252 = vmatprep.subr.mxu1 %v5931_v0 }
 0x176   : > { %1182 = vmatpush2.msra.mxu0 %v5932_v9  ;;  %1253 = vmatpush2.msra.mxu1 %v5933_v10 }
 0x177   : > { %1183 = vmatprep.subr.mxu0 %v5934_v11  ;;  %1254 = vmatprep.subr.mxu1 %v5935_v12  ;;  %v2942_v11 = vld [vmem:[%s5347_s5 + $0x10] sm:$0xff] }
 0x178   : > { %1184 = vmatpush2.msra.mxu0 %v5936_v14  ;;  %1255 = vmatpush2.msra.mxu1 %v5860_v6  ;;  %v4246_v14 = vld [vmem:[%s3408_s17 + $0x1f0] sm:$0xff] }
 0x179   : > { %1185 = vmatprep.subr.mxu0 %v5937_v15  ;;  %1256 = vmatprep.subr.mxu1 %v5862_v50 }
 0x17a   : > { %1186 = vmatpush2.msra.mxu0 %v5859_v61  ;;  %1257 = vmatpush2.msra.mxu1 %v5938_v16 }
 0x17b   : > { %1187 = vmatprep.subr.mxu0 %v5939_v17  ;;  %1258 = vmatprep.subr.mxu1 %v5940_v18 }
 0x17c   : > { %1188 = vmatpush2.msra.mxu0 %v5941_v19  ;;  %1259 = vmatpush2.msra.mxu1 %v5942_v20 }
 0x17d   : > { %1189 = vmatprep.subr.mxu0 %v5943_v21  ;;  %1260 = vmatprep.subr.mxu1 %v5944_v22 }
 0x17e   : > { %1190 = vmatpush2.msra.mxu0 %v5945_v23  ;;  %1261 = vmatpush2.msra.mxu1 %v5946_v24 }
 0x17f   : > { %1191 = vmatprep.subr.mxu0 %v5947_v25  ;;  %1262 = vmatprep.subr.mxu1 %v5948_v26 }
 0x180   : > { %1192 = vmatpush2.msra.mxu0 %v5949_v27  ;;  %1263 = vmatpush2.msra.mxu1 %v5950_v28 }
 0x181   : > { %1193 = vmatprep.subr.mxu0 %v5951_v29  ;;  %1264 = vmatprep.subr.mxu1 %v5952_v30 }
 0x182   : > { %1194 = vmatpush2.msra.mxu0 %v5953_v31  ;;  %1265 = vmatpush2.msra.mxu1 %v5954_v32 }
 0x183   : > { %1452 = vmatprep.subr.mxu0 %v4220_v33  ;;  %1523 = vmatprep.subr.mxu1 %v4224_v34 }
 0x203   : > { %v876_v40 = vpop.f32.mrf.mxu0  ;;  %v947_v44 = vpop.f32.mrf.mxu1 }
 0x204   : > { %v877_v41 = vadd.f32 %v876_v40, %v793_v37  ;;  %v948_v48 = vadd.f32 %v947_v44, %v801_v42  ;;  %v4254_v37 = vld [vmem:[%s3408_s17 + $0x1d8] sm:$0xff]  ;;  %v4262_v40 = vld [vmem:[%s3408_s17 + $0x1d0] sm:$0xff] }
 0x205   : > { %v878_v43 = vpop.f32.mrf.mxu0  ;;  %v949_v51 = vpop.f32.mrf.mxu1  ;;  %v4270_v42 = vld [vmem:[%s3408_s17 + $0x1b8] sm:$0xff]  ;;  %v4278_v44 = vld [vmem:[%s3408_s17 + $0x1b0] sm:$0xff] }
 0x206   : > { %v952_v45 = vmul.f32 0.5, %v877_v41  ;;  %v879_v46 = vadd.f32 %v878_v43, %v797_v39  ;;  %v950_v53 = vadd.f32 %v949_v51, %v805_v49  ;;  %v4258_v39 = vld [vmem:[%s3408_s17 + $0x1c0] sm:$0xff]  ;;  %v4266_v41 = vld [vmem:[%s3408_s17 + $0x1a8] sm:$0xff]  ;;  %v4302_v51 = vld [vmem:[%s3408_s17 + $0x178] sm:$0xff] }
 0x207   : > { %v4274_v43 = vld [vmem:[%s3408_s17 + $0x1a0] sm:$0xff]  ;;  %v4298_v49 = vld [vmem:[%s3408_s17 + $0x168] sm:$0xff] }
 0x208   : > { %2976 = vtanh.f32 %v952_v45  ;;  %v956_v47 = vmul.f32 0.5, %v879_v46  ;;  %v961_v55 = vmul.f32 0.5, %v950_v53  ;;  %v4282_v45 = vld [vmem:[%s3408_s17 + $0x188] sm:$0xff]  ;;  %v4286_v46 = vld [vmem:[%s3408_s17 + $0x198] sm:$0xff]  ;;  %v4306_v53 = vld [vmem:[%s3408_s17 + $0x160] sm:$0xff] }
 0x20a   : > { %2978 = vtanh.f32 %v956_v47  ;;  %v4290_v47 = vld [vmem:[%s3408_s17 + $0x180] sm:$0xff] }
 0x20b   : > { %2980 = vtanh.f32 %v948_v48  ;;  %v4294_v48 = vld [vmem:[%s3408_s17 + $0x190] sm:$0xff] }
 0x20c   : > { %2982 = vtanh.f32 %v961_v55  ;;  %v4310_v55 = vld [vmem:[%s3408_s17 + $0x170] sm:$0xff] }
 0x215   : > { %v2977_v3 = vpop.eup %2976 }
 0x216   : > { %v954_v1 = vmul.f32 0.5, %v2977_v3  ;;  %v4314_v3 = vld [vmem:[%s3408_s17 + $0x148] sm:$0xff] }
 0x217   : > { %v2979_v2 = vpop.eup %2978 }
 0x218   : > { %v955_v4 = vadd.f32 0.5, %v954_v1  ;;  %v958_v56 = vmul.f32 0.5, %v2979_v2  ;;  %v2981_v62 = vpop.eup %2980  ;;  %v4318_v1 = vld [vmem:[%s3408_s17 + $0x158] sm:$0xff]  ;;  %v4322_v2 = vld [vmem:[%s3408_s17 + $0x140] sm:$0xff] }
 0x219   : > { %v2983_v58 = vpop.eup %2982 }
 0x21a   : > { %v959_v8 = vadd.f32 0.5, %v958_v56  ;;  %v967_v54 = vmul.f32 %v2981_v62, %v955_v4  ;;  %v963_v5 = vmul.f32 0.5, %v2983_v58  ;;  %v4326_v4 = vld [vmem:[%s3408_s17 + $0x150] sm:$0xff]  ;;  %v4330_v56 = vld [vmem:[%s3408_s17 + $0x128] sm:$0xff]  ;;  %v4334_v62 = vld [vmem:[%s3408_s17 + $0x138] sm:$0xff] }
 0x21b   : > { %v4350_v58 = vld [vmem:[%s3408_s17 + $0x118] sm:$0xff] }
 0x21c   : > { %v966_v59 = vmul.f32 %v959_v8, %v4084_v13  ;;  %v964_v7 = vadd.f32 0.5, %v963_v5  ;;  %v4242_v13 = vld [vmem:[%s3408_s17 + $0x1e0] sm:$0xff]  ;;  %5959 = vst [vmem:[#allocation11_spill] sm:$0xff] %v4350_v58 }
 0x21d   : > { %v4338_v8 = vld [vmem:[%s3408_s17 + $0x120] sm:$0xff] }
 0x21e   : > { %v4232_v52 = vadd.f32 %v967_v54, %v966_v59  ;;  %v4342_v59 = vld [vmem:[%s3408_s17 + $0x130] sm:$0xff]  ;;  %v4346_v54 = vld [vmem:[%s3408_s17 + $0x108] sm:$0xff]  ;;  %v4354_v5 = vld [vmem:[%s3408_s17 + $0x100] sm:$0xff] }
 0x21f   : > { %5960 = vst [vmem:[#allocation15_spill] sm:$0xff] %v4354_v5 }
 0x220   : > { %2984 = vtanh.f32 %v4232_v52 }
 0x22d   : > { %v2985_v60 = vpop.eup %2984 }
 0x22e   : > { %v970_v9 = vmul.f32 %v2985_v60, %v964_v7  ;;  %v4358_v7 = vld [vmem:[%s3408_s17 + $0x110] sm:$0xff]  ;;  %v4362_v60 = vld [vmem:[%s3408_s17 + $0xe8] sm:$0xff] }
 0x22f   : > { %5961 = vst [vmem:[#allocation12_spill] sm:$0xff] %v4358_v7  ;;  %5962 = vst [vmem:[#allocation17_spill] sm:$0xff] %v4362_v60 }
 0x230   : > { %2941 = vst [vmem:[%s5347_s5 + $0x8] sm:$0xff] %v970_v9  ;;  %1195 = vmatprep.mubr.f32.mxu0 %v970_v9  ;;  %1266 = vmatprep.mubr.f32.mxu1 %v970_v9  ;;  %v4366_v9 = vld [vmem:[%s3408_s17 + $0xf8] sm:$0xff] }
 0x231   : > { %1196 = vmatmul.mubr.f32.vlgmr.msra.gmra.mxu0 %v2942_v11  ;;  %1267 = vmatmul.mubr.f32.vlgmr.msra.gmra.mxu1 %v2942_v11  ;;  %5963 = vst [vmem:[#allocation14_spill] sm:$0xff] %v4366_v9  ;;  %v4370_v11 = vld [vmem:[%s3408_s17 + $0xe0] sm:$0xff] }
 0x232   : > { %1453 = vmatpush1.msra.mxu0 %v4242_v13  ;;  %1524 = vmatpush1.msra.mxu1 %v4246_v14  ;;  %5964 = vst [vmem:[#allocation19_spill] sm:$0xff] %v4370_v11 }
 0x233   : > { %1454 = vmatprep.subr.mxu0 %v4250_v35  ;;  %1525 = vmatprep.subr.mxu1 %v4254_v37 }
 0x234   : > { %1455 = vmatpush1.msra.mxu0 %v4258_v39  ;;  %1526 = vmatpush1.msra.mxu1 %v4262_v40 }
 0x235   : > { %1456 = vmatprep.subr.mxu0 %v4266_v41  ;;  %1527 = vmatprep.subr.mxu1 %v4270_v42 }
 0x236   : > { %1457 = vmatpush1.msra.mxu0 %v4274_v43  ;;  %1528 = vmatpush1.msra.mxu1 %v4278_v44 }
 0x237   : > { %1458 = vmatprep.subr.mxu0 %v4282_v45  ;;  %1529 = vmatprep.subr.mxu1 %v4286_v46 }
 0x238   : > { %1459 = vmatpush1.msra.mxu0 %v4290_v47  ;;  %1530 = vmatpush1.msra.mxu1 %v4294_v48 }
 0x239   : > { %1460 = vmatprep.subr.mxu0 %v4298_v49  ;;  %1531 = vmatprep.subr.mxu1 %v4302_v51 }
 0x23a   : > { %1461 = vmatpush1.msra.mxu0 %v4306_v53  ;;  %1532 = vmatpush1.msra.mxu1 %v4310_v55 }
 0x23b   : > { %1462 = vmatprep.subr.mxu0 %v4314_v3  ;;  %1533 = vmatprep.subr.mxu1 %v4318_v1 }
 0x23c   : > { %1463 = vmatpush1.msra.mxu0 %v4322_v2  ;;  %1534 = vmatpush1.msra.mxu1 %v4326_v4 }
 0x23d   : > { %1464 = vmatprep.subr.mxu0 %v4330_v56  ;;  %1535 = vmatprep.subr.mxu1 %v4334_v62 }
 0x23e   : > { %1465 = vmatpush1.msra.mxu0 %v4338_v8  ;;  %1536 = vmatpush1.msra.mxu1 %v4342_v59 }
 0x23f   : > { %1466 = vmatprep.subr.mxu0 %v4346_v54  ;;  %1537 = vmatprep.subr.mxu1 %v4350_v58  ;;  %v4630_v58 = vld [vmem:[%s3408_s17 + $0x2f0] sm:$0xff] }
 0x240   : > { %1467 = vmatpush1.msra.mxu0 %v4354_v5  ;;  %1538 = vmatpush1.msra.mxu1 %v4358_v7  ;;  %v4374_v5 = vld [vmem:[%s3408_s17 + $0xf0] sm:$0xff]  ;;  %v4378_v7 = vld [vmem:[%s3408_s17 + $0xc8] sm:$0xff]  ;;  %6029 = vst [vmem:[#allocation88_spill] sm:$0xff] %v4630_v58 }
 0x241   : > { %1468 = vmatprep.subr.mxu0 %v4362_v60  ;;  %1539 = vmatprep.subr.mxu1 %v4366_v9  ;;  %5965 = vst [vmem:[#allocation16_spill] sm:$0xff] %v4374_v5  ;;  %5966 = vst [vmem:[#allocation21_spill] sm:$0xff] %v4378_v7  ;;  %v4382_v60 = vld [vmem:[%s3408_s17 + $0xd8] sm:$0xff]  ;;  %v4386_v9 = vld [vmem:[%s3408_s17 + $0xc0] sm:$0xff] }
 0x242   : > { %1469 = vmatpush1.msra.mxu0 %v4370_v11  ;;  %1540 = vmatpush1.msra.mxu1 %v4374_v5  ;;  %5967 = vst [vmem:[#allocation18_spill] sm:$0xff] %v4382_v60  ;;  %5968 = vst [vmem:[#allocation23_spill] sm:$0xff] %v4386_v9  ;;  %v4390_v11 = vld [vmem:[%s3408_s17 + $0xd0] sm:$0xff]  ;;  %v4394_v5 = vld [vmem:[%s3408_s17 + $0xa8] sm:$0xff] }
 0x243   : > { %1470 = vmatprep.subr.mxu0 %v4378_v7  ;;  %1541 = vmatprep.subr.mxu1 %v4382_v60  ;;  %5969 = vst [vmem:[#allocation20_spill] sm:$0xff] %v4390_v11  ;;  %5970 = vst [vmem:[#allocation25_spill] sm:$0xff] %v4394_v5  ;;  %v4398_v7 = vld [vmem:[%s3408_s17 + $0xb8] sm:$0xff]  ;;  %v4402_v60 = vld [vmem:[%s3408_s17 + $0xa0] sm:$0xff] }
 0x244   : > { %1471 = vmatpush1.msra.mxu0 %v4386_v9  ;;  %1542 = vmatpush1.msra.mxu1 %v4390_v11  ;;  %5971 = vst [vmem:[#allocation22_spill] sm:$0xff] %v4398_v7  ;;  %5972 = vst [vmem:[#allocation27_spill] sm:$0xff] %v4402_v60  ;;  %v4406_v9 = vld [vmem:[%s3408_s17 + $0xb0] sm:$0xff]  ;;  %v4410_v11 = vld [vmem:[%s3408_s17 + $0x88] sm:$0xff] }
 0x245   : > { %1472 = vmatprep.subr.mxu0 %v4394_v5  ;;  %1543 = vmatprep.subr.mxu1 %v4398_v7  ;;  %5973 = vst [vmem:[#allocation24_spill] sm:$0xff] %v4406_v9  ;;  %5974 = vst [vmem:[#allocation29_spill] sm:$0xff] %v4410_v11  ;;  %v4414_v5 = vld [vmem:[%s3408_s17 + $0x98] sm:$0xff]  ;;  %v4418_v7 = vld [vmem:[%s3408_s17 + $0x80] sm:$0xff] }
 0x246   : > { %1473 = vmatpush1.msra.mxu0 %v4402_v60  ;;  %1544 = vmatpush1.msra.mxu1 %v4406_v9  ;;  %5975 = vst [vmem:[#allocation26_spill] sm:$0xff] %v4414_v5  ;;  %5976 = vst [vmem:[#allocation31_spill] sm:$0xff] %v4418_v7  ;;  %v4422_v60 = vld [vmem:[%s3408_s17 + $0x90] sm:$0xff]  ;;  %v4426_v9 = vld [vmem:[%s3408_s17 + $0x68] sm:$0xff] }
 0x247   : > { %1474 = vmatprep.subr.mxu0 %v4410_v11  ;;  %1545 = vmatprep.subr.mxu1 %v4414_v5  ;;  %5977 = vst [vmem:[#allocation28_spill] sm:$0xff] %v4422_v60  ;;  %5978 = vst [vmem:[#allocation33_spill] sm:$0xff] %v4426_v9  ;;  %v4430_v11 = vld [vmem:[%s3408_s17 + $0x78] sm:$0xff]  ;;  %v4434_v5 = vld [vmem:[%s3408_s17 + $0x60] sm:$0xff] }
 0x248   : > { %1475 = vmatpush1.msra.mxu0 %v4418_v7  ;;  %1546 = vmatpush1.msra.mxu1 %v4422_v60  ;;  %5979 = vst [vmem:[#allocation30_spill] sm:$0xff] %v4430_v11  ;;  %5980 = vst [vmem:[#allocation35_spill] sm:$0xff] %v4434_v5  ;;  %v4438_v7 = vld [vmem:[%s3408_s17 + $0x70] sm:$0xff]  ;;  %v4442_v60 = vld [vmem:[%s3408_s17 + $0x48] sm:$0xff] }
 0x249   : > { %1476 = vmatprep.subr.mxu0 %v4426_v9  ;;  %1547 = vmatprep.subr.mxu1 %v4430_v11  ;;  %5981 = vst [vmem:[#allocation32_spill] sm:$0xff] %v4438_v7  ;;  %5982 = vst [vmem:[#allocation37_spill] sm:$0xff] %v4442_v60  ;;  %v4446_v9 = vld [vmem:[%s3408_s17 + $0x58] sm:$0xff]  ;;  %v4450_v11 = vld [vmem:[%s3408_s17 + $0x40] sm:$0xff] }
 0x24a   : > { %1477 = vmatpush1.msra.mxu0 %v4434_v5  ;;  %1548 = vmatpush1.msra.mxu1 %v4438_v7  ;;  %5983 = vst [vmem:[#allocation34_spill] sm:$0xff] %v4446_v9  ;;  %5984 = vst [vmem:[#allocation39_spill] sm:$0xff] %v4450_v11  ;;  %v4454_v5 = vld [vmem:[%s3408_s17 + $0x50] sm:$0xff]  ;;  %v4458_v7 = vld [vmem:[%s3408_s17 + $0x28] sm:$0xff] }
 0x24b   : > { %1478 = vmatprep.subr.mxu0 %v4442_v60  ;;  %1549 = vmatprep.subr.mxu1 %v4446_v9  ;;  %5985 = vst [vmem:[#allocation36_spill] sm:$0xff] %v4454_v5  ;;  %5986 = vst [vmem:[#allocation41_spill] sm:$0xff] %v4458_v7  ;;  %v4462_v60 = vld [vmem:[%s3408_s17 + $0x38] sm:$0xff]  ;;  %v4466_v9 = vld [vmem:[%s3408_s17 + $0x20] sm:$0xff] }
 0x24c   : > { %1479 = vmatpush1.msra.mxu0 %v4450_v11  ;;  %1550 = vmatpush1.msra.mxu1 %v4454_v5  ;;  %5987 = vst [vmem:[#allocation38_spill] sm:$0xff] %v4462_v60  ;;  %5988 = vst [vmem:[#allocation43_spill] sm:$0xff] %v4466_v9  ;;  %v4470_v11 = vld [vmem:[%s3408_s17 + $0x30] sm:$0xff]  ;;  %v4474_v5 = vld [vmem:[%s3408_s17 + $0x8] sm:$0xff] }
 0x24d   : > { %1480 = vmatprep.subr.mxu0 %v4458_v7  ;;  %1551 = vmatprep.subr.mxu1 %v4462_v60  ;;  %5989 = vst [vmem:[#allocation40_spill] sm:$0xff] %v4470_v11  ;;  %5990 = vst [vmem:[#allocation45_spill] sm:$0xff] %v4474_v5  ;;  %v4478_v7 = vld [vmem:[%s3408_s17 + $0x18] sm:$0xff]  ;;  %v4482_v60 = vld [vmem:[%s3408_s17] sm:$0xff] }
 0x24e   : > { %1481 = vmatpush1.msra.mxu0 %v4466_v9  ;;  %1552 = vmatpush1.msra.mxu1 %v4470_v11  ;;  %5991 = vst [vmem:[#allocation42_spill] sm:$0xff] %v4478_v7  ;;  %5992 = vst [vmem:[#allocation47_spill] sm:$0xff] %v4482_v60  ;;  %v4486_v9 = vld [vmem:[%s3408_s17 + $0x10] sm:$0xff]  ;;  %v4490_v11 = vld [vmem:[%s3408_s17 + $0x3e8] sm:$0xff] }
 0x24f   : > { %1482 = vmatprep.subr.mxu0 %v4474_v5  ;;  %1553 = vmatprep.subr.mxu1 %v4478_v7  ;;  %5993 = vst [vmem:[#allocation44_spill] sm:$0xff] %v4486_v9  ;;  %5994 = vst [vmem:[#allocation49_spill] sm:$0xff] %v4490_v11  ;;  %v4494_v5 = vld [vmem:[%s3408_s17 + $0x3f8] sm:$0xff]  ;;  %v4498_v7 = vld [vmem:[%s3408_s17 + $0x3e0] sm:$0xff] }
 0x250   : > { %1483 = vmatpush1.msra.mxu0 %v4482_v60  ;;  %1554 = vmatpush1.msra.mxu1 %v4486_v9  ;;  %5995 = vst [vmem:[#allocation46_spill] sm:$0xff] %v4494_v5  ;;  %5996 = vst [vmem:[#allocation51_spill] sm:$0xff] %v4498_v7  ;;  %v4502_v60 = vld [vmem:[%s3408_s17 + $0x3f0] sm:$0xff]  ;;  %v4506_v9 = vld [vmem:[%s3408_s17 + $0x3c8] sm:$0xff] }
 0x251   : > { %1484 = vmatprep.subr.mxu0 %v4490_v11  ;;  %1555 = vmatprep.subr.mxu1 %v4494_v5  ;;  %5997 = vst [vmem:[#allocation48_spill] sm:$0xff] %v4502_v60  ;;  %5998 = vst [vmem:[#allocation53_spill] sm:$0xff] %v4506_v9  ;;  %v4510_v11 = vld [vmem:[%s3408_s17 + $0x3d8] sm:$0xff]  ;;  %v4514_v5 = vld [vmem:[%s3408_s17 + $0x3c0] sm:$0xff] }
 0x252   : > { %1485 = vmatpush2.msra.mxu0 %v4498_v7  ;;  %1556 = vmatpush2.msra.mxu1 %v4502_v60  ;;  %5999 = vst [vmem:[#allocation50_spill] sm:$0xff] %v4510_v11  ;;  %6000 = vst [vmem:[#allocation55_spill] sm:$0xff] %v4514_v5  ;;  %v4518_v7 = vld [vmem:[%s3408_s17 + $0x3d0] sm:$0xff]  ;;  %v4522_v60 = vld [vmem:[%s3408_s17 + $0x3a8] sm:$0xff] }
 0x253   : > { %1486 = vmatprep.subr.mxu0 %v4506_v9  ;;  %1557 = vmatprep.subr.mxu1 %v4510_v11  ;;  %6001 = vst [vmem:[#allocation52_spill] sm:$0xff] %v4518_v7  ;;  %6002 = vst [vmem:[#allocation57_spill] sm:$0xff] %v4522_v60  ;;  %v4526_v9 = vld [vmem:[%s3408_s17 + $0x3b8] sm:$0xff]  ;;  %v4530_v11 = vld [vmem:[%s3408_s17 + $0x3a0] sm:$0xff] }
 0x254   : > { %1487 = vmatpush2.msra.mxu0 %v4514_v5  ;;  %1558 = vmatpush2.msra.mxu1 %v4518_v7  ;;  %6003 = vst [vmem:[#allocation54_spill] sm:$0xff] %v4526_v9  ;;  %6004 = vst [vmem:[#allocation59_spill] sm:$0xff] %v4530_v11  ;;  %v4534_v5 = vld [vmem:[%s3408_s17 + $0x3b0] sm:$0xff]  ;;  %v4538_v7 = vld [vmem:[%s3408_s17 + $0x388] sm:$0xff] }
 0x255   : > { %1488 = vmatprep.subr.mxu0 %v4522_v60  ;;  %1559 = vmatprep.subr.mxu1 %v4526_v9  ;;  %6005 = vst [vmem:[#allocation56_spill] sm:$0xff] %v4534_v5  ;;  %6006 = vst [vmem:[#allocation61_spill] sm:$0xff] %v4538_v7  ;;  %v4542_v60 = vld [vmem:[%s3408_s17 + $0x398] sm:$0xff]  ;;  %v4546_v9 = vld [vmem:[%s3408_s17 + $0x380] sm:$0xff] }
 0x256   : > { %1489 = vmatpush2.msra.mxu0 %v4530_v11  ;;  %1560 = vmatpush2.msra.mxu1 %v4534_v5  ;;  %6007 = vst [vmem:[#allocation58_spill] sm:$0xff] %v4542_v60  ;;  %6008 = vst [vmem:[#allocation63_spill] sm:$0xff] %v4546_v9  ;;  %v4550_v11 = vld [vmem:[%s3408_s17 + $0x390] sm:$0xff]  ;;  %v4554_v5 = vld [vmem:[%s3408_s17 + $0x368] sm:$0xff] }
 0x257   : > { %1490 = vmatprep.subr.mxu0 %v4538_v7  ;;  %1561 = vmatprep.subr.mxu1 %v4542_v60  ;;  %6009 = vst [vmem:[#allocation60_spill] sm:$0xff] %v4550_v11  ;;  %6010 = vst [vmem:[#allocation65_spill] sm:$0xff] %v4554_v5  ;;  %v4558_v7 = vld [vmem:[%s3408_s17 + $0x378] sm:$0xff]  ;;  %v4562_v60 = vld [vmem:[%s3408_s17 + $0x360] sm:$0xff] }
 0x258   : > { %1491 = vmatpush2.msra.mxu0 %v4546_v9  ;;  %1562 = vmatpush2.msra.mxu1 %v4550_v11  ;;  %6011 = vst [vmem:[#allocation62_spill] sm:$0xff] %v4558_v7  ;;  %6012 = vst [vmem:[#allocation67_spill] sm:$0xff] %v4562_v60  ;;  %v4566_v9 = vld [vmem:[%s3408_s17 + $0x370] sm:$0xff]  ;;  %v4570_v11 = vld [vmem:[%s3408_s17 + $0x348] sm:$0xff] }
 0x259   : > { %1492 = vmatprep.subr.mxu0 %v4554_v5  ;;  %1563 = vmatprep.subr.mxu1 %v4558_v7  ;;  %6013 = vst [vmem:[#allocation64_spill] sm:$0xff] %v4566_v9  ;;  %6014 = vst [vmem:[#allocation69_spill] sm:$0xff] %v4570_v11  ;;  %v4574_v5 = vld [vmem:[%s3408_s17 + $0x358] sm:$0xff]  ;;  %v4578_v7 = vld [vmem:[%s3408_s17 + $0x340] sm:$0xff] }
 0x25a   : > { %1493 = vmatpush2.msra.mxu0 %v4562_v60  ;;  %1564 = vmatpush2.msra.mxu1 %v4566_v9  ;;  %6015 = vst [vmem:[#allocation66_spill] sm:$0xff] %v4574_v5  ;;  %6016 = vst [vmem:[#allocation71_spill] sm:$0xff] %v4578_v7  ;;  %v4582_v60 = vld [vmem:[%s3408_s17 + $0x350] sm:$0xff]  ;;  %v4586_v9 = vld [vmem:[%s3408_s17 + $0x328] sm:$0xff] }
 0x25b   : > { %1494 = vmatprep.subr.mxu0 %v4570_v11  ;;  %1565 = vmatprep.subr.mxu1 %v4574_v5  ;;  %6017 = vst [vmem:[#allocation68_spill] sm:$0xff] %v4582_v60  ;;  %6018 = vst [vmem:[#allocation73_spill] sm:$0xff] %v4586_v9  ;;  %v4590_v11 = vld [vmem:[%s3408_s17 + $0x338] sm:$0xff]  ;;  %v4594_v5 = vld [vmem:[%s3408_s17 + $0x320] sm:$0xff] }
 0x25c   : > { %1495 = vmatpush2.msra.mxu0 %v4578_v7  ;;  %1566 = vmatpush2.msra.mxu1 %v4582_v60  ;;  %6019 = vst [vmem:[#allocation70_spill] sm:$0xff] %v4590_v11  ;;  %6020 = vst [vmem:[#allocation72_spill] sm:$0xff] %v4594_v5  ;;  %v4598_v7 = vld [vmem:[%s3408_s17 + $0x330] sm:$0xff]  ;;  %v4602_v60 = vld [vmem:[%s3408_s17 + $0x308] sm:$0xff] }
 0x25d   : > { %1496 = vmatprep.subr.mxu0 %v4586_v9  ;;  %1567 = vmatprep.subr.mxu1 %v4590_v11  ;;  %6021 = vst [vmem:[#allocation79_spill] sm:$0xff] %v4598_v7  ;;  %6022 = vst [vmem:[#allocation76_spill] sm:$0xff] %v4602_v60  ;;  %v4606_v9 = vld [vmem:[%s3408_s17 + $0x318] sm:$0xff]  ;;  %v4610_v11 = vld [vmem:[%s3408_s17 + $0x300] sm:$0xff] }
 0x25e   : > { %1497 = vmatpush2.msra.mxu0 %v4594_v5  ;;  %1568 = vmatpush2.msra.mxu1 %v4598_v7  ;;  %6023 = vst [vmem:[#allocation81_spill] sm:$0xff] %v4606_v9  ;;  %6024 = vst [vmem:[#allocation78_spill] sm:$0xff] %v4610_v11  ;;  %v4614_v5 = vld [vmem:[%s3408_s17 + $0x310] sm:$0xff]  ;;  %v4618_v7 = vld [vmem:[%s3408_s17 + $0x2e8] sm:$0xff] }
 0x25f   : > { %1498 = vmatprep.subr.mxu0 %v4602_v60  ;;  %1569 = vmatprep.subr.mxu1 %v4606_v9  ;;  %6025 = vst [vmem:[#allocation84_spill] sm:$0xff] %v4614_v5  ;;  %6026 = vst [vmem:[#allocation80_spill] sm:$0xff] %v4618_v7  ;;  %v4622_v60 = vld [vmem:[%s3408_s17 + $0x2f8] sm:$0xff]  ;;  %v4626_v9 = vld [vmem:[%s3408_s17 + $0x2e0] sm:$0xff] }
 0x260   : > { %1499 = vmatpush2.msra.mxu0 %v4610_v11  ;;  %1570 = vmatpush2.msra.mxu1 %v4614_v5  ;;  %6027 = vst [vmem:[#allocation86_spill] sm:$0xff] %v4622_v60  ;;  %6028 = vst [vmem:[#allocation82_spill] sm:$0xff] %v4626_v9  ;;  %v4634_v11 = vld [vmem:[%s3408_s17 + $0x2c8] sm:$0xff] }
 0x261   : > { %1500 = vmatprep.subr.mxu0 %v4618_v7  ;;  %1571 = vmatprep.subr.mxu1 %v4622_v60  ;;  %6030 = vst [vmem:[#allocation83_spill] sm:$0xff] %v4634_v11  ;;  %v4639_v7 = vld [vmem:[%s3408_s17 + $0x2c0] sm:$0xff]  ;;  %v4644_v60 = vld [vmem:[%s3408_s17 + $0x2a8] sm:$0xff] }
 0x262   : > { %1501 = vmatpush2.msra.mxu0 %v4626_v9  ;;  %1572 = vmatpush2.msra.mxu1 %v4630_v58  ;;  %6031 = vst [vmem:[#allocation90_spill] sm:$0xff] %v4639_v7  ;;  %6032 = vst [vmem:[#allocation85_spill] sm:$0xff] %v4644_v60  ;;  %v4649_v9 = vld [vmem:[%s3408_s17 + $0x2a0] sm:$0xff] }
 0x263   : > { %1502 = vmatprep.subr.mxu0 %v4634_v11  ;;  %1573 = vmatprep.subr.mxu1 %v5931_v0  ;;  %6033 = vst [vmem:[#allocation91_spill] sm:$0xff] %v4649_v9 }
 0x264   : > { %1503 = vmatpush2.msra.mxu0 %v4639_v7  ;;  %1574 = vmatpush2.msra.mxu1 %v5933_v10 }
 0x265   : > { %1504 = vmatprep.subr.mxu0 %v4644_v60  ;;  %1575 = vmatprep.subr.mxu1 %v5935_v12 }
 0x266   : > { %1505 = vmatpush2.msra.mxu0 %v4649_v9  ;;  %1576 = vmatpush2.msra.mxu1 %v5860_v6 }
 0x267   : > { %1506 = vmatprep.subr.mxu0 %v5937_v15  ;;  %1577 = vmatprep.subr.mxu1 %v5862_v50  ;;  %v1109_v50 = vld [vmem:[#allocation6] sm:$0xf] }
 0x268   : > { %1507 = vmatpush2.msra.mxu0 %v5859_v61  ;;  %1578 = vmatpush2.msra.mxu1 %v5938_v16  ;;  %v1114_v61 = vrot.slane %v1109_v50, %v5957_v36  ;;  %v1118_v6 = vrot.slane %v1109_v50, %v5958_v38  ;;  %v1122_v12 = vrot.slane %v1109_v50, %v4073_v63 }
 0x269   : > { %1508 = vmatprep.subr.mxu0 %v5939_v17  ;;  %1579 = vmatprep.subr.mxu1 %v5940_v18 }
 0x26a   : > { %1509 = vmatpush2.msra.mxu0 %v5941_v19  ;;  %1580 = vmatpush2.msra.mxu1 %v5942_v20 }
 0x26b   : > { %1510 = vmatprep.subr.mxu0 %v5943_v21  ;;  %1581 = vmatprep.subr.mxu1 %v5944_v22  ;;  %v1126_v21 = vrot.slane %v1109_v50, %v4077_v57 }
 0x26c   : > { %1511 = vmatpush2.msra.mxu0 %v5945_v23  ;;  %1582 = vmatpush2.msra.mxu1 %v5946_v24 }
 0x26d   : > { %1512 = vmatprep.subr.mxu0 %v5947_v25  ;;  %1583 = vmatprep.subr.mxu1 %v5948_v26 }
 0x26e   : > { %1513 = vmatpush2.msra.mxu0 %v5949_v27  ;;  %1584 = vmatpush2.msra.mxu1 %v5950_v28 }
 0x26f   : > { %1514 = vmatprep.subr.mxu0 %v5951_v29  ;;  %1585 = vmatprep.subr.mxu1 %v5952_v30 }
 0x270   : > { %1515 = vmatpush2.msra.mxu0 %v5953_v31  ;;  %1586 = vmatpush2.msra.mxu1 %v5954_v32 }
 0x271   : > { %1773 = vmatprep.subr.mxu0 %v4220_v33  ;;  %1844 = vmatprep.subr.mxu1 %v4224_v34 }
 0x2f1   : > { %v1197_v0 = vpop.f32.mrf.mxu0  ;;  %v1268_v16 = vpop.f32.mrf.mxu1 }
 0x2f2   : > { %v1198_v10 = vadd.f32 %v1197_v0, %v1114_v61  ;;  %v1269_v20 = vadd.f32 %v1268_v16, %v1122_v12  ;;  %v2944_v16 = vld [vmem:[%s5347_s5 + $0x18] sm:$0xff] }
 0x2f3   : > { %v1199_v15 = vpop.f32.mrf.mxu0  ;;  %v1270_v22 = vpop.f32.mrf.mxu1 }
 0x2f4   : > { %v1273_v17 = vmul.f32 0.5, %v1198_v10  ;;  %v1200_v18 = vadd.f32 %v1199_v15, %v1118_v6  ;;  %v1271_v23 = vadd.f32 %v1270_v22, %v1126_v21  ;;  %v6039_v21 = vld [vmem:[#allocation19_spill] sm:$0xff]  ;;  %v6040_v22 = vld [vmem:[#allocation16_spill] sm:$0xff] }
 0x2f6   : > { %2986 = vtanh.f32 %v1273_v17  ;;  %v1277_v19 = vmul.f32 0.5, %v1200_v18  ;;  %v1282_v24 = vmul.f32 0.5, %v1271_v23  ;;  %v6035_v17 = vld [vmem:[#allocation15_spill] sm:$0xff]  ;;  %v6036_v18 = vld [vmem:[#allocation12_spill] sm:$0xff]  ;;  %v6041_v23 = vld [vmem:[#allocation21_spill] sm:$0xff] }
 0x2f8   : > { %2988 = vtanh.f32 %v1277_v19  ;;  %v6037_v19 = vld [vmem:[#allocation17_spill] sm:$0xff] }
 0x2f9   : > { %2990 = vtanh.f32 %v1269_v20  ;;  %v6038_v20 = vld [vmem:[#allocation14_spill] sm:$0xff] }
 0x2fa   : > { %2992 = vtanh.f32 %v1282_v24  ;;  %v6042_v24 = vld [vmem:[#allocation18_spill] sm:$0xff] }
 0x303   : > { %v2987_v25 = vpop.eup %2986 }
 0x304   : > { %v1275_v26 = vmul.f32 0.5, %v2987_v25  ;;  %v6043_v25 = vld [vmem:[#allocation23_spill] sm:$0xff] }
 0x305   : > { %v2989_v27 = vpop.eup %2988 }
 0x306   : > { %v1276_v28 = vadd.f32 0.5, %v1275_v26  ;;  %v1279_v29 = vmul.f32 0.5, %v2989_v27  ;;  %v2991_v30 = vpop.eup %2990  ;;  %v6044_v26 = vld [vmem:[#allocation20_spill] sm:$0xff]  ;;  %v6045_v27 = vld [vmem:[#allocation25_spill] sm:$0xff] }
 0x307   : > { %v2993_v0 = vpop.eup %2992 }
 0x308   : > { %v1280_v31 = vadd.f32 0.5, %v1279_v29  ;;  %v1288_v61 = vmul.f32 %v2991_v30, %v1276_v28  ;;  %v1284_v50 = vmul.f32 0.5, %v2993_v0  ;;  %v6046_v28 = vld [vmem:[#allocation22_spill] sm:$0xff]  ;;  %v6047_v29 = vld [vmem:[#allocation27_spill] sm:$0xff]  ;;  %v6048_v30 = vld [vmem:[#allocation24_spill] sm:$0xff] }
 0x309   : > { %v6052_v0 = vld [vmem:[#allocation28_spill] sm:$0xff] }
 0x30a   : > { %v1287_v32 = vmul.f32 %v1280_v31, %v4232_v52  ;;  %v1285_v10 = vadd.f32 0.5, %v1284_v50  ;;  %v6034_v52 = vld [vmem:[#allocation11_spill] sm:$0xff]  ;;  %v6049_v31 = vld [vmem:[#allocation29_spill] sm:$0xff] }
 0x30b   : > { %v6053_v50 = vld [vmem:[#allocation33_spill] sm:$0xff] }
 0x30c   : > { %v4680_v6 = vadd.f32 %v1288_v61, %v1287_v32  ;;  %v6050_v32 = vld [vmem:[#allocation26_spill] sm:$0xff]  ;;  %v6051_v61 = vld [vmem:[#allocation31_spill] sm:$0xff] }
 0x30e   : > { %2994 = vtanh.f32 %v4680_v6 }
 0x31b   : > { %v2995_v12 = vpop.eup %2994 }
 0x31c   : > { %v1291_v15 = vmul.f32 %v2995_v12, %v1285_v10  ;;  %v6054_v10 = vld [vmem:[#allocation30_spill] sm:$0xff]  ;;  %v6055_v12 = vld [vmem:[#allocation35_spill] sm:$0xff] }
 0x31e   : > { %2943 = vst [vmem:[%s5347_s5 + $0x10] sm:$0xff] %v1291_v15  ;;  %1516 = vmatprep.mubr.f32.mxu0 %v1291_v15  ;;  %1587 = vmatprep.mubr.f32.mxu1 %v1291_v15  ;;  %v6056_v15 = vld [vmem:[#allocation32_spill] sm:$0xff] }
 0x31f   : > { %1517 = vmatmul.mubr.f32.vlgmr.msra.gmra.mxu0 %v2944_v16  ;;  %1588 = vmatmul.mubr.f32.vlgmr.msra.gmra.mxu1 %v2944_v16  ;;  %v6057_v16 = vld [vmem:[#allocation37_spill] sm:$0xff] }
 0x320   : > { %1774 = vmatpush1.msra.mxu0 %v4242_v13  ;;  %1845 = vmatpush1.msra.mxu1 %v4246_v14 }
 0x321   : > { %1775 = vmatprep.subr.mxu0 %v4250_v35  ;;  %1846 = vmatprep.subr.mxu1 %v4254_v37 }
 0x322   : > { %1776 = vmatpush1.msra.mxu0 %v4258_v39  ;;  %1847 = vmatpush1.msra.mxu1 %v4262_v40 }
 0x323   : > { %1777 = vmatprep.subr.mxu0 %v4266_v41  ;;  %1848 = vmatprep.subr.mxu1 %v4270_v42 }
 0x324   : > { %1778 = vmatpush1.msra.mxu0 %v4274_v43  ;;  %1849 = vmatpush1.msra.mxu1 %v4278_v44 }
 0x325   : > { %1779 = vmatprep.subr.mxu0 %v4282_v45  ;;  %1850 = vmatprep.subr.mxu1 %v4286_v46 }
 0x326   : > { %1780 = vmatpush1.msra.mxu0 %v4290_v47  ;;  %1851 = vmatpush1.msra.mxu1 %v4294_v48 }
 0x327   : > { %1781 = vmatprep.subr.mxu0 %v4298_v49  ;;  %1852 = vmatprep.subr.mxu1 %v4302_v51 }
 0x328   : > { %1782 = vmatpush1.msra.mxu0 %v4306_v53  ;;  %1853 = vmatpush1.msra.mxu1 %v4310_v55 }
 0x329   : > { %1783 = vmatprep.subr.mxu0 %v4314_v3  ;;  %1854 = vmatprep.subr.mxu1 %v4318_v1 }
 0x32a   : > { %1784 = vmatpush1.msra.mxu0 %v4322_v2  ;;  %1855 = vmatpush1.msra.mxu1 %v4326_v4 }
 0x32b   : > { %1785 = vmatprep.subr.mxu0 %v4330_v56  ;;  %1856 = vmatprep.subr.mxu1 %v4334_v62 }
 0x32c   : > { %1786 = vmatpush1.msra.mxu0 %v4338_v8  ;;  %1857 = vmatpush1.msra.mxu1 %v4342_v59 }
 0x32d   : > { %1787 = vmatprep.subr.mxu0 %v4346_v54  ;;  %1858 = vmatprep.subr.mxu1 %v6034_v52 }
 0x32e   : > { %1788 = vmatpush1.msra.mxu0 %v6035_v17  ;;  %1859 = vmatpush1.msra.mxu1 %v6036_v18 }
 0x32f   : > { %1789 = vmatprep.subr.mxu0 %v6037_v19  ;;  %1860 = vmatprep.subr.mxu1 %v6038_v20 }
 0x330   : > { %1790 = vmatpush1.msra.mxu0 %v6039_v21  ;;  %1861 = vmatpush1.msra.mxu1 %v6040_v22 }
 0x331   : > { %1791 = vmatprep.subr.mxu0 %v6041_v23  ;;  %1862 = vmatprep.subr.mxu1 %v6042_v24 }
 0x332   : > { %1792 = vmatpush1.msra.mxu0 %v6043_v25  ;;  %1863 = vmatpush1.msra.mxu1 %v6044_v26 }
 0x333   : > { %1793 = vmatprep.subr.mxu0 %v6045_v27  ;;  %1864 = vmatprep.subr.mxu1 %v6046_v28 }
 0x334   : > { %1794 = vmatpush1.msra.mxu0 %v6047_v29  ;;  %1865 = vmatpush1.msra.mxu1 %v6048_v30  ;;  %v6058_v29 = vld [vmem:[#allocation34_spill] sm:$0xff]  ;;  %v6059_v30 = vld [vmem:[#allocation39_spill] sm:$0xff] }
 0x335   : > { %1795 = vmatprep.subr.mxu0 %v6049_v31  ;;  %1866 = vmatprep.subr.mxu1 %v6050_v32  ;;  %v6060_v31 = vld [vmem:[#allocation36_spill] sm:$0xff]  ;;  %v6061_v32 = vld [vmem:[#allocation41_spill] sm:$0xff] }
 0x336   : > { %1796 = vmatpush1.msra.mxu0 %v6051_v61  ;;  %1867 = vmatpush1.msra.mxu1 %v6052_v0  ;;  %v6062_v61 = vld [vmem:[#allocation38_spill] sm:$0xff]  ;;  %v6063_v0 = vld [vmem:[#allocation43_spill] sm:$0xff] }
 0x337   : > { %1797 = vmatprep.subr.mxu0 %v6053_v50  ;;  %1868 = vmatprep.subr.mxu1 %v6054_v10  ;;  %v6064_v50 = vld [vmem:[#allocation40_spill] sm:$0xff]  ;;  %v6065_v10 = vld [vmem:[#allocation45_spill] sm:$0xff] }
 0x338   : > { %1798 = vmatpush1.msra.mxu0 %v6055_v12  ;;  %1869 = vmatpush1.msra.mxu1 %v6056_v15  ;;  %v6066_v12 = vld [vmem:[#allocation42_spill] sm:$0xff]  ;;  %v6067_v15 = vld [vmem:[#allocation47_spill] sm:$0xff] }
 0x339   : > { %1799 = vmatprep.subr.mxu0 %v6057_v16  ;;  %1870 = vmatprep.subr.mxu1 %v6058_v29  ;;  %v6068_v16 = vld [vmem:[#allocation44_spill] sm:$0xff]  ;;  %v6069_v29 = vld [vmem:[#allocation49_spill] sm:$0xff] }
 0x33a   : > { %1800 = vmatpush1.msra.mxu0 %v6059_v30  ;;  %1871 = vmatpush1.msra.mxu1 %v6060_v31  ;;  %v6070_v30 = vld [vmem:[#allocation46_spill] sm:$0xff]  ;;  %v6071_v31 = vld [vmem:[#allocation51_spill] sm:$0xff] }
 0x33b   : > { %1801 = vmatprep.subr.mxu0 %v6061_v32  ;;  %1872 = vmatprep.subr.mxu1 %v6062_v61  ;;  %v6072_v32 = vld [vmem:[#allocation48_spill] sm:$0xff]  ;;  %v6073_v61 = vld [vmem:[#allocation53_spill] sm:$0xff] }
 0x33c   : > { %1802 = vmatpush1.msra.mxu0 %v6063_v0  ;;  %1873 = vmatpush1.msra.mxu1 %v6064_v50  ;;  %v6074_v0 = vld [vmem:[#allocation50_spill] sm:$0xff]  ;;  %v6075_v50 = vld [vmem:[#allocation55_spill] sm:$0xff] }
 0x33d   : > { %1803 = vmatprep.subr.mxu0 %v6065_v10  ;;  %1874 = vmatprep.subr.mxu1 %v6066_v12  ;;  %v6076_v10 = vld [vmem:[#allocation52_spill] sm:$0xff]  ;;  %v6077_v12 = vld [vmem:[#allocation57_spill] sm:$0xff] }
 0x33e   : > { %1804 = vmatpush1.msra.mxu0 %v6067_v15  ;;  %1875 = vmatpush1.msra.mxu1 %v6068_v16  ;;  %v6078_v15 = vld [vmem:[#allocation54_spill] sm:$0xff]  ;;  %v6079_v16 = vld [vmem:[#allocation59_spill] sm:$0xff] }
 0x33f   : > { %1805 = vmatprep.subr.mxu0 %v6069_v29  ;;  %1876 = vmatprep.subr.mxu1 %v6070_v30  ;;  %v6080_v29 = vld [vmem:[#allocation56_spill] sm:$0xff]  ;;  %v6081_v30 = vld [vmem:[#allocation61_spill] sm:$0xff] }
 0x340   : > { %1806 = vmatpush2.msra.mxu0 %v6071_v31  ;;  %1877 = vmatpush2.msra.mxu1 %v6072_v32  ;;  %v6082_v31 = vld [vmem:[#allocation58_spill] sm:$0xff]  ;;  %v6083_v32 = vld [vmem:[#allocation63_spill] sm:$0xff] }
 0x341   : > { %1807 = vmatprep.subr.mxu0 %v6073_v61  ;;  %1878 = vmatprep.subr.mxu1 %v6074_v0  ;;  %v6084_v61 = vld [vmem:[#allocation60_spill] sm:$0xff]  ;;  %v6085_v0 = vld [vmem:[#allocation65_spill] sm:$0xff] }
 0x342   : > { %1808 = vmatpush2.msra.mxu0 %v6075_v50  ;;  %1879 = vmatpush2.msra.mxu1 %v6076_v10  ;;  %v6086_v50 = vld [vmem:[#allocation62_spill] sm:$0xff]  ;;  %v6087_v10 = vld [vmem:[#allocation67_spill] sm:$0xff] }
 0x343   : > { %1809 = vmatprep.subr.mxu0 %v6077_v12  ;;  %1880 = vmatprep.subr.mxu1 %v6078_v15  ;;  %v6088_v12 = vld [vmem:[#allocation64_spill] sm:$0xff]  ;;  %v6089_v15 = vld [vmem:[#allocation69_spill] sm:$0xff] }
 0x344   : > { %1810 = vmatpush2.msra.mxu0 %v6079_v16  ;;  %1881 = vmatpush2.msra.mxu1 %v6080_v29  ;;  %v6090_v16 = vld [vmem:[#allocation66_spill] sm:$0xff]  ;;  %v6091_v29 = vld [vmem:[#allocation71_spill] sm:$0xff] }
 0x345   : > { %1811 = vmatprep.subr.mxu0 %v6081_v30  ;;  %1882 = vmatprep.subr.mxu1 %v6082_v31  ;;  %v6092_v31 = vld [vmem:[#allocation68_spill] sm:$0xff] }
 0x346   : > { %1812 = vmatpush2.msra.mxu0 %v6083_v32  ;;  %1883 = vmatpush2.msra.mxu1 %v6084_v61  ;;  %v6093_v32 = vld [vmem:[#allocation73_spill] sm:$0xff]  ;;  %v6094_v61 = vld [vmem:[#allocation70_spill] sm:$0xff] }
 0x347   : > { %1813 = vmatprep.subr.mxu0 %v6085_v0  ;;  %1884 = vmatprep.subr.mxu1 %v6086_v50  ;;  %v6095_v0 = vld [vmem:[#allocation72_spill] sm:$0xff]  ;;  %v6096_v50 = vld [vmem:[#allocation79_spill] sm:$0xff] }
 0x348   : > { %1814 = vmatpush2.msra.mxu0 %v6087_v10  ;;  %1885 = vmatpush2.msra.mxu1 %v6088_v12  ;;  %v6097_v10 = vld [vmem:[#allocation76_spill] sm:$0xff] }
 0x349   : > { %1815 = vmatprep.subr.mxu0 %v6089_v15  ;;  %1886 = vmatprep.subr.mxu1 %v6090_v16  ;;  %v6098_v15 = vld [vmem:[#allocation81_spill] sm:$0xff]  ;;  %v6099_v16 = vld [vmem:[#allocation78_spill] sm:$0xff] }
 0x34a   : > { %1816 = vmatpush2.msra.mxu0 %v6091_v29  ;;  %1887 = vmatpush2.msra.mxu1 %v6092_v31  ;;  %v6100_v31 = vld [vmem:[#allocation80_spill] sm:$0xff] }
 0x34b   : > { %1817 = vmatprep.subr.mxu0 %v6093_v32  ;;  %1888 = vmatprep.subr.mxu1 %v6094_v61  ;;  %v6101_v32 = vld [vmem:[#allocation86_spill] sm:$0xff] }
 0x34c   : > { %1818 = vmatpush2.msra.mxu0 %v6095_v0  ;;  %1889 = vmatpush2.msra.mxu1 %v6096_v50  ;;  %v6102_v61 = vld [vmem:[#allocation82_spill] sm:$0xff] }
 0x34d   : > { %1819 = vmatprep.subr.mxu0 %v6097_v10  ;;  %1890 = vmatprep.subr.mxu1 %v6098_v15  ;;  %v4789_v10 = vld [vmem:[%s3408_s17 + $0x2d8] sm:$0xff] }
 0x34e   : > { %1820 = vmatpush2.msra.mxu0 %v6099_v16  ;;  %1891 = vmatpush2.msra.mxu1 %v4614_v5  ;;  %6103 = vst [vmem:[#allocation87_spill] sm:$0xff] %v4789_v10  ;;  %v4794_v5 = vld [vmem:[%s3408_s17 + $0x2d0] sm:$0xff] }
 0x34f   : > { %1821 = vmatprep.subr.mxu0 %v6100_v31  ;;  %1892 = vmatprep.subr.mxu1 %v6101_v32  ;;  %6104 = vst [vmem:[#allocation92_spill] sm:$0xff] %v4794_v5 }
 0x350   : > { %1822 = vmatpush2.msra.mxu0 %v6102_v61  ;;  %1893 = vmatpush2.msra.mxu1 %v4630_v58  ;;  %v4799_v61 = vld [vmem:[%s3408_s17 + $0x2b8] sm:$0xff] }
 0x351   : > { %1823 = vmatprep.subr.mxu0 %v4634_v11  ;;  %1894 = vmatprep.subr.mxu1 %v4789_v10  ;;  %6105 = vst [vmem:[#allocation89_spill] sm:$0xff] %v4799_v61  ;;  %v4804_v11 = vld [vmem:[%s3408_s17 + $0x2b0] sm:$0xff] }
 0x352   : > { %1824 = vmatpush2.msra.mxu0 %v4639_v7  ;;  %1895 = vmatpush2.msra.mxu1 %v4794_v5  ;;  %6106 = vst [vmem:[#allocation93_spill] sm:$0xff] %v4804_v11  ;;  %v4808_v7 = vld [vmem:[%s3408_s17 + $0x288] sm:$0xff]  ;;  %v4812_v5 = vld [vmem:[%s3408_s17 + $0x298] sm:$0xff] }
 0x353   : > { %1825 = vmatprep.subr.mxu0 %v4644_v60  ;;  %1896 = vmatprep.subr.mxu1 %v4799_v61  ;;  %6107 = vst [vmem:[#allocation11_spill] sm:$0xff] %v4808_v7  ;;  %6108 = vst [vmem:[#allocation15_spill] sm:$0xff] %v4812_v5  ;;  %v4816_v60 = vld [vmem:[%s3408_s17 + $0x280] sm:$0xff] }
 0x354   : > { %1826 = vmatpush2.msra.mxu0 %v4649_v9  ;;  %1897 = vmatpush2.msra.mxu1 %v4804_v11  ;;  %6109 = vst [vmem:[#allocation12_spill] sm:$0xff] %v4816_v60  ;;  %v4820_v9 = vld [vmem:[%s3408_s17 + $0x290] sm:$0xff]  ;;  %v4824_v11 = vld [vmem:[%s3408_s17 + $0x268] sm:$0xff]  ;;  %v4864_v61 = vld [vmem:[%s3408_s17 + $0x220] sm:$0xff] }
 0x355   : > { %1827 = vmatprep.subr.mxu0 %v4808_v7  ;;  %1898 = vmatprep.subr.mxu1 %v4812_v5  ;;  %6110 = vst [vmem:[#allocation17_spill] sm:$0xff] %v4820_v9  ;;  %6111 = vst [vmem:[#allocation14_spill] sm:$0xff] %v4824_v11  ;;  %v4828_v7 = vld [vmem:[%s3408_s17 + $0x278] sm:$0xff]  ;;  %v4832_v5 = vld [vmem:[%s3408_s17 + $0x260] sm:$0xff] }
 0x356   : > { %1828 = vmatpush2.msra.mxu0 %v4816_v60  ;;  %1899 = vmatpush2.msra.mxu1 %v4820_v9  ;;  %6112 = vst [vmem:[#allocation19_spill] sm:$0xff] %v4828_v7  ;;  %6113 = vst [vmem:[#allocation16_spill] sm:$0xff] %v4832_v5  ;;  %v4836_v60 = vld [vmem:[%s3408_s17 + $0x270] sm:$0xff]  ;;  %v4840_v9 = vld [vmem:[%s3408_s17 + $0x248] sm:$0xff] }
 0x357   : > { %1829 = vmatprep.subr.mxu0 %v4824_v11  ;;  %1900 = vmatprep.subr.mxu1 %v4828_v7  ;;  %6114 = vst [vmem:[#allocation21_spill] sm:$0xff] %v4836_v60  ;;  %6115 = vst [vmem:[#allocation18_spill] sm:$0xff] %v4840_v9  ;;  %v4844_v11 = vld [vmem:[%s3408_s17 + $0x258] sm:$0xff]  ;;  %v4848_v7 = vld [vmem:[%s3408_s17 + $0x240] sm:$0xff] }
 0x358   : > { %1830 = vmatpush2.msra.mxu0 %v4832_v5  ;;  %1901 = vmatpush2.msra.mxu1 %v4836_v60  ;;  %6116 = vst [vmem:[#allocation23_spill] sm:$0xff] %v4844_v11  ;;  %6117 = vst [vmem:[#allocation20_spill] sm:$0xff] %v4848_v7  ;;  %v4852_v5 = vld [vmem:[%s3408_s17 + $0x250] sm:$0xff]  ;;  %v4856_v60 = vld [vmem:[%s3408_s17 + $0x228] sm:$0xff] }
 0x359   : > { %1831 = vmatprep.subr.mxu0 %v4840_v9  ;;  %1902 = vmatprep.subr.mxu1 %v4844_v11  ;;  %6118 = vst [vmem:[#allocation25_spill] sm:$0xff] %v4852_v5  ;;  %6119 = vst [vmem:[#allocation22_spill] sm:$0xff] %v4856_v60  ;;  %v4860_v9 = vld [vmem:[%s3408_s17 + $0x238] sm:$0xff]  ;;  %v4868_v11 = vld [vmem:[%s3408_s17 + $0x230] sm:$0xff] }
 0x35a   : > { %1832 = vmatpush2.msra.mxu0 %v4848_v7  ;;  %1903 = vmatpush2.msra.mxu1 %v4852_v5  ;;  %6120 = vst [vmem:[#allocation94_spill] sm:$0xff] %v4860_v9  ;;  %6121 = vst [vmem:[#allocation95_spill] sm:$0xff] %v4864_v61  ;;  %v4872_v7 = vld [vmem:[%s3408_s17 + $0x208] sm:$0xff]  ;;  %v4876_v5 = vld [vmem:[%s3408_s17 + $0x218] sm:$0xff] }
 0x35b   : > { %1833 = vmatprep.subr.mxu0 %v4856_v60  ;;  %1904 = vmatprep.subr.mxu1 %v4860_v9  ;;  %6122 = vst [vmem:[#allocation96_spill] sm:$0xff] %v4868_v11  ;;  %6123 = vst [vmem:[#allocation97_spill] sm:$0xff] %v4872_v7  ;;  %v4880_v60 = vld [vmem:[%s3408_s17 + $0x200] sm:$0xff]  ;;  %v4884_v9 = vld [vmem:[%s3408_s17 + $0x210] sm:$0xff] }
 0x35c   : > { %1834 = vmatpush2.msra.mxu0 %v4864_v61  ;;  %1905 = vmatpush2.msra.mxu1 %v4868_v11  ;;  %6124 = vst [vmem:[#allocation98_spill] sm:$0xff] %v4876_v5  ;;  %6125 = vst [vmem:[#allocation99_spill] sm:$0xff] %v4880_v60  ;;  %v1430_v11 = vld [vmem:[#allocation6] sm:$0xf] }
 0x35d   : > { %1835 = vmatprep.subr.mxu0 %v4872_v7  ;;  %1906 = vmatprep.subr.mxu1 %v4876_v5  ;;  %6126 = vst [vmem:[#allocation100_spill] sm:$0xff] %v4884_v9  ;;  %v1435_v61 = vrot.slane %v1430_v11, %v5957_v36  ;;  %v1439_v7 = vrot.slane %v1430_v11, %v5958_v38 }
 0x35e   : > { %1836 = vmatpush2.msra.mxu0 %v4880_v60  ;;  %1907 = vmatpush2.msra.mxu1 %v4884_v9  ;;  %v1443_v5 = vrot.slane %v1430_v11, %v4073_v63 }
 0x35f   : > { %2094 = vmatprep.subr.mxu0 %v4220_v33  ;;  %2165 = vmatprep.subr.mxu1 %v4224_v34  ;;  %v1447_v34 = vrot.slane %v1430_v11, %v4077_v57 }
 0x3df   : > { %v1518_v10 = vpop.f32.mrf.mxu0  ;;  %v1589_v31 = vpop.f32.mrf.mxu1 }
 0x3e0   : > { %v1519_v58 = vadd.f32 %v1518_v10, %v1435_v61  ;;  %v1590_v9 = vadd.f32 %v1589_v31, %v1443_v5  ;;  %v6131_v31 = vld [vmem:[#allocation31_spill] sm:$0xff] }
 0x3e1   : > { %v1520_v32 = vpop.f32.mrf.mxu0  ;;  %v1591_v33 = vpop.f32.mrf.mxu1 }
 0x3e2   : > { %v1594_v60 = vmul.f32 0.5, %v1519_v58  ;;  %v1521_v16 = vadd.f32 %v1520_v32, %v1439_v7  ;;  %v1592_v50 = vadd.f32 %v1591_v33, %v1447_v34  ;;  %v6132_v32 = vld [vmem:[#allocation28_spill] sm:$0xff] }
 0x3e4   : > { %2996 = vtanh.f32 %v1594_v60  ;;  %v1598_v15 = vmul.f32 0.5, %v1521_v16  ;;  %v1603_v36 = vmul.f32 0.5, %v1592_v50  ;;  %v6134_v50 = vld [vmem:[#allocation30_spill] sm:$0xff]  ;;  %v6137_v16 = vld [vmem:[#allocation37_spill] sm:$0xff] }
 0x3e6   : > { %2998 = vtanh.f32 %v1598_v15  ;;  %v6136_v15 = vld [vmem:[#allocation32_spill] sm:$0xff] }
 0x3e7   : > { %3000 = vtanh.f32 %v1590_v9 }
 0x3e8   : > { %3002 = vtanh.f32 %v1603_v36  ;;  %v6128_v36 = vld [vmem:[#allocation24_spill] sm:$0xff] }
 0x3f1   : > { %v2997_v0 = vpop.eup %2996 }
 0x3f2   : > { %v1596_v38 = vmul.f32 0.5, %v2997_v0  ;;  %v6133_v0 = vld [vmem:[#allocation33_spill] sm:$0xff] }
 0x3f3   : > { %v2999_v29 = vpop.eup %2998 }
 0x3f4   : > { %v1597_v61 = vadd.f32 0.5, %v1596_v38  ;;  %v1600_v10 = vmul.f32 0.5, %v2999_v29  ;;  %v3001_v63 = vpop.eup %3000  ;;  %v2946_v38 = vld [vmem:[%s5347_s5 + $0x20] sm:$0xff] }
 0x3f5   : > { %v3003_v5 = vpop.eup %3002  ;;  %v6130_v29 = vld [vmem:[#allocation26_spill] sm:$0xff] }
 0x3f6   : > { %v1601_v12 = vadd.f32 0.5, %v1600_v10  ;;  %v1609_v7 = vmul.f32 %v3001_v63, %v1597_v61  ;;  %v1605_v9 = vmul.f32 0.5, %v3003_v5  ;;  %v6127_v63 = vld [vmem:[#allocation27_spill] sm:$0xff]  ;;  %v6138_v61 = vld [vmem:[#allocation34_spill] sm:$0xff] }
 0x3f7   : > { %v6139_v10 = vld [vmem:[#allocation39_spill] sm:$0xff]  ;;  %v6142_v5 = vld [vmem:[#allocation38_spill] sm:$0xff] }
 0x3f8   : > { %v1608_v58 = vmul.f32 %v1601_v12, %v4680_v6  ;;  %v1606_v11 = vadd.f32 0.5, %v1605_v9  ;;  %v6129_v6 = vld [vmem:[#allocation29_spill] sm:$0xff]  ;;  %v6135_v12 = vld [vmem:[#allocation35_spill] sm:$0xff] }
 0x3f9   : > { %v6143_v9 = vld [vmem:[#allocation43_spill] sm:$0xff] }
 0x3fa   : > { %v4894_v60 = vadd.f32 %v1609_v7, %v1608_v58  ;;  %v6140_v58 = vld [vmem:[#allocation36_spill] sm:$0xff]  ;;  %v6141_v7 = vld [vmem:[#allocation41_spill] sm:$0xff] }
 0x3fc   : > { %3004 = vtanh.f32 %v4894_v60 }
 0x409   : > { %v3005_v33 = vpop.eup %3004 }
 0x40a   : > { %v1612_v34 = vmul.f32 %v3005_v33, %v1606_v11  ;;  %v6144_v11 = vld [vmem:[#allocation40_spill] sm:$0xff]  ;;  %v6145_v33 = vld [vmem:[#allocation45_spill] sm:$0xff] }
 0x40c   : > { %2945 = vst [vmem:[%s5347_s5 + $0x18] sm:$0xff] %v1612_v34  ;;  %1837 = vmatprep.mubr.f32.mxu0 %v1612_v34  ;;  %1908 = vmatprep.mubr.f32.mxu1 %v1612_v34  ;;  %v6146_v34 = vld [vmem:[#allocation42_spill] sm:$0xff] }
 0x40d   : > { %1838 = vmatmul.mubr.f32.vlgmr.msra.gmra.mxu0 %v2946_v38  ;;  %1909 = vmatmul.mubr.f32.vlgmr.msra.gmra.mxu1 %v2946_v38  ;;  %v6147_v38 = vld [vmem:[#allocation47_spill] sm:$0xff] }
 0x40e   : > { %2095 = vmatpush1.msra.mxu0 %v4242_v13  ;;  %2166 = vmatpush1.msra.mxu1 %v4246_v14 }
 0x40f   : > { %2096 = vmatprep.subr.mxu0 %v4250_v35  ;;  %2167 = vmatprep.subr.mxu1 %v4254_v37 }
 0x410   : > { %2097 = vmatpush1.msra.mxu0 %v4258_v39  ;;  %2168 = vmatpush1.msra.mxu1 %v4262_v40 }
 0x411   : > { %2098 = vmatprep.subr.mxu0 %v4266_v41  ;;  %2169 = vmatprep.subr.mxu1 %v4270_v42 }
 0x412   : > { %2099 = vmatpush1.msra.mxu0 %v4274_v43  ;;  %2170 = vmatpush1.msra.mxu1 %v4278_v44 }
 0x413   : > { %2100 = vmatprep.subr.mxu0 %v4282_v45  ;;  %2171 = vmatprep.subr.mxu1 %v4286_v46 }
 0x414   : > { %2101 = vmatpush1.msra.mxu0 %v4290_v47  ;;  %2172 = vmatpush1.msra.mxu1 %v4294_v48 }
 0x415   : > { %2102 = vmatprep.subr.mxu0 %v4298_v49  ;;  %2173 = vmatprep.subr.mxu1 %v4302_v51 }
 0x416   : > { %2103 = vmatpush1.msra.mxu0 %v4306_v53  ;;  %2174 = vmatpush1.msra.mxu1 %v4310_v55 }
 0x417   : > { %2104 = vmatprep.subr.mxu0 %v4314_v3  ;;  %2175 = vmatprep.subr.mxu1 %v4318_v1 }
 0x418   : > { %2105 = vmatpush1.msra.mxu0 %v4322_v2  ;;  %2176 = vmatpush1.msra.mxu1 %v4326_v4 }
 0x419   : > { %2106 = vmatprep.subr.mxu0 %v4330_v56  ;;  %2177 = vmatprep.subr.mxu1 %v4334_v62 }
 0x41a   : > { %2107 = vmatpush1.msra.mxu0 %v4338_v8  ;;  %2178 = vmatpush1.msra.mxu1 %v4342_v59 }
 0x41b   : > { %2108 = vmatprep.subr.mxu0 %v4346_v54  ;;  %2179 = vmatprep.subr.mxu1 %v6034_v52 }
 0x41c   : > { %2109 = vmatpush1.msra.mxu0 %v6035_v17  ;;  %2180 = vmatpush1.msra.mxu1 %v6036_v18 }
 0x41d   : > { %2110 = vmatprep.subr.mxu0 %v6037_v19  ;;  %2181 = vmatprep.subr.mxu1 %v6038_v20 }
 0x41e   : > { %2111 = vmatpush1.msra.mxu0 %v6039_v21  ;;  %2182 = vmatpush1.msra.mxu1 %v6040_v22 }
 0x41f   : > { %2112 = vmatprep.subr.mxu0 %v6041_v23  ;;  %2183 = vmatprep.subr.mxu1 %v6042_v24 }
 0x420   : > { %2113 = vmatpush1.msra.mxu0 %v6043_v25  ;;  %2184 = vmatpush1.msra.mxu1 %v6044_v26 }
 0x421   : > { %2114 = vmatprep.subr.mxu0 %v6045_v27  ;;  %2185 = vmatprep.subr.mxu1 %v6046_v28 }
 0x422   : > { %2115 = vmatpush1.msra.mxu0 %v6127_v63  ;;  %2186 = vmatpush1.msra.mxu1 %v6128_v36 }
 0x423   : > { %2116 = vmatprep.subr.mxu0 %v6129_v6  ;;  %2187 = vmatprep.subr.mxu1 %v6130_v29 }
 0x424   : > { %2117 = vmatpush1.msra.mxu0 %v6131_v31  ;;  %2188 = vmatpush1.msra.mxu1 %v6132_v32 }
 0x425   : > { %2118 = vmatprep.subr.mxu0 %v6133_v0  ;;  %2189 = vmatprep.subr.mxu1 %v6134_v50 }
 0x426   : > { %2119 = vmatpush1.msra.mxu0 %v6135_v12  ;;  %2190 = vmatpush1.msra.mxu1 %v6136_v15 }
 0x427   : > { %2120 = vmatprep.subr.mxu0 %v6137_v16  ;;  %2191 = vmatprep.subr.mxu1 %v6138_v61  ;;  %v6148_v16 = vld [vmem:[#allocation44_spill] sm:$0xff]  ;;  %v6149_v61 = vld [vmem:[#allocation49_spill] sm:$0xff] }
 0x428   : > { %2121 = vmatpush1.msra.mxu0 %v6139_v10  ;;  %2192 = vmatpush1.msra.mxu1 %v6140_v58  ;;  %v6150_v10 = vld [vmem:[#allocation46_spill] sm:$0xff]  ;;  %v6151_v58 = vld [vmem:[#allocation51_spill] sm:$0xff] }
 0x429   : > { %2122 = vmatprep.subr.mxu0 %v6141_v7  ;;  %2193 = vmatprep.subr.mxu1 %v6142_v5  ;;  %v6152_v7 = vld [vmem:[#allocation48_spill] sm:$0xff]  ;;  %v6153_v5 = vld [vmem:[#allocation53_spill] sm:$0xff] }
 0x42a   : > { %2123 = vmatpush1.msra.mxu0 %v6143_v9  ;;  %2194 = vmatpush1.msra.mxu1 %v6144_v11  ;;  %v6154_v9 = vld [vmem:[#allocation50_spill] sm:$0xff]  ;;  %v6155_v11 = vld [vmem:[#allocation55_spill] sm:$0xff] }
 0x42b   : > { %2124 = vmatprep.subr.mxu0 %v6145_v33  ;;  %2195 = vmatprep.subr.mxu1 %v6146_v34  ;;  %v6156_v33 = vld [vmem:[#allocation52_spill] sm:$0xff]  ;;  %v6157_v34 = vld [vmem:[#allocation57_spill] sm:$0xff] }
 0x42c   : > { %2125 = vmatpush1.msra.mxu0 %v6147_v38  ;;  %2196 = vmatpush1.msra.mxu1 %v6148_v16  ;;  %v6158_v38 = vld [vmem:[#allocation54_spill] sm:$0xff]  ;;  %v6159_v16 = vld [vmem:[#allocation59_spill] sm:$0xff] }
 0x42d   : > { %2126 = vmatprep.subr.mxu0 %v6149_v61  ;;  %2197 = vmatprep.subr.mxu1 %v6150_v10  ;;  %v6160_v61 = vld [vmem:[#allocation56_spill] sm:$0xff] }
 0x42e   : > { %2127 = vmatpush2.msra.mxu0 %v6151_v58  ;;  %2198 = vmatpush2.msra.mxu1 %v6152_v7  ;;  %v6161_v58 = vld [vmem:[#allocation58_spill] sm:$0xff]  ;;  %v6162_v7 = vld [vmem:[#allocation63_spill] sm:$0xff] }
 0x42f   : > { %2128 = vmatprep.subr.mxu0 %v6153_v5  ;;  %2199 = vmatprep.subr.mxu1 %v6154_v9  ;;  %v6163_v5 = vld [vmem:[#allocation60_spill] sm:$0xff]  ;;  %v6164_v9 = vld [vmem:[#allocation65_spill] sm:$0xff] }
 0x430   : > { %2129 = vmatpush2.msra.mxu0 %v6155_v11  ;;  %2200 = vmatpush2.msra.mxu1 %v6156_v33  ;;  %v6165_v11 = vld [vmem:[#allocation62_spill] sm:$0xff]  ;;  %v6166_v33 = vld [vmem:[#allocation67_spill] sm:$0xff] }
 0x431   : > { %2130 = vmatprep.subr.mxu0 %v6157_v34  ;;  %2201 = vmatprep.subr.mxu1 %v6158_v38  ;;  %v6167_v34 = vld [vmem:[#allocation64_spill] sm:$0xff]  ;;  %v6168_v38 = vld [vmem:[#allocation69_spill] sm:$0xff] }
 0x432   : > { %2131 = vmatpush2.msra.mxu0 %v6159_v16  ;;  %2202 = vmatpush2.msra.mxu1 %v6160_v61  ;;  %v6169_v16 = vld [vmem:[#allocation66_spill] sm:$0xff]  ;;  %v6170_v61 = vld [vmem:[#allocation71_spill] sm:$0xff] }
 0x433   : > { %2132 = vmatprep.subr.mxu0 %v6081_v30  ;;  %2203 = vmatprep.subr.mxu1 %v6161_v58  ;;  %v6171_v30 = vld [vmem:[#allocation68_spill] sm:$0xff]  ;;  %v6172_v58 = vld [vmem:[#allocation73_spill] sm:$0xff] }
 0x434   : > { %2133 = vmatpush2.msra.mxu0 %v6162_v7  ;;  %2204 = vmatpush2.msra.mxu1 %v6163_v5  ;;  %v6173_v7 = vld [vmem:[#allocation70_spill] sm:$0xff]  ;;  %v6174_v5 = vld [vmem:[#allocation72_spill] sm:$0xff] }
 0x435   : > { %2134 = vmatprep.subr.mxu0 %v6164_v9  ;;  %2205 = vmatprep.subr.mxu1 %v6165_v11  ;;  %v6175_v9 = vld [vmem:[#allocation79_spill] sm:$0xff]  ;;  %v6176_v11 = vld [vmem:[#allocation76_spill] sm:$0xff] }
 0x436   : > { %2135 = vmatpush2.msra.mxu0 %v6166_v33  ;;  %2206 = vmatpush2.msra.mxu1 %v6167_v34  ;;  %v6177_v33 = vld [vmem:[#allocation81_spill] sm:$0xff]  ;;  %v6178_v34 = vld [vmem:[#allocation78_spill] sm:$0xff] }
 0x437   : > { %2136 = vmatprep.subr.mxu0 %v6168_v38  ;;  %2207 = vmatprep.subr.mxu1 %v6169_v16  ;;  %v6179_v38 = vld [vmem:[#allocation84_spill] sm:$0xff] }
 0x438   : > { %2137 = vmatpush2.msra.mxu0 %v6170_v61  ;;  %2208 = vmatpush2.msra.mxu1 %v6171_v30  ;;  %v6180_v16 = vld [vmem:[#allocation80_spill] sm:$0xff]  ;;  %v6181_v61 = vld [vmem:[#allocation86_spill] sm:$0xff] }
 0x439   : > { %2138 = vmatprep.subr.mxu0 %v6172_v58  ;;  %2209 = vmatprep.subr.mxu1 %v6173_v7  ;;  %v6182_v30 = vld [vmem:[#allocation82_spill] sm:$0xff]  ;;  %v6183_v58 = vld [vmem:[#allocation88_spill] sm:$0xff]  ;;  %v6184_v7 = vld [vmem:[#allocation83_spill] sm:$0xff] }
 0x43a   : > { %2139 = vmatpush2.msra.mxu0 %v6174_v5  ;;  %2210 = vmatpush2.msra.mxu1 %v6175_v9  ;;  %v6185_v5 = vld [vmem:[#allocation87_spill] sm:$0xff]  ;;  %v6186_v9 = vld [vmem:[#allocation90_spill] sm:$0xff] }
 0x43b   : > { %2140 = vmatprep.subr.mxu0 %v6176_v11  ;;  %2211 = vmatprep.subr.mxu1 %v6177_v33  ;;  %v6187_v11 = vld [vmem:[#allocation92_spill] sm:$0xff]  ;;  %v6188_v33 = vld [vmem:[#allocation85_spill] sm:$0xff] }
 0x43c   : > { %2141 = vmatpush2.msra.mxu0 %v6178_v34  ;;  %2212 = vmatpush2.msra.mxu1 %v6179_v38  ;;  %v6189_v34 = vld [vmem:[#allocation89_spill] sm:$0xff]  ;;  %v6190_v38 = vld [vmem:[#allocation91_spill] sm:$0xff] }
 0x43d   : > { %2142 = vmatprep.subr.mxu0 %v6180_v16  ;;  %2213 = vmatprep.subr.mxu1 %v6181_v61  ;;  %v6191_v16 = vld [vmem:[#allocation93_spill] sm:$0xff]  ;;  %v6192_v61 = vld [vmem:[#allocation11_spill] sm:$0xff] }
 0x43e   : > { %2143 = vmatpush2.msra.mxu0 %v6182_v30  ;;  %2214 = vmatpush2.msra.mxu1 %v6183_v58  ;;  %v6193_v30 = vld [vmem:[#allocation15_spill] sm:$0xff]  ;;  %v6194_v58 = vld [vmem:[#allocation12_spill] sm:$0xff] }
 0x43f   : > { %2144 = vmatprep.subr.mxu0 %v6184_v7  ;;  %2215 = vmatprep.subr.mxu1 %v6185_v5  ;;  %v6195_v7 = vld [vmem:[#allocation17_spill] sm:$0xff]  ;;  %v6196_v5 = vld [vmem:[#allocation14_spill] sm:$0xff] }
 0x440   : > { %2145 = vmatpush2.msra.mxu0 %v6186_v9  ;;  %2216 = vmatpush2.msra.mxu1 %v6187_v11  ;;  %v6197_v9 = vld [vmem:[#allocation19_spill] sm:$0xff]  ;;  %v6198_v11 = vld [vmem:[#allocation16_spill] sm:$0xff] }
 0x441   : > { %2146 = vmatprep.subr.mxu0 %v6188_v33  ;;  %2217 = vmatprep.subr.mxu1 %v6189_v34  ;;  %v6199_v33 = vld [vmem:[#allocation21_spill] sm:$0xff]  ;;  %v6200_v34 = vld [vmem:[#allocation18_spill] sm:$0xff] }
 0x442   : > { %2147 = vmatpush2.msra.mxu0 %v6190_v38  ;;  %2218 = vmatpush2.msra.mxu1 %v6191_v16  ;;  %v6201_v38 = vld [vmem:[#allocation23_spill] sm:$0xff]  ;;  %v6202_v16 = vld [vmem:[#allocation20_spill] sm:$0xff] }
 0x443   : > { %2148 = vmatprep.subr.mxu0 %v6192_v61  ;;  %2219 = vmatprep.subr.mxu1 %v6193_v30  ;;  %v6203_v61 = vld [vmem:[#allocation25_spill] sm:$0xff]  ;;  %v6204_v30 = vld [vmem:[#allocation22_spill] sm:$0xff] }
 0x444   : > { %2149 = vmatpush2.msra.mxu0 %v6194_v58  ;;  %2220 = vmatpush2.msra.mxu1 %v6195_v7  ;;  %v6205_v58 = vld [vmem:[#allocation94_spill] sm:$0xff]  ;;  %v6206_v7 = vld [vmem:[#allocation95_spill] sm:$0xff] }
 0x445   : > { %2150 = vmatprep.subr.mxu0 %v6196_v5  ;;  %2221 = vmatprep.subr.mxu1 %v6197_v9  ;;  %v6207_v5 = vld [vmem:[#allocation96_spill] sm:$0xff]  ;;  %v6208_v9 = vld [vmem:[#allocation97_spill] sm:$0xff] }
 0x446   : > { %2151 = vmatpush2.msra.mxu0 %v6198_v11  ;;  %2222 = vmatpush2.msra.mxu1 %v6199_v33  ;;  %v6209_v11 = vld [vmem:[#allocation98_spill] sm:$0xff]  ;;  %v6210_v33 = vld [vmem:[#allocation99_spill] sm:$0xff] }
 0x447   : > { %2152 = vmatprep.subr.mxu0 %v6200_v34  ;;  %2223 = vmatprep.subr.mxu1 %v6201_v38  ;;  %v6211_v34 = vld [vmem:[#allocation100_spill] sm:$0xff]  ;;  %v6212_v38 = vld [vmem:[#allocation10_spill] sm:$0xff] }
 0x448   : > { %2153 = vmatpush2.msra.mxu0 %v6202_v16  ;;  %2224 = vmatpush2.msra.mxu1 %v6203_v61  ;;  %v6213_v16 = vld [vmem:[#allocation13_spill] sm:$0xff] }
 0x449   : > { %2154 = vmatprep.subr.mxu0 %v6204_v30  ;;  %2225 = vmatprep.subr.mxu1 %v6205_v58  ;;  %v1751_v61 = vld [vmem:[#allocation6] sm:$0xf]  ;;  %v6214_v30 = vld [vmem:[#allocation74_spill] sm:$0xff]  ;;  %v6215_v58 = vld [vmem:[#allocation75_spill] sm:$0xff] }
 0x44a   : > { %2155 = vmatpush2.msra.mxu0 %v6206_v7  ;;  %2226 = vmatpush2.msra.mxu1 %v6207_v5  ;;  %v1756_v10 = vrot.slane %v1751_v61, %v6214_v30  ;;  %v1760_v15 = vrot.slane %v1751_v61, %v6215_v58  ;;  %v6216_v5 = vld [vmem:[#allocation77_spill] sm:$0xff] }
 0x44b   : > { %2156 = vmatprep.subr.mxu0 %v6208_v9  ;;  %2227 = vmatprep.subr.mxu1 %v6209_v11  ;;  %v1764_v50 = vrot.slane %v1751_v61, %v6216_v5 }
 0x44c   : > { %2157 = vmatpush2.msra.mxu0 %v6210_v33  ;;  %2228 = vmatpush2.msra.mxu1 %v6211_v34 }
 0x44d   : > { %2415 = vmatprep.subr.mxu0 %v6212_v38  ;;  %2486 = vmatprep.subr.mxu1 %v6213_v16  ;;  %v1768_v16 = vrot.slane %v1751_v61, %v4077_v57 }
 0x4cd   : > { %v1839_v7 = vpop.f32.mrf.mxu0  ;;  %v1910_v0 = vpop.f32.mrf.mxu1 }
 0x4ce   : > { %v1840_v12 = vadd.f32 %v1839_v7, %v1756_v10  ;;  %v1911_v34 = vadd.f32 %v1910_v0, %v1764_v50 }
 0x4cf   : > { %v1841_v9 = vpop.f32.mrf.mxu0  ;;  %v1912_v38 = vpop.f32.mrf.mxu1 }
 0x4d0   : > { %v1915_v11 = vmul.f32 0.5, %v1840_v12  ;;  %v1842_v32 = vadd.f32 %v1841_v9, %v1760_v15  ;;  %v1913_v31 = vadd.f32 %v1912_v38, %v1768_v16  ;;  %v6267_v16 = vld [vmem:[#allocation81_spill] sm:$0xff]  ;;  %v6268_v38 = vld [vmem:[#allocation78_spill] sm:$0xff] }
 0x4d2   : > { %3006 = vtanh.f32 %v1915_v11  ;;  %v1919_v33 = vmul.f32 0.5, %v1842_v32  ;;  %v1924_v30 = vmul.f32 0.5, %v1913_v31  ;;  %v6264_v11 = vld [vmem:[#allocation72_spill] sm:$0xff] }
 0x4d4   : > { %3008 = vtanh.f32 %v1919_v33  ;;  %v6265_v33 = vld [vmem:[#allocation79_spill] sm:$0xff] }
 0x4d5   : > { %3010 = vtanh.f32 %v1911_v34  ;;  %v6266_v34 = vld [vmem:[#allocation76_spill] sm:$0xff] }
 0x4d6   : > { %3012 = vtanh.f32 %v1924_v30  ;;  %v6257_v30 = vld [vmem:[#allocation64_spill] sm:$0xff] }
 0x4df   : > { %v3007_v29 = vpop.eup %3006 }
 0x4e0   : > { %v1917_v58 = vmul.f32 0.5, %v3007_v29  ;;  %v2948_v29 = vld [vmem:[%s5347_s5 + $0x28] sm:$0xff] }
 0x4e1   : > { %v3009_v6 = vpop.eup %3008 }
 0x4e2   : > { %v1918_v10 = vadd.f32 0.5, %v1917_v58  ;;  %v1921_v7 = vmul.f32 0.5, %v3009_v6  ;;  %v3011_v5 = vpop.eup %3010  ;;  %v6261_v6 = vld [vmem:[#allocation68_spill] sm:$0xff]  ;;  %v6262_v58 = vld [vmem:[#allocation73_spill] sm:$0xff] }
 0x4e3   : > { %v3013_v0 = vpop.eup %3012 }
 0x4e4   : > { %v1922_v36 = vadd.f32 0.5, %v1921_v7  ;;  %v1930_v15 = vmul.f32 %v3011_v5, %v1918_v10  ;;  %v1926_v50 = vmul.f32 0.5, %v3013_v0  ;;  %v6263_v5 = vld [vmem:[#allocation70_spill] sm:$0xff]  ;;  %v6269_v10 = vld [vmem:[#allocation84_spill] sm:$0xff] }
 0x4e5   : > { %v6270_v7 = vld [vmem:[#allocation80_spill] sm:$0xff] }
 0x4e6   : > { %v1929_v12 = vmul.f32 %v1922_v36, %v4894_v60  ;;  %v1927_v61 = vadd.f32 0.5, %v1926_v50  ;;  %v6258_v60 = vld [vmem:[#allocation69_spill] sm:$0xff]  ;;  %v6260_v36 = vld [vmem:[#allocation71_spill] sm:$0xff]  ;;  %v6273_v0 = vld [vmem:[#allocation88_spill] sm:$0xff] }
 0x4e7   : > { %v6274_v50 = vld [vmem:[#allocation83_spill] sm:$0xff] }
 0x4e8   : > { %v5036_v32 = vadd.f32 %v1930_v15, %v1929_v12  ;;  %v6271_v12 = vld [vmem:[#allocation86_spill] sm:$0xff] }
 0x4e9   : > { %v6272_v15 = vld [vmem:[#allocation82_spill] sm:$0xff] }
 0x4ea   : > { %3014 = vtanh.f32 %v5036_v32 }
 0x4f7   : > { %v3015_v9 = vpop.eup %3014 }
 0x4f8   : > { %v1933_v31 = vmul.f32 %v3015_v9, %v1927_v61  ;;  %v6275_v61 = vld [vmem:[#allocation87_spill] sm:$0xff]  ;;  %v6276_v9 = vld [vmem:[#allocation90_spill] sm:$0xff] }
 0x4fa   : > { %2947 = vst [vmem:[%s5347_s5 + $0x20] sm:$0xff] %v1933_v31  ;;  %2158 = vmatprep.mubr.f32.mxu0 %v1933_v31  ;;  %2229 = vmatprep.mubr.f32.mxu1 %v1933_v31  ;;  %v6277_v31 = vld [vmem:[#allocation92_spill] sm:$0xff] }
 0x4fb   : > { %2159 = vmatmul.mubr.f32.vlgmr.msra.gmra.mxu0 %v2948_v29  ;;  %2230 = vmatmul.mubr.f32.vlgmr.msra.gmra.mxu1 %v2948_v29  ;;  %v6278_v29 = vld [vmem:[#allocation85_spill] sm:$0xff] }
 0x4fc   : > { %2416 = vmatpush1.msra.mxu0 %v4242_v13  ;;  %2487 = vmatpush1.msra.mxu1 %v4246_v14  ;;  %v6217_v13 = vld [vmem:[#allocation24_spill] sm:$0xff]  ;;  %v6218_v14 = vld [vmem:[#allocation29_spill] sm:$0xff] }
 0x4fd   : > { %2417 = vmatprep.subr.mxu0 %v4250_v35  ;;  %2488 = vmatprep.subr.mxu1 %v4254_v37  ;;  %v6219_v35 = vld [vmem:[#allocation26_spill] sm:$0xff]  ;;  %v6220_v37 = vld [vmem:[#allocation31_spill] sm:$0xff] }
 0x4fe   : > { %2418 = vmatpush1.msra.mxu0 %v4258_v39  ;;  %2489 = vmatpush1.msra.mxu1 %v4262_v40  ;;  %v6221_v39 = vld [vmem:[#allocation28_spill] sm:$0xff]  ;;  %v6222_v40 = vld [vmem:[#allocation33_spill] sm:$0xff] }
 0x4ff   : > { %2419 = vmatprep.subr.mxu0 %v4266_v41  ;;  %2490 = vmatprep.subr.mxu1 %v4270_v42  ;;  %v6223_v41 = vld [vmem:[#allocation30_spill] sm:$0xff]  ;;  %v6224_v42 = vld [vmem:[#allocation35_spill] sm:$0xff] }
 0x500   : > { %2420 = vmatpush1.msra.mxu0 %v4274_v43  ;;  %2491 = vmatpush1.msra.mxu1 %v4278_v44  ;;  %v6225_v43 = vld [vmem:[#allocation32_spill] sm:$0xff]  ;;  %v6226_v44 = vld [vmem:[#allocation37_spill] sm:$0xff] }
 0x501   : > { %2421 = vmatprep.subr.mxu0 %v4282_v45  ;;  %2492 = vmatprep.subr.mxu1 %v4286_v46  ;;  %v6227_v45 = vld [vmem:[#allocation34_spill] sm:$0xff]  ;;  %v6228_v46 = vld [vmem:[#allocation39_spill] sm:$0xff] }
 0x502   : > { %2422 = vmatpush1.msra.mxu0 %v4290_v47  ;;  %2493 = vmatpush1.msra.mxu1 %v4294_v48  ;;  %v6229_v47 = vld [vmem:[#allocation36_spill] sm:$0xff]  ;;  %v6230_v48 = vld [vmem:[#allocation41_spill] sm:$0xff] }
 0x503   : > { %2423 = vmatprep.subr.mxu0 %v4298_v49  ;;  %2494 = vmatprep.subr.mxu1 %v4302_v51  ;;  %v6231_v49 = vld [vmem:[#allocation38_spill] sm:$0xff]  ;;  %v6232_v51 = vld [vmem:[#allocation43_spill] sm:$0xff] }
 0x504   : > { %2424 = vmatpush1.msra.mxu0 %v4306_v53  ;;  %2495 = vmatpush1.msra.mxu1 %v4310_v55  ;;  %v6233_v53 = vld [vmem:[#allocation40_spill] sm:$0xff]  ;;  %v6234_v55 = vld [vmem:[#allocation45_spill] sm:$0xff] }
 0x505   : > { %2425 = vmatprep.subr.mxu0 %v4314_v3  ;;  %2496 = vmatprep.subr.mxu1 %v4318_v1  ;;  %v6235_v3 = vld [vmem:[#allocation42_spill] sm:$0xff]  ;;  %v6236_v1 = vld [vmem:[#allocation47_spill] sm:$0xff] }
 0x506   : > { %2426 = vmatpush1.msra.mxu0 %v4322_v2  ;;  %2497 = vmatpush1.msra.mxu1 %v4326_v4  ;;  %v6237_v2 = vld [vmem:[#allocation44_spill] sm:$0xff]  ;;  %v6238_v4 = vld [vmem:[#allocation49_spill] sm:$0xff] }
 0x507   : > { %2427 = vmatprep.subr.mxu0 %v4330_v56  ;;  %2498 = vmatprep.subr.mxu1 %v4334_v62  ;;  %v6239_v56 = vld [vmem:[#allocation46_spill] sm:$0xff]  ;;  %v6240_v62 = vld [vmem:[#allocation51_spill] sm:$0xff] }
 0x508   : > { %2428 = vmatpush1.msra.mxu0 %v4338_v8  ;;  %2499 = vmatpush1.msra.mxu1 %v4342_v59  ;;  %v6241_v8 = vld [vmem:[#allocation48_spill] sm:$0xff]  ;;  %v6242_v59 = vld [vmem:[#allocation53_spill] sm:$0xff] }
 0x509   : > { %2429 = vmatprep.subr.mxu0 %v4346_v54  ;;  %2500 = vmatprep.subr.mxu1 %v6034_v52  ;;  %v6243_v54 = vld [vmem:[#allocation50_spill] sm:$0xff]  ;;  %v6244_v52 = vld [vmem:[#allocation55_spill] sm:$0xff] }
 0x50a   : > { %2430 = vmatpush1.msra.mxu0 %v6035_v17  ;;  %2501 = vmatpush1.msra.mxu1 %v6036_v18  ;;  %v6245_v17 = vld [vmem:[#allocation52_spill] sm:$0xff]  ;;  %v6246_v18 = vld [vmem:[#allocation57_spill] sm:$0xff] }
 0x50b   : > { %2431 = vmatprep.subr.mxu0 %v6037_v19  ;;  %2502 = vmatprep.subr.mxu1 %v6038_v20  ;;  %v6247_v19 = vld [vmem:[#allocation54_spill] sm:$0xff]  ;;  %v6248_v20 = vld [vmem:[#allocation59_spill] sm:$0xff] }
 0x50c   : > { %2432 = vmatpush1.msra.mxu0 %v6039_v21  ;;  %2503 = vmatpush1.msra.mxu1 %v6040_v22  ;;  %v6249_v21 = vld [vmem:[#allocation56_spill] sm:$0xff]  ;;  %v6250_v22 = vld [vmem:[#allocation61_spill] sm:$0xff] }
 0x50d   : > { %2433 = vmatprep.subr.mxu0 %v6041_v23  ;;  %2504 = vmatprep.subr.mxu1 %v6042_v24  ;;  %v6251_v23 = vld [vmem:[#allocation58_spill] sm:$0xff]  ;;  %v6252_v24 = vld [vmem:[#allocation63_spill] sm:$0xff] }
 0x50e   : > { %2434 = vmatpush1.msra.mxu0 %v6043_v25  ;;  %2505 = vmatpush1.msra.mxu1 %v6044_v26  ;;  %v6253_v25 = vld [vmem:[#allocation60_spill] sm:$0xff]  ;;  %v6254_v26 = vld [vmem:[#allocation65_spill] sm:$0xff] }
 0x50f   : > { %2435 = vmatprep.subr.mxu0 %v6045_v27  ;;  %2506 = vmatprep.subr.mxu1 %v6046_v28  ;;  %v6255_v27 = vld [vmem:[#allocation62_spill] sm:$0xff]  ;;  %v6256_v28 = vld [vmem:[#allocation67_spill] sm:$0xff] }
 0x510   : > { %2436 = vmatpush1.msra.mxu0 %v6127_v63  ;;  %2507 = vmatpush1.msra.mxu1 %v6217_v13  ;;  %v6259_v63 = vld [vmem:[#allocation66_spill] sm:$0xff]  ;;  %v6279_v13 = vld [vmem:[#allocation89_spill] sm:$0xff] }
 0x511   : > { %2437 = vmatprep.subr.mxu0 %v6218_v14  ;;  %2508 = vmatprep.subr.mxu1 %v6219_v35  ;;  %v6280_v14 = vld [vmem:[#allocation91_spill] sm:$0xff]  ;;  %v6281_v35 = vld [vmem:[#allocation93_spill] sm:$0xff] }
 0x512   : > { %2438 = vmatpush1.msra.mxu0 %v6220_v37  ;;  %2509 = vmatpush1.msra.mxu1 %v6221_v39  ;;  %v6282_v37 = vld [vmem:[#allocation11_spill] sm:$0xff] }
 0x513   : > { %2439 = vmatprep.subr.mxu0 %v6222_v40  ;;  %2510 = vmatprep.subr.mxu1 %v6223_v41  ;;  %v6283_v39 = vld [vmem:[#allocation15_spill] sm:$0xff]  ;;  %v6284_v40 = vld [vmem:[#allocation12_spill] sm:$0xff]  ;;  %v6285_v41 = vld [vmem:[#allocation17_spill] sm:$0xff] }
 0x514   : > { %2440 = vmatpush1.msra.mxu0 %v6224_v42  ;;  %2511 = vmatpush1.msra.mxu1 %v6225_v43  ;;  %v6286_v42 = vld [vmem:[#allocation14_spill] sm:$0xff]  ;;  %v6287_v43 = vld [vmem:[#allocation19_spill] sm:$0xff] }
 0x515   : > { %2441 = vmatprep.subr.mxu0 %v6226_v44  ;;  %2512 = vmatprep.subr.mxu1 %v6227_v45  ;;  %v6288_v44 = vld [vmem:[#allocation16_spill] sm:$0xff]  ;;  %v6289_v45 = vld [vmem:[#allocation21_spill] sm:$0xff] }
 0x516   : > { %2442 = vmatpush1.msra.mxu0 %v6228_v46  ;;  %2513 = vmatpush1.msra.mxu1 %v6229_v47  ;;  %v6290_v46 = vld [vmem:[#allocation18_spill] sm:$0xff]  ;;  %v6291_v47 = vld [vmem:[#allocation23_spill] sm:$0xff] }
 0x517   : > { %2443 = vmatprep.subr.mxu0 %v6230_v48  ;;  %2514 = vmatprep.subr.mxu1 %v6231_v49  ;;  %v6292_v48 = vld [vmem:[#allocation20_spill] sm:$0xff]  ;;  %v6293_v49 = vld [vmem:[#allocation25_spill] sm:$0xff] }
 0x518   : > { %2444 = vmatpush1.msra.mxu0 %v6232_v51  ;;  %2515 = vmatpush1.msra.mxu1 %v6233_v53  ;;  %v6294_v51 = vld [vmem:[#allocation22_spill] sm:$0xff] }
 0x519   : > { %2445 = vmatprep.subr.mxu0 %v6234_v55  ;;  %2516 = vmatprep.subr.mxu1 %v6235_v3  ;;  %v6295_v53 = vld [vmem:[#allocation94_spill] sm:$0xff]  ;;  %v6296_v55 = vld [vmem:[#allocation95_spill] sm:$0xff]  ;;  %v6297_v3 = vld [vmem:[#allocation96_spill] sm:$0xff] }
 0x51a   : > { %2446 = vmatpush1.msra.mxu0 %v6236_v1  ;;  %2517 = vmatpush1.msra.mxu1 %v6237_v2  ;;  %v6298_v1 = vld [vmem:[#allocation97_spill] sm:$0xff]  ;;  %v6299_v2 = vld [vmem:[#allocation98_spill] sm:$0xff] }
 0x51b   : > { %2447 = vmatprep.subr.mxu0 %v6238_v4  ;;  %2518 = vmatprep.subr.mxu1 %v6239_v56  ;;  %v6300_v4 = vld [vmem:[#allocation99_spill] sm:$0xff]  ;;  %v6301_v56 = vld [vmem:[#allocation100_spill] sm:$0xff] }
 0x51c   : > { %2448 = vmatpush2.msra.mxu0 %v6240_v62  ;;  %2519 = vmatpush2.msra.mxu1 %v6241_v8  ;;  %v3174_v62 = vld [vmem:[%s3408_s17 + $0x1e8] sm:$0xff]  ;;  %v3175_v8 = vld [vmem:[%s3408_s17 + $0x1f8] sm:$0xff] }
 0x51d   : > { %2449 = vmatprep.subr.mxu0 %v6242_v59  ;;  %2520 = vmatprep.subr.mxu1 %v6243_v54  ;;  %v2072_v59 = vld [vmem:[#allocation6] sm:$0xf]  ;;  %v6302_v54 = vld [vmem:[#allocation74_spill] sm:$0xff] }
 0x51e   : > { %2450 = vmatpush2.msra.mxu0 %v6244_v52  ;;  %2521 = vmatpush2.msra.mxu1 %v6245_v17  ;;  %v2077_v52 = vrot.slane %v2072_v59, %v6302_v54  ;;  %v6303_v17 = vld [vmem:[#allocation75_spill] sm:$0xff] }
 0x51f   : > { %2451 = vmatprep.subr.mxu0 %v6246_v18  ;;  %2522 = vmatprep.subr.mxu1 %v6247_v19  ;;  %v2081_v18 = vrot.slane %v2072_v59, %v6303_v17 }
 0x520   : > { %2452 = vmatpush2.msra.mxu0 %v6248_v20  ;;  %2523 = vmatpush2.msra.mxu1 %v6249_v21  ;;  %v6304_v21 = vld [vmem:[#allocation77_spill] sm:$0xff] }
 0x521   : > { %2453 = vmatprep.subr.mxu0 %v6250_v22  ;;  %2524 = vmatprep.subr.mxu1 %v6251_v23  ;;  %v2085_v22 = vrot.slane %v2072_v59, %v6304_v21 }
 0x522   : > { %2454 = vmatpush2.msra.mxu0 %v6252_v24  ;;  %2525 = vmatpush2.msra.mxu1 %v6253_v25 }
 0x523   : > { %2455 = vmatprep.subr.mxu0 %v6254_v26  ;;  %2526 = vmatprep.subr.mxu1 %v6255_v27 }
 0x524   : > { %2456 = vmatpush2.msra.mxu0 %v6256_v28  ;;  %2527 = vmatpush2.msra.mxu1 %v6257_v30  ;;  %v2089_v30 = vrot.slane %v2072_v59, %v4077_v57  ;;  %v3180_v59 = vld [vmem:[%s3408_s17 + $0x1c0] sm:$0xff] }
 0x525   : > { %2457 = vmatprep.subr.mxu0 %v6258_v60  ;;  %2528 = vmatprep.subr.mxu1 %v6259_v63 }
 0x526   : > { %2458 = vmatpush2.msra.mxu0 %v6260_v36  ;;  %2529 = vmatpush2.msra.mxu1 %v6261_v6 }
 0x527   : > { %2459 = vmatprep.subr.mxu0 %v6262_v58  ;;  %2530 = vmatprep.subr.mxu1 %v6263_v5 }
 0x528   : > { %2460 = vmatpush2.msra.mxu0 %v6264_v11  ;;  %2531 = vmatpush2.msra.mxu1 %v6265_v33 }
 0x529   : > { %2461 = vmatprep.subr.mxu0 %v6266_v34  ;;  %2532 = vmatprep.subr.mxu1 %v6267_v16 }
 0x52a   : > { %2462 = vmatpush2.msra.mxu0 %v6268_v38  ;;  %2533 = vmatpush2.msra.mxu1 %v6269_v10 }
 0x52b   : > { %2463 = vmatprep.subr.mxu0 %v6270_v7  ;;  %2534 = vmatprep.subr.mxu1 %v6271_v12 }
 0x52c   : > { %2464 = vmatpush2.msra.mxu0 %v6272_v15  ;;  %2535 = vmatpush2.msra.mxu1 %v6273_v0 }
 0x52d   : > { %2465 = vmatprep.subr.mxu0 %v6274_v50  ;;  %2536 = vmatprep.subr.mxu1 %v6275_v61 }
 0x52e   : > { %2466 = vmatpush2.msra.mxu0 %v6276_v9  ;;  %2537 = vmatpush2.msra.mxu1 %v6277_v31 }
 0x52f   : > { %2467 = vmatprep.subr.mxu0 %v6278_v29  ;;  %2538 = vmatprep.subr.mxu1 %v6279_v13  ;;  %v2950_v29 = vld [vmem:[%s5347_s5 + $0x30] sm:$0xff] }
 0x530   : > { %2468 = vmatpush2.msra.mxu0 %v6280_v14  ;;  %2539 = vmatpush2.msra.mxu1 %v6281_v35  ;;  %v3177_v14 = vld [vmem:[%s3408_s17 + $0x1f0] sm:$0xff] }
 0x531   : > { %2469 = vmatprep.subr.mxu0 %v6282_v37  ;;  %2540 = vmatprep.subr.mxu1 %v6283_v39 }
 0x532   : > { %2470 = vmatpush2.msra.mxu0 %v6284_v40  ;;  %2541 = vmatpush2.msra.mxu1 %v6285_v41 }
 0x533   : > { %2471 = vmatprep.subr.mxu0 %v6286_v42  ;;  %2542 = vmatprep.subr.mxu1 %v6287_v43 }
 0x534   : > { %2472 = vmatpush2.msra.mxu0 %v6288_v44  ;;  %2543 = vmatpush2.msra.mxu1 %v6289_v45 }
 0x535   : > { %2473 = vmatprep.subr.mxu0 %v6290_v46  ;;  %2544 = vmatprep.subr.mxu1 %v6291_v47 }
 0x536   : > { %2474 = vmatpush2.msra.mxu0 %v6292_v48  ;;  %2545 = vmatpush2.msra.mxu1 %v6293_v49 }
 0x537   : > { %2475 = vmatprep.subr.mxu0 %v6294_v51  ;;  %2546 = vmatprep.subr.mxu1 %v6295_v53 }
 0x538   : > { %2476 = vmatpush2.msra.mxu0 %v6296_v55  ;;  %2547 = vmatpush2.msra.mxu1 %v6297_v3 }
 0x539   : > { %2477 = vmatprep.subr.mxu0 %v6298_v1  ;;  %2548 = vmatprep.subr.mxu1 %v6299_v2 }
 0x53a   : > { %2478 = vmatpush2.msra.mxu0 %v6300_v4  ;;  %2549 = vmatpush2.msra.mxu1 %v6301_v56 }
 0x53b   : > { %2736 = vmatprep.subr.mxu0 %v3174_v62  ;;  %2807 = vmatprep.subr.mxu1 %v3175_v8  ;;  %v3178_v62 = vld [vmem:[%s3408_s17 + $0x1c8] sm:$0xff]  ;;  %v3179_v8 = vld [vmem:[%s3408_s17 + $0x1d8] sm:$0xff] }
 0x5bb   : > { %v2160_v19 = vpop.f32.mrf.mxu0  ;;  %v2231_v24 = vpop.f32.mrf.mxu1 }
 0x5bc   : > { %v2161_v20 = vadd.f32 %v2160_v19, %v2077_v52  ;;  %v2232_v28 = vadd.f32 %v2231_v24, %v2085_v22  ;;  %v3181_v52 = vld [vmem:[%s3408_s17 + $0x1d0] sm:$0xff]  ;;  %v3183_v19 = vld [vmem:[%s3408_s17 + $0x1b8] sm:$0xff] }
 0x5bd   : > { %v2162_v23 = vpop.f32.mrf.mxu0  ;;  %v2233_v60 = vpop.f32.mrf.mxu1  ;;  %v3185_v22 = vld [vmem:[%s3408_s17 + $0x1b0] sm:$0xff]  ;;  %v3187_v24 = vld [vmem:[%s3408_s17 + $0x198] sm:$0xff] }
 0x5be   : > { %v2236_v25 = vmul.f32 0.5, %v2161_v20  ;;  %v2163_v26 = vadd.f32 %v2162_v23, %v2081_v18  ;;  %v2234_v63 = vadd.f32 %v2233_v60, %v2089_v30  ;;  %v3182_v18 = vld [vmem:[%s3408_s17 + $0x1a8] sm:$0xff]  ;;  %v3184_v20 = vld [vmem:[%s3408_s17 + $0x1a0] sm:$0xff]  ;;  %v3193_v60 = vld [vmem:[%s3408_s17 + $0x170] sm:$0xff] }
 0x5bf   : > { %v3186_v23 = vld [vmem:[%s3408_s17 + $0x188] sm:$0xff]  ;;  %v3192_v30 = vld [vmem:[%s3408_s17 + $0x160] sm:$0xff] }
 0x5c0   : > { %3016 = vtanh.f32 %v2236_v25  ;;  %v2240_v27 = vmul.f32 0.5, %v2163_v26  ;;  %v2245_v36 = vmul.f32 0.5, %v2234_v63  ;;  %v3188_v25 = vld [vmem:[%s3408_s17 + $0x180] sm:$0xff]  ;;  %v3189_v26 = vld [vmem:[%s3408_s17 + $0x190] sm:$0xff]  ;;  %v3194_v63 = vld [vmem:[%s3408_s17 + $0x148] sm:$0xff] }
 0x5c2   : > { %3018 = vtanh.f32 %v2240_v27  ;;  %v3190_v27 = vld [vmem:[%s3408_s17 + $0x168] sm:$0xff] }
 0x5c3   : > { %3020 = vtanh.f32 %v2232_v28  ;;  %v3191_v28 = vld [vmem:[%s3408_s17 + $0x178] sm:$0xff] }
 0x5c4   : > { %3022 = vtanh.f32 %v2245_v36  ;;  %v3195_v36 = vld [vmem:[%s3408_s17 + $0x158] sm:$0xff] }
 0x5cd   : > { %v3017_v6 = vpop.eup %3016 }
 0x5ce   : > { %v2238_v58 = vmul.f32 0.5, %v3017_v6  ;;  %v3196_v6 = vld [vmem:[%s3408_s17 + $0x140] sm:$0xff] }
 0x5cf   : > { %v3019_v5 = vpop.eup %3018 }
 0x5d0   : > { %v2239_v11 = vadd.f32 0.5, %v2238_v58  ;;  %v2242_v33 = vmul.f32 0.5, %v3019_v5  ;;  %v3021_v34 = vpop.eup %3020  ;;  %v3197_v58 = vld [vmem:[%s3408_s17 + $0x150] sm:$0xff]  ;;  %v3198_v5 = vld [vmem:[%s3408_s17 + $0x128] sm:$0xff] }
 0x5d1   : > { %v3023_v12 = vpop.eup %3022 }
 0x5d2   : > { %v2243_v16 = vadd.f32 0.5, %v2242_v33  ;;  %v2251_v10 = vmul.f32 %v3021_v34, %v2239_v11  ;;  %v2247_v15 = vmul.f32 0.5, %v3023_v12  ;;  %v3199_v11 = vld [vmem:[%s3408_s17 + $0x138] sm:$0xff]  ;;  %v3200_v33 = vld [vmem:[%s3408_s17 + $0x120] sm:$0xff]  ;;  %v3201_v34 = vld [vmem:[%s3408_s17 + $0x130] sm:$0xff] }
 0x5d3   : > { %v3205_v12 = vld [vmem:[%s3408_s17 + $0x110] sm:$0xff] }
 0x5d4   : > { %v2250_v38 = vmul.f32 %v2243_v16, %v5036_v32  ;;  %v2248_v0 = vadd.f32 0.5, %v2247_v15  ;;  %v3176_v32 = vld [vmem:[%s3408_s17 + $0x1e0] sm:$0xff]  ;;  %v3202_v16 = vld [vmem:[%s3408_s17 + $0x108] sm:$0xff] }
 0x5d5   : > { %v3206_v15 = vld [vmem:[%s3408_s17 + $0xe8] sm:$0xff] }
 0x5d6   : > { %v5178_v7 = vadd.f32 %v2251_v10, %v2250_v38  ;;  %v3203_v38 = vld [vmem:[%s3408_s17 + $0x118] sm:$0xff]  ;;  %v3204_v10 = vld [vmem:[%s3408_s17 + $0x100] sm:$0xff] }
 0x5d8   : > { %3024 = vtanh.f32 %v5178_v7 }
 0x5e5   : > { %v3025_v50 = vpop.eup %3024 }
 0x5e6   : > { %v2254_v9 = vmul.f32 %v3025_v50, %v2248_v0  ;;  %v3207_v0 = vld [vmem:[%s3408_s17 + $0xf8] sm:$0xff]  ;;  %v3208_v50 = vld [vmem:[%s3408_s17 + $0xe0] sm:$0xff] }
 0x5e8   : > { %2949 = vst [vmem:[%s5347_s5 + $0x28] sm:$0xff] %v2254_v9  ;;  %2479 = vmatprep.mubr.f32.mxu0 %v2254_v9  ;;  %2550 = vmatprep.mubr.f32.mxu1 %v2254_v9  ;;  %v3209_v9 = vld [vmem:[%s3408_s17 + $0xf0] sm:$0xff] }
 0x5e9   : > { %2480 = vmatmul.mubr.f32.vlgmr.msra.gmra.mxu0 %v2950_v29  ;;  %2551 = vmatmul.mubr.f32.vlgmr.msra.gmra.mxu1 %v2950_v29  ;;  %v3210_v29 = vld [vmem:[%s3408_s17 + $0xc8] sm:$0xff] }
 0x5ea   : > { %2737 = vmatpush1.msra.mxu0 %v3176_v32  ;;  %2808 = vmatpush1.msra.mxu1 %v3177_v14  ;;  %v3211_v32 = vld [vmem:[%s3408_s17 + $0xd8] sm:$0xff]  ;;  %v3212_v14 = vld [vmem:[%s3408_s17 + $0xc0] sm:$0xff] }
 0x5eb   : > { %2738 = vmatprep.subr.mxu0 %v3178_v62  ;;  %2809 = vmatprep.subr.mxu1 %v3179_v8  ;;  %v3213_v62 = vld [vmem:[%s3408_s17 + $0xd0] sm:$0xff]  ;;  %v3214_v8 = vld [vmem:[%s3408_s17 + $0xa8] sm:$0xff] }
 0x5ec   : > { %2739 = vmatpush1.msra.mxu0 %v3180_v59  ;;  %2810 = vmatpush1.msra.mxu1 %v3181_v52  ;;  %v3215_v59 = vld [vmem:[%s3408_s17 + $0xb8] sm:$0xff]  ;;  %v3216_v52 = vld [vmem:[%s3408_s17 + $0xa0] sm:$0xff] }
 0x5ed   : > { %2740 = vmatprep.subr.mxu0 %v3182_v18  ;;  %2811 = vmatprep.subr.mxu1 %v3183_v19  ;;  %v3217_v18 = vld [vmem:[%s3408_s17 + $0xb0] sm:$0xff]  ;;  %v3218_v19 = vld [vmem:[%s3408_s17 + $0x88] sm:$0xff] }
 0x5ee   : > { %2741 = vmatpush1.msra.mxu0 %v3184_v20  ;;  %2812 = vmatpush1.msra.mxu1 %v3185_v22  ;;  %v3219_v20 = vld [vmem:[%s3408_s17 + $0x98] sm:$0xff]  ;;  %v3220_v22 = vld [vmem:[%s3408_s17 + $0x80] sm:$0xff] }
 0x5ef   : > { %2742 = vmatprep.subr.mxu0 %v3186_v23  ;;  %2813 = vmatprep.subr.mxu1 %v3187_v24  ;;  %v3221_v23 = vld [vmem:[%s3408_s17 + $0x90] sm:$0xff]  ;;  %v3222_v24 = vld [vmem:[%s3408_s17 + $0x68] sm:$0xff] }
 0x5f0   : > { %2743 = vmatpush1.msra.mxu0 %v3188_v25  ;;  %2814 = vmatpush1.msra.mxu1 %v3189_v26  ;;  %v3223_v25 = vld [vmem:[%s3408_s17 + $0x78] sm:$0xff]  ;;  %v3224_v26 = vld [vmem:[%s3408_s17 + $0x60] sm:$0xff] }
 0x5f1   : > { %2744 = vmatprep.subr.mxu0 %v3190_v27  ;;  %2815 = vmatprep.subr.mxu1 %v3191_v28  ;;  %v3225_v27 = vld [vmem:[%s3408_s17 + $0x70] sm:$0xff]  ;;  %v3226_v28 = vld [vmem:[%s3408_s17 + $0x48] sm:$0xff] }
 0x5f2   : > { %2745 = vmatpush1.msra.mxu0 %v3192_v30  ;;  %2816 = vmatpush1.msra.mxu1 %v3193_v60  ;;  %v3227_v30 = vld [vmem:[%s3408_s17 + $0x58] sm:$0xff]  ;;  %v3228_v60 = vld [vmem:[%s3408_s17 + $0x40] sm:$0xff] }
 0x5f3   : > { %2746 = vmatprep.subr.mxu0 %v3194_v63  ;;  %2817 = vmatprep.subr.mxu1 %v3195_v36  ;;  %v3229_v63 = vld [vmem:[%s3408_s17 + $0x50] sm:$0xff]  ;;  %v3230_v36 = vld [vmem:[%s3408_s17 + $0x28] sm:$0xff] }
 0x5f4   : > { %2747 = vmatpush1.msra.mxu0 %v3196_v6  ;;  %2818 = vmatpush1.msra.mxu1 %v3197_v58  ;;  %v3231_v6 = vld [vmem:[%s3408_s17 + $0x38] sm:$0xff]  ;;  %v3232_v58 = vld [vmem:[%s3408_s17 + $0x20] sm:$0xff] }
 0x5f5   : > { %2748 = vmatprep.subr.mxu0 %v3198_v5  ;;  %2819 = vmatprep.subr.mxu1 %v3199_v11  ;;  %v3233_v5 = vld [vmem:[%s3408_s17 + $0x30] sm:$0xff]  ;;  %v3234_v11 = vld [vmem:[%s3408_s17 + $0x8] sm:$0xff] }
 0x5f6   : > { %2749 = vmatpush1.msra.mxu0 %v3200_v33  ;;  %2820 = vmatpush1.msra.mxu1 %v3201_v34  ;;  %v3235_v33 = vld [vmem:[%s3408_s17 + $0x18] sm:$0xff]  ;;  %v3236_v34 = vld [vmem:[%s3408_s17] sm:$0xff] }
 0x5f7   : > { %2750 = vmatprep.subr.mxu0 %v3202_v16  ;;  %2821 = vmatprep.subr.mxu1 %v3203_v38  ;;  %v3237_v16 = vld [vmem:[%s3408_s17 + $0x10] sm:$0xff]  ;;  %v3238_v38 = vld [vmem:[%s3408_s17 + $0x3e8] sm:$0xff] }
 0x5f8   : > { %2751 = vmatpush1.msra.mxu0 %v3204_v10  ;;  %2822 = vmatpush1.msra.mxu1 %v3205_v12  ;;  %v3239_v10 = vld [vmem:[%s3408_s17 + $0x3f8] sm:$0xff]  ;;  %v3240_v12 = vld [vmem:[%s3408_s17 + $0x3e0] sm:$0xff] }
 0x5f9   : > { %2752 = vmatprep.subr.mxu0 %v3206_v15  ;;  %2823 = vmatprep.subr.mxu1 %v3207_v0  ;;  %v3241_v15 = vld [vmem:[%s3408_s17 + $0x3f0] sm:$0xff]  ;;  %v3242_v0 = vld [vmem:[%s3408_s17 + $0x3c8] sm:$0xff] }
 0x5fa   : > { %2753 = vmatpush1.msra.mxu0 %v3208_v50  ;;  %2824 = vmatpush1.msra.mxu1 %v3209_v9  ;;  %v3243_v50 = vld [vmem:[%s3408_s17 + $0x3d8] sm:$0xff]  ;;  %v3244_v9 = vld [vmem:[%s3408_s17 + $0x3c0] sm:$0xff] }
 0x5fb   : > { %2754 = vmatprep.subr.mxu0 %v3210_v29  ;;  %2825 = vmatprep.subr.mxu1 %v3211_v32  ;;  %v3245_v29 = vld [vmem:[%s3408_s17 + $0x3d0] sm:$0xff]  ;;  %v3246_v32 = vld [vmem:[%s3408_s17 + $0x3a8] sm:$0xff] }
 0x5fc   : > { %2755 = vmatpush1.msra.mxu0 %v3212_v14  ;;  %2826 = vmatpush1.msra.mxu1 %v3213_v62  ;;  %v3247_v14 = vld [vmem:[%s3408_s17 + $0x3b8] sm:$0xff]  ;;  %v3248_v62 = vld [vmem:[%s3408_s17 + $0x3a0] sm:$0xff] }
 0x5fd   : > { %2756 = vmatprep.subr.mxu0 %v3214_v8  ;;  %2827 = vmatprep.subr.mxu1 %v3215_v59  ;;  %v3249_v8 = vld [vmem:[%s3408_s17 + $0x3b0] sm:$0xff]  ;;  %v3250_v59 = vld [vmem:[%s3408_s17 + $0x388] sm:$0xff] }
 0x5fe   : > { %2757 = vmatpush1.msra.mxu0 %v3216_v52  ;;  %2828 = vmatpush1.msra.mxu1 %v3217_v18  ;;  %v3251_v52 = vld [vmem:[%s3408_s17 + $0x398] sm:$0xff]  ;;  %v3252_v18 = vld [vmem:[%s3408_s17 + $0x380] sm:$0xff] }
 0x5ff   : > { %2758 = vmatprep.subr.mxu0 %v3218_v19  ;;  %2829 = vmatprep.subr.mxu1 %v3219_v20  ;;  %v3253_v19 = vld [vmem:[%s3408_s17 + $0x390] sm:$0xff]  ;;  %v3254_v20 = vld [vmem:[%s3408_s17 + $0x368] sm:$0xff] }
 0x600   : > { %2759 = vmatpush1.msra.mxu0 %v3220_v22  ;;  %2830 = vmatpush1.msra.mxu1 %v3221_v23  ;;  %v3255_v22 = vld [vmem:[%s3408_s17 + $0x378] sm:$0xff]  ;;  %v3256_v23 = vld [vmem:[%s3408_s17 + $0x360] sm:$0xff] }
 0x601   : > { %2760 = vmatprep.subr.mxu0 %v3222_v24  ;;  %2831 = vmatprep.subr.mxu1 %v3223_v25  ;;  %v3257_v24 = vld [vmem:[%s3408_s17 + $0x370] sm:$0xff]  ;;  %v3258_v25 = vld [vmem:[%s3408_s17 + $0x348] sm:$0xff] }
 0x602   : > { %2761 = vmatpush1.msra.mxu0 %v3224_v26  ;;  %2832 = vmatpush1.msra.mxu1 %v3225_v27  ;;  %v3259_v26 = vld [vmem:[%s3408_s17 + $0x358] sm:$0xff]  ;;  %v3260_v27 = vld [vmem:[%s3408_s17 + $0x340] sm:$0xff] }
 0x603   : > { %2762 = vmatprep.subr.mxu0 %v3226_v28  ;;  %2833 = vmatprep.subr.mxu1 %v3227_v30  ;;  %v3261_v28 = vld [vmem:[%s3408_s17 + $0x350] sm:$0xff]  ;;  %v3262_v30 = vld [vmem:[%s3408_s17 + $0x328] sm:$0xff] }
 0x604   : > { %2763 = vmatpush1.msra.mxu0 %v3228_v60  ;;  %2834 = vmatpush1.msra.mxu1 %v3229_v63  ;;  %v3263_v60 = vld [vmem:[%s3408_s17 + $0x338] sm:$0xff]  ;;  %v3264_v63 = vld [vmem:[%s3408_s17 + $0x320] sm:$0xff] }
 0x605   : > { %2764 = vmatprep.subr.mxu0 %v3230_v36  ;;  %2835 = vmatprep.subr.mxu1 %v3231_v6  ;;  %v3265_v36 = vld [vmem:[%s3408_s17 + $0x330] sm:$0xff]  ;;  %v3266_v6 = vld [vmem:[%s3408_s17 + $0x308] sm:$0xff] }
 0x606   : > { %2765 = vmatpush1.msra.mxu0 %v3232_v58  ;;  %2836 = vmatpush1.msra.mxu1 %v3233_v5  ;;  %v3267_v58 = vld [vmem:[%s3408_s17 + $0x318] sm:$0xff]  ;;  %v3268_v5 = vld [vmem:[%s3408_s17 + $0x300] sm:$0xff] }
 0x607   : > { %2766 = vmatprep.subr.mxu0 %v3234_v11  ;;  %2837 = vmatprep.subr.mxu1 %v3235_v33  ;;  %v3269_v11 = vld [vmem:[%s3408_s17 + $0x310] sm:$0xff]  ;;  %v3270_v33 = vld [vmem:[%s3408_s17 + $0x2e8] sm:$0xff] }
 0x608   : > { %2767 = vmatpush1.msra.mxu0 %v3236_v34  ;;  %2838 = vmatpush1.msra.mxu1 %v3237_v16  ;;  %v3271_v34 = vld [vmem:[%s3408_s17 + $0x2f8] sm:$0xff]  ;;  %v3272_v16 = vld [vmem:[%s3408_s17 + $0x2e0] sm:$0xff] }
 0x609   : > { %2768 = vmatprep.subr.mxu0 %v3238_v38  ;;  %2839 = vmatprep.subr.mxu1 %v3239_v10  ;;  %v3273_v38 = vld [vmem:[%s3408_s17 + $0x2f0] sm:$0xff]  ;;  %v3274_v10 = vld [vmem:[%s3408_s17 + $0x2c8] sm:$0xff] }
 0x60a   : > { %2769 = vmatpush2.msra.mxu0 %v3240_v12  ;;  %2840 = vmatpush2.msra.mxu1 %v3241_v15  ;;  %v3275_v12 = vld [vmem:[%s3408_s17 + $0x2c0] sm:$0xff]  ;;  %v3276_v15 = vld [vmem:[%s3408_s17 + $0x2a8] sm:$0xff] }
 0x60b   : > { %2770 = vmatprep.subr.mxu0 %v3242_v0  ;;  %2841 = vmatprep.subr.mxu1 %v3243_v50  ;;  %v3277_v0 = vld [vmem:[%s3408_s17 + $0x2a0] sm:$0xff] }
 0x60c   : > { %2771 = vmatpush2.msra.mxu0 %v3244_v9  ;;  %2842 = vmatpush2.msra.mxu1 %v3245_v29 }
 0x60d   : > { %2772 = vmatprep.subr.mxu0 %v3246_v32  ;;  %2843 = vmatprep.subr.mxu1 %v3247_v14 }
 0x60e   : > { %2773 = vmatpush2.msra.mxu0 %v3248_v62  ;;  %2844 = vmatpush2.msra.mxu1 %v3249_v8 }
 0x60f   : > { %2774 = vmatprep.subr.mxu0 %v3250_v59  ;;  %2845 = vmatprep.subr.mxu1 %v3251_v52  ;;  %v2952_v59 = vld [vmem:[%s5347_s5 + $0x38] sm:$0xff] }
 0x610   : > { %2775 = vmatpush2.msra.mxu0 %v3252_v18  ;;  %2846 = vmatpush2.msra.mxu1 %v3253_v19 }
 0x611   : > { %2776 = vmatprep.subr.mxu0 %v3254_v20  ;;  %2847 = vmatprep.subr.mxu1 %v3255_v22 }
 0x612   : > { %2777 = vmatpush2.msra.mxu0 %v3256_v23  ;;  %2848 = vmatpush2.msra.mxu1 %v3257_v24 }
 0x613   : > { %2778 = vmatprep.subr.mxu0 %v3258_v25  ;;  %2849 = vmatprep.subr.mxu1 %v3259_v26 }
 0x614   : > { %2779 = vmatpush2.msra.mxu0 %v3260_v27  ;;  %2850 = vmatpush2.msra.mxu1 %v3261_v28 }
 0x615   : > { %2780 = vmatprep.subr.mxu0 %v3262_v30  ;;  %2851 = vmatprep.subr.mxu1 %v3263_v60 }
 0x616   : > { %2781 = vmatpush2.msra.mxu0 %v3264_v63  ;;  %2852 = vmatpush2.msra.mxu1 %v3265_v36 }
 0x617   : > { %2782 = vmatprep.subr.mxu0 %v3266_v6  ;;  %2853 = vmatprep.subr.mxu1 %v3267_v58 }
 0x618   : > { %2783 = vmatpush2.msra.mxu0 %v3268_v5  ;;  %2854 = vmatpush2.msra.mxu1 %v3269_v11 }
 0x619   : > { %2784 = vmatprep.subr.mxu0 %v3270_v33  ;;  %2855 = vmatprep.subr.mxu1 %v3271_v34 }
 0x61a   : > { %2785 = vmatpush2.msra.mxu0 %v3272_v16  ;;  %2856 = vmatpush2.msra.mxu1 %v3273_v38 }
 0x61b   : > { %2786 = vmatprep.subr.mxu0 %v3274_v10  ;;  %2857 = vmatprep.subr.mxu1 %v6275_v61  ;;  %v2393_v61 = vld [vmem:[#allocation6] sm:$0xf] }
 0x61c   : > { %2787 = vmatpush2.msra.mxu0 %v3275_v12  ;;  %2858 = vmatpush2.msra.mxu1 %v6277_v31  ;;  %v2398_v31 = vrot.slane %v2393_v61, %v6302_v54 }
 0x61d   : > { %2788 = vmatprep.subr.mxu0 %v3276_v15  ;;  %2859 = vmatprep.subr.mxu1 %v6279_v13  ;;  %v2402_v13 = vrot.slane %v2393_v61, %v6303_v17 }
 0x61e   : > { %2789 = vmatpush2.msra.mxu0 %v3277_v0  ;;  %2860 = vmatpush2.msra.mxu1 %v6281_v35 }
 0x61f   : > { %2790 = vmatprep.subr.mxu0 %v6282_v37  ;;  %2861 = vmatprep.subr.mxu1 %v6283_v39  ;;  %v2406_v39 = vrot.slane %v2393_v61, %v6304_v21 }
 0x620   : > { %2791 = vmatpush2.msra.mxu0 %v6284_v40  ;;  %2862 = vmatpush2.msra.mxu1 %v6285_v41 }
 0x621   : > { %2792 = vmatprep.subr.mxu0 %v6286_v42  ;;  %2863 = vmatprep.subr.mxu1 %v6287_v43 }
 0x622   : > { %2793 = vmatpush2.msra.mxu0 %v6288_v44  ;;  %2864 = vmatpush2.msra.mxu1 %v6289_v45 }
 0x623   : > { %2794 = vmatprep.subr.mxu0 %v6290_v46  ;;  %2865 = vmatprep.subr.mxu1 %v6291_v47  ;;  %v2410_v46 = vrot.slane %v2393_v61, %v4077_v57 }
 0x624   : > { %2795 = vmatpush2.msra.mxu0 %v6292_v48  ;;  %2866 = vmatpush2.msra.mxu1 %v6293_v49 }
 0x625   : > { %2796 = vmatprep.subr.mxu0 %v6294_v51  ;;  %2867 = vmatprep.subr.mxu1 %v6295_v53 }
 0x626   : > { %2797 = vmatpush2.msra.mxu0 %v6296_v55  ;;  %2868 = vmatpush2.msra.mxu1 %v6297_v3 }
 0x627   : > { %2798 = vmatprep.subr.mxu0 %v6298_v1  ;;  %2869 = vmatprep.subr.mxu1 %v6299_v2 }
 0x628   : > { %2799 = vmatpush2.msra.mxu0 %v6300_v4  ;;  %2870 = vmatpush2.msra.mxu1 %v6301_v56 }
 0x6a9   : > { %v2481_v35 = vpop.f32.mrf.mxu0  ;;  %v2552_v41 = vpop.f32.mrf.mxu1 }
 0x6aa   : > { %v2482_v37 = vadd.f32 %v2481_v35, %v2398_v31  ;;  %v2553_v45 = vadd.f32 %v2552_v41, %v2406_v39 }
 0x6ab   : > { %v2483_v40 = vpop.f32.mrf.mxu0  ;;  %v2554_v47 = vpop.f32.mrf.mxu1 }
 0x6ac   : > { %v2557_v42 = vmul.f32 0.5, %v2482_v37  ;;  %v2484_v43 = vadd.f32 %v2483_v40, %v2402_v13  ;;  %v2555_v48 = vadd.f32 %v2554_v47, %v2410_v46 }
 0x6ae   : > { %3026 = vtanh.f32 %v2557_v42  ;;  %v2561_v44 = vmul.f32 0.5, %v2484_v43  ;;  %v2566_v49 = vmul.f32 0.5, %v2555_v48 }
 0x6b0   : > { %3028 = vtanh.f32 %v2561_v44 }
 0x6b1   : > { %3030 = vtanh.f32 %v2553_v45 }
 0x6b2   : > { %3032 = vtanh.f32 %v2566_v49 }
 0x6bb   : > { %v3027_v51 = vpop.eup %3026 }
 0x6bc   : > { %v2559_v53 = vmul.f32 0.5, %v3027_v51 }
 0x6bd   : > { %v3029_v55 = vpop.eup %3028 }
 0x6be   : > { %v2560_v3 = vadd.f32 0.5, %v2559_v53  ;;  %v2563_v1 = vmul.f32 0.5, %v3029_v55  ;;  %v3031_v2 = vpop.eup %3030 }
 0x6bf   : > { %v3033_v29 = vpop.eup %3032 }
 0x6c0   : > { %v2564_v4 = vadd.f32 0.5, %v2563_v1  ;;  %v2572_v50 = vmul.f32 %v3031_v2, %v2560_v3  ;;  %v2568_v32 = vmul.f32 0.5, %v3033_v29 }
 0x6c2   : > { %v2571_v56 = vmul.f32 %v2564_v4, %v5178_v7  ;;  %v2569_v14 = vadd.f32 0.5, %v2568_v32  ;;  %v2714_v7 = vld [vmem:[#allocation6] sm:$0xf] }
 0x6c3   : > { %v2719_v52 = vrot.slane %v2714_v7, %v6302_v54  ;;  %v2723_v18 = vrot.slane %v2714_v7, %v6303_v17  ;;  %v2727_v22 = vrot.slane %v2714_v7, %v6304_v21  ;;  %v2731_v30 = vrot.slane %v2714_v7, %v4077_v57 }
 0x6c4   : > { %v2573_v9 = vadd.f32 %v2572_v50, %v2571_v56 }
 0x6c6   : > { %3034 = vtanh.f32 %v2573_v9 }
 0x6d3   : > { %v3035_v62 = vpop.eup %3034 }
 0x6d4   : > { %v2575_v8 = vmul.f32 %v3035_v62, %v2569_v14 }
 0x6d6   : > { %2951 = vst [vmem:[%s5347_s5 + $0x30] sm:$0xff] %v2575_v8  ;;  %2800 = vmatprep.mubr.f32.mxu0 %v2575_v8  ;;  %2871 = vmatprep.mubr.f32.mxu1 %v2575_v8 }
 0x6d7   : > { %2801 = vmatmul.mubr.f32.vlgmr.msra.gmra.mxu0 %v2952_v59  ;;  %2872 = vmatmul.mubr.f32.vlgmr.msra.gmra.mxu1 %v2952_v59 }
 0x797   : > { %v2802_v19 = vpop.f32.mrf.mxu0  ;;  %v2873_v24 = vpop.f32.mrf.mxu1 }
 0x798   : > { %v2803_v20 = vadd.f32 %v2802_v19, %v2719_v52  ;;  %v2874_v28 = vadd.f32 %v2873_v24, %v2727_v22 }
 0x799   : > { %v2804_v23 = vpop.f32.mrf.mxu0  ;;  %v2875_v60 = vpop.f32.mrf.mxu1 }
 0x79a   : > { %v2878_v25 = vmul.f32 0.5, %v2803_v20  ;;  %v2805_v26 = vadd.f32 %v2804_v23, %v2723_v18  ;;  %v2876_v54 = vadd.f32 %v2875_v60, %v2731_v30 }
 0x79c   : > { %3036 = vtanh.f32 %v2878_v25  ;;  %v2882_v27 = vmul.f32 0.5, %v2805_v26  ;;  %v2887_v63 = vmul.f32 0.5, %v2876_v54 }
 0x79e   : > { %3038 = vtanh.f32 %v2882_v27 }
 0x79f   : > { %3040 = vtanh.f32 %v2874_v28 }
 0x7a0   : > { %3042 = vtanh.f32 %v2887_v63 }
 0x7a9   : > { %v3037_v17 = vpop.eup %3036 }
 0x7aa   : > { %v2880_v36 = vmul.f32 0.5, %v3037_v17 }
 0x7ab   : > { %v3039_v6 = vpop.eup %3038 }
 0x7ac   : > { %v2881_v21 = vadd.f32 0.5, %v2880_v36  ;;  %v2884_v58 = vmul.f32 0.5, %v3039_v6  ;;  %v3041_v5 = vpop.eup %3040 }
 0x7ad   : > { %v3043_v57 = vpop.eup %3042 }
 0x7ae   : > { %v2885_v11 = vadd.f32 0.5, %v2884_v58  ;;  %v2893_v34 = vmul.f32 %v3041_v5, %v2881_v21  ;;  %v2889_v38 = vmul.f32 0.5, %v3043_v57 }
 0x7b0   : > { %v2892_v33 = vmul.f32 %v2885_v11, %v2573_v9  ;;  %v2890_v10 = vadd.f32 0.5, %v2889_v38 }
 0x7b2   : > { %v2894_v16 = vadd.f32 %v2893_v34, %v2892_v33 }
 0x7b4   : > { %3044 = vtanh.f32 %v2894_v16  ;;  %2905 = vst [vmem:[%s2904_s14] sm:$0xff] %v2894_v16 }
 0x7c0   :  { %57 = sbr.rel (!%p55_p5) target bundleno = 18 (0x12), region = 80 }
 0x7c1   : > { %v3045_v12 = vpop.eup %3044 }
 0x7c2   : > { %v2896_v15 = vmul.f32 %v3045_v12, %v2890_v10 }
 0x7c4   : > { %2953 = vst [vmem:[%s5347_s5 + $0x38] sm:$0xff] %v2896_v15  ;;  %2902 = vst [vmem:[%s2901_s0] sm:$0xff] %v2896_v15 }
 0x7c5   :  { %2918 = vsyncpa [#allocation8], 1 }

</bundles_post_ra>
